<compile_context>
chip_gen: v7x
topology: tpu7x:2x2x1
jax: 0.10.0
libtpu: 0.0.40
codegen_flags: <defaults>
</compile_context>

<pallas_src>
import functools

import jax
import jax.numpy as jnp
from jax.experimental import pallas as pl
from jax.experimental.pallas import tpu as pltpu

INPUT_SIZE = 3
HIDDEN_SIZE = 512    # matches the PyTorch module default
OUTPUT_SIZE = 1
NUM_LAYERS = 5
DROPOUT = 0.0        # nn.Dropout(0) is a no-op in forward
LANE = 128


def _round_up(n, m):
    return ((n + m - 1) // m) * m


def _cdiv(a, b):
    return (a + b - 1) // b


def _tpu_vmem_bytes():
    """Physical VMEM per TensorCore; conservative fallback if query fails."""
    try:
        return int(pltpu.get_tpu_info().vmem_capacity_bytes)
    except Exception:
        return 64 * 1024 * 1024   # v7x-sized conservative default


_VMEM_BYTES = _tpu_vmem_bytes()
_VMEM_LIMIT = int(_VMEM_BYTES * 0.75)
# Big tiles on 128-MiB parts (v5e/v6e), smaller on 64-MiB v7x.
MAX_TILE_B = 2048 if _VMEM_BYTES >= 100 * 1024 * 1024 else 1024


def _select_tile(batch, max_tile_b):
    """Balanced tiles; guarantee >=2 grid steps for megacore when batch is big."""
    num_tiles = max(1, _cdiv(batch, max_tile_b))
    if num_tiles == 1 and batch > 512:
        # v7x has 2 TCs; a single tile would idle one of them. On 1-TC parts
        # the extra grid step costs ~0.35us, which is noise.
        num_tiles = 2
    tb = _round_up(_cdiv(batch, num_tiles), 8)
    padded = tb * num_tiles
    return tb, padded, num_tiles


def _const_spec(shape, index_map):
    """Constant-index block: single-buffered (no point double-buffering it)."""
    try:
        return pl.BlockSpec(shape, index_map, pipeline_mode=pl.Buffered(1))
    except TypeError:  # older jax without pipeline_mode kwarg
        return pl.BlockSpec(shape, index_map)


def _mlp_kernel(num_layers, input_size,
                x_ref, w_in_ref, b_in_ref, w_h_ref, b_h_ref,
                w_out_pad_ref, b_out_pad_ref, o_ref):
    """One batch tile through the whole MLP."""
    x = x_ref[...]                                       # (TB, IN) f32

    # fc_in on the VPU: K=3 would waste an MXU pass, so use broadcast FMAs.
    h = b_in_ref[...]                                    # (1, H) f32
    for k in range(input_size):                          # static -> unrolled
        h = h + x[:, k:k + 1] * w_in_ref[k:k + 1, :]     # (TB,1)*(1,H)
    h = jnp.maximum(h, 0.0)                              # (TB, H) f32

    # Hidden fc blocks on the MXU: bf16 inputs, f32 accumulation + f32 ReLU.
    for l in range(num_layers):                          # static -> unrolled
        h = jnp.dot(h.astype(jnp.bfloat16), w_h_ref[l],
                    preferred_element_type=jnp.float32) + b_h_ref[l]
        h = jnp.maximum(h, 0.0)

    # fc_out as an MXU dot against zero-padded (H, 128) weights -> lane-dense
    # (TB, 128) store; wrapper slices the real OUTPUT_SIZE columns.
    o = jnp.dot(h.astype(jnp.bfloat16), w_out_pad_ref[...],
                preferred_element_type=jnp.float32) + b_out_pad_ref[...]
    o_ref[...] = o.astype(o_ref.dtype)


def prepare_params(params):
    """One-time packing: bf16 weights + lane-padded fc_out. Do NOT call per step."""
    w_in, b_in, w_h, b_h, w_out, b_out = params
    out_pad = _round_up(OUTPUT_SIZE, LANE)
    w_h_bf16 = w_h.astype(jnp.bfloat16)                              # (L, H, H)
    w_out_pad = jnp.pad(w_out.astype(jnp.bfloat16),
                        ((0, 0), (0, out_pad - OUTPUT_SIZE)))        # (H, 128)
    b_out_pad = jnp.pad(b_out.astype(jnp.float32),
                        ((0, 0), (0, out_pad - OUTPUT_SIZE)))        # (1, 128)
    return (w_in.astype(jnp.float32), b_in.astype(jnp.float32),
            w_h_bf16, b_h.astype(jnp.float32), w_out_pad, b_out_pad)


def mlp_v1_forward(x, prepared_params, max_tile_b=MAX_TILE_B):
    """x: any shape whose trailing dims flatten to (-1, INPUT_SIZE)."""
    w_in, b_in, w_h_bf16, b_h, w_out_pad, b_out_pad = prepared_params
    out_pad = w_out_pad.shape[1]

    x2d = x.reshape(-1, INPUT_SIZE).astype(jnp.float32)
    batch = x2d.shape[0]

    tb, padded, num_tiles = _select_tile(batch, max_tile_b)
    if padded != batch:
        # Zero rows flow through bias/ReLU harmlessly and are sliced off.
        x2d = jnp.pad(x2d, ((0, padded - batch), (0, 0)))
    grid = (num_tiles,)

    H, L = HIDDEN_SIZE, NUM_LAYERS
    flops = 2 * padded * (INPUT_SIZE * H + L * H * H + H * out_pad)
    bytes_accessed = (padded * (INPUT_SIZE + out_pad) * 4
                      + w_h_bf16.size * 2 + w_out_pad.size * 2
                      + (w_in.size + b_in.size + b_h.size + b_out_pad.size) * 4)

    kernel = functools.partial(_mlp_kernel, NUM_LAYERS, INPUT_SIZE)
    const2 = lambda i: (0, 0)
    const3 = lambda i: (0, 0, 0)

    out = pl.pallas_call(
        kernel,
        out_shape=jax.ShapeDtypeStruct((padded, out_pad), jnp.float32),
        grid=grid,
        in_specs=[
            pl.BlockSpec((tb, INPUT_SIZE), lambda i: (i, 0)),               # x tile
            _const_spec((INPUT_SIZE, HIDDEN_SIZE), const2),                 # w_in (f32)
            _const_spec((1, HIDDEN_SIZE), const2),                          # b_in
            _const_spec((NUM_LAYERS, HIDDEN_SIZE, HIDDEN_SIZE), const3),    # w_h (bf16)
            _const_spec((NUM_LAYERS, 1, HIDDEN_SIZE), const3),              # b_h
            _const_spec((HIDDEN_SIZE, out_pad), const2),                    # w_out padded (bf16)
            _const_spec((1, out_pad), const2),                              # b_out padded
        ],
        out_specs=pl.BlockSpec((tb, out_pad), lambda i: (i, 0)),            # lane-dense
        compiler_params=pltpu.CompilerParams(
            dimension_semantics=("parallel",),
            vmem_limit_bytes=_VMEM_LIMIT),
        cost_estimate=pl.CostEstimate(flops=flops, transcendentals=0,
                                      bytes_accessed=bytes_accessed),
    )(x2d, w_in, b_in, w_h_bf16, b_h, w_out_pad, b_out_pad)

    return out[:batch, :OUTPUT_SIZE]


def init_params(key):
    """Deterministic init mimicking PyTorch Linear default (U[-1/sqrt(fan_in), +])."""
    ks = jax.random.split(key, 8)

    def linear(kw, kb, fan_in, fan_out):
        bound = 1.0 / jnp.sqrt(jnp.float32(fan_in))
        w = jax.random.uniform(kw, (fan_in, fan_out), jnp.float32, -bound, bound)
        b = jax.random.uniform(kb, (1, fan_out), jnp.float32, -bound, bound)
        return w, b

    w_in, b_in = linear(ks[0], ks[1], INPUT_SIZE, HIDDEN_SIZE)

    w_h_list, b_h_list = [], []
    kh = jax.random.split(ks[2], 2 * NUM_LAYERS)
    for l in range(NUM_LAYERS):
        w, b = linear(kh[2 * l], kh[2 * l + 1], HIDDEN_SIZE, HIDDEN_SIZE)
        w_h_list.append(w)
        b_h_list.append(b)
    w_h = jnp.stack(w_h_list)          # (L, H, H)
    b_h = jnp.stack(b_h_list)          # (L, 1, H)

    w_out, b_out = linear(ks[3], ks[4], HIDDEN_SIZE, OUTPUT_SIZE)
    return (w_in, b_in, w_h, b_h, w_out, b_out)


def _reference_forward(x, params):
    """Pure-JAX f32 reference for sanity checking."""
    w_in, b_in, w_h, b_h, w_out, b_out = params
    h = x.reshape(-1, INPUT_SIZE).astype(jnp.float32)
    h = jnp.maximum(h @ w_in + b_in, 0.0)
    for l in range(NUM_LAYERS):
        h = jnp.maximum(h @ w_h[l] + b_h[l], 0.0)
    return h @ w_out + b_out


if __name__ == "__main__":
    key = jax.random.PRNGKey(0)
    k_x, k_p = jax.random.split(key)

    # x.view(-1, 3) -> (8, 3) rows through the MLP
    x = jax.random.normal(k_x, (2, 4, INPUT_SIZE), dtype=jnp.float32)
    params = init_params(k_p)
    prepared = prepare_params(params)     # one-time bf16 cast / fc_out padding

    out = jax.block_until_ready(mlp_v1_forward(x, prepared))
    ref = _reference_forward(x, params)

    assert out.shape == (8, OUTPUT_SIZE), out.shape
    # bf16 MXU inputs (f32 accumulation) vs pure-f32 reference -> loose tol.
    assert jnp.allclose(out, ref, atol=2e-2, rtol=2e-2), "mismatch vs reference"

    print("KERNEL_OK")
</pallas_src>

<mosaic_0001>
module attributes {stable_mosaic.version = 11 : i64} {
  func.func @_mlp_kernel(%arg0: i32, %arg1: memref<8x3xf32, #tpu.memory_space<vmem>>, %arg2: memref<3x512xf32, #tpu.memory_space<vmem>>, %arg3: memref<1x512xf32, #tpu.memory_space<vmem>>, %arg4: memref<5x512x512xbf16, #tpu.memory_space<vmem>>, %arg5: memref<5x1x512xf32, #tpu.memory_space<vmem>>, %arg6: memref<512x128xbf16, #tpu.memory_space<vmem>>, %arg7: memref<1x128xf32, #tpu.memory_space<vmem>>, %arg8: memref<8x128xf32, #tpu.memory_space<vmem>>) attributes {dimension_semantics = [#tpu.dimension_semantics<parallel>], iteration_bounds = array<i64: 1>, scalar_prefetch = 0 : i64, scratch_operands = 0 : i64, tpu.core_type = #tpu.core_type<tc>, window_params = [{transform_indices = @transform_0, window_bounds = array<i64: 8, 3>}, {pipeline_mode = #tpu.pipeline_mode<synchronous>, transform_indices = @transform_1, window_bounds = array<i64: 3, 512>}, {pipeline_mode = #tpu.pipeline_mode<synchronous>, transform_indices = @transform_2, window_bounds = array<i64: 1, 512>}, {pipeline_mode = #tpu.pipeline_mode<synchronous>, transform_indices = @transform_3, window_bounds = array<i64: 5, 512, 512>}, {pipeline_mode = #tpu.pipeline_mode<synchronous>, transform_indices = @transform_4, window_bounds = array<i64: 5, 1, 512>}, {pipeline_mode = #tpu.pipeline_mode<synchronous>, transform_indices = @transform_5, window_bounds = array<i64: 512, 128>}, {pipeline_mode = #tpu.pipeline_mode<synchronous>, transform_indices = @transform_6, window_bounds = array<i64: 1, 128>}, {transform_indices = @transform_7, window_bounds = array<i64: 8, 128>}]} {
    %c0 = arith.constant 0 : index
    %c0_0 = arith.constant 0 : index
    %0 = vector.load %arg1[%c0, %c0_0] : memref<8x3xf32, #tpu.memory_space<vmem>>, vector<8x3xf32>
    %c0_1 = arith.constant 0 : index
    %c0_2 = arith.constant 0 : index
    %1 = vector.load %arg3[%c0_1, %c0_2] : memref<1x512xf32, #tpu.memory_space<vmem>>, vector<1x512xf32>
    %2 = vector.extract_strided_slice %0 {offsets = [0, 0], sizes = [8, 1], strides = [1, 1]} : vector<8x3xf32> to vector<8x1xf32>
    %c0_3 = arith.constant 0 : index
    %c0_4 = arith.constant 0 : index
    %3 = vector.load %arg2[%c0_3, %c0_4] : memref<3x512xf32, #tpu.memory_space<vmem>>, vector<1x512xf32>
    %4 = vector.broadcast %2 : vector<8x1xf32> to vector<8x512xf32>
    %5 = vector.broadcast %3 : vector<1x512xf32> to vector<8x512xf32>
    %6 = arith.mulf %4, %5 : vector<8x512xf32>
    %7 = vector.broadcast %1 : vector<1x512xf32> to vector<8x512xf32>
    %8 = arith.addf %7, %6 : vector<8x512xf32>
    %9 = vector.extract_strided_slice %0 {offsets = [0, 1], sizes = [8, 1], strides = [1, 1]} : vector<8x3xf32> to vector<8x1xf32>
    %c1 = arith.constant 1 : index
    %c0_5 = arith.constant 0 : index
    %10 = vector.load %arg2[%c1, %c0_5] : memref<3x512xf32, #tpu.memory_space<vmem>>, vector<1x512xf32>
    %11 = vector.broadcast %9 : vector<8x1xf32> to vector<8x512xf32>
    %12 = vector.broadcast %10 : vector<1x512xf32> to vector<8x512xf32>
    %13 = arith.mulf %11, %12 : vector<8x512xf32>
    %14 = arith.addf %8, %13 : vector<8x512xf32>
    %15 = vector.extract_strided_slice %0 {offsets = [0, 2], sizes = [8, 1], strides = [1, 1]} : vector<8x3xf32> to vector<8x1xf32>
    %c2 = arith.constant 2 : index
    %c0_6 = arith.constant 0 : index
    %16 = vector.load %arg2[%c2, %c0_6] : memref<3x512xf32, #tpu.memory_space<vmem>>, vector<1x512xf32>
    %17 = vector.broadcast %15 : vector<8x1xf32> to vector<8x512xf32>
    %18 = vector.broadcast %16 : vector<1x512xf32> to vector<8x512xf32>
    %19 = arith.mulf %17, %18 : vector<8x512xf32>
    %20 = arith.addf %14, %19 : vector<8x512xf32>
    %cst = arith.constant 0.000000e+00 : f32
    %21 = vector.broadcast %cst : f32 to vector<8x512xf32>
    %22 = arith.maximumf %20, %21 : vector<8x512xf32>
    %23 = arith.truncf %22 : vector<8x512xf32> to vector<8x512xbf16>
    %c0_7 = arith.constant 0 : index
    %c0_8 = arith.constant 0 : index
    %c0_9 = arith.constant 0 : index
    %24 = vector.load %arg4[%c0_7, %c0_8, %c0_9] : memref<5x512x512xbf16, #tpu.memory_space<vmem>>, vector<1x512x512xbf16>
    %25 = vector.shape_cast %24 : vector<1x512x512xbf16> to vector<512x512xbf16>
    %cst_10 = arith.constant dense<0.000000e+00> : vector<8x512xf32>
    %26 = tpu.matmul %23, %25, %cst_10 {dimension_numbers = #tpu.dot_dimension_numbers<[1], [0], [0], [1], [0, 0, 1, 1], [], []>} : vector<8x512xbf16>, vector<512x512xbf16>, vector<8x512xf32> -> vector<8x512xf32>
    %c0_11 = arith.constant 0 : index
    %c0_12 = arith.constant 0 : index
    %c0_13 = arith.constant 0 : index
    %27 = vector.load %arg5[%c0_11, %c0_12, %c0_13] : memref<5x1x512xf32, #tpu.memory_space<vmem>>, vector<1x1x512xf32>
    %28 = vector.shape_cast %27 : vector<1x1x512xf32> to vector<1x512xf32>
    %29 = vector.broadcast %28 : vector<1x512xf32> to vector<8x512xf32>
    %30 = arith.addf %26, %29 : vector<8x512xf32>
    %cst_14 = arith.constant 0.000000e+00 : f32
    %31 = vector.broadcast %cst_14 : f32 to vector<8x512xf32>
    %32 = arith.maximumf %30, %31 : vector<8x512xf32>
    %33 = arith.truncf %32 : vector<8x512xf32> to vector<8x512xbf16>
    %c1_15 = arith.constant 1 : index
    %c0_16 = arith.constant 0 : index
    %c0_17 = arith.constant 0 : index
    %34 = vector.load %arg4[%c1_15, %c0_16, %c0_17] : memref<5x512x512xbf16, #tpu.memory_space<vmem>>, vector<1x512x512xbf16>
    %35 = vector.shape_cast %34 : vector<1x512x512xbf16> to vector<512x512xbf16>
    %cst_18 = arith.constant dense<0.000000e+00> : vector<8x512xf32>
    %36 = tpu.matmul %33, %35, %cst_18 {dimension_numbers = #tpu.dot_dimension_numbers<[1], [0], [0], [1], [0, 0, 1, 1], [], []>} : vector<8x512xbf16>, vector<512x512xbf16>, vector<8x512xf32> -> vector<8x512xf32>
    %c1_19 = arith.constant 1 : index
    %c0_20 = arith.constant 0 : index
    %c0_21 = arith.constant 0 : index
    %37 = vector.load %arg5[%c1_19, %c0_20, %c0_21] : memref<5x1x512xf32, #tpu.memory_space<vmem>>, vector<1x1x512xf32>
    %38 = vector.shape_cast %37 : vector<1x1x512xf32> to vector<1x512xf32>
    %39 = vector.broadcast %38 : vector<1x512xf32> to vector<8x512xf32>
    %40 = arith.addf %36, %39 : vector<8x512xf32>
    %cst_22 = arith.constant 0.000000e+00 : f32
    %41 = vector.broadcast %cst_22 : f32 to vector<8x512xf32>
    %42 = arith.maximumf %40, %41 : vector<8x512xf32>
    %43 = arith.truncf %42 : vector<8x512xf32> to vector<8x512xbf16>
    %c2_23 = arith.constant 2 : index
    %c0_24 = arith.constant 0 : index
    %c0_25 = arith.constant 0 : index
    %44 = vector.load %arg4[%c2_23, %c0_24, %c0_25] : memref<5x512x512xbf16, #tpu.memory_space<vmem>>, vector<1x512x512xbf16>
    %45 = vector.shape_cast %44 : vector<1x512x512xbf16> to vector<512x512xbf16>
    %cst_26 = arith.constant dense<0.000000e+00> : vector<8x512xf32>
    %46 = tpu.matmul %43, %45, %cst_26 {dimension_numbers = #tpu.dot_dimension_numbers<[1], [0], [0], [1], [0, 0, 1, 1], [], []>} : vector<8x512xbf16>, vector<512x512xbf16>, vector<8x512xf32> -> vector<8x512xf32>
    %c2_27 = arith.constant 2 : index
    %c0_28 = arith.constant 0 : index
    %c0_29 = arith.constant 0 : index
    %47 = vector.load %arg5[%c2_27, %c0_28, %c0_29] : memref<5x1x512xf32, #tpu.memory_space<vmem>>, vector<1x1x512xf32>
    %48 = vector.shape_cast %47 : vector<1x1x512xf32> to vector<1x512xf32>
    %49 = vector.broadcast %48 : vector<1x512xf32> to vector<8x512xf32>
    %50 = arith.addf %46, %49 : vector<8x512xf32>
    %cst_30 = arith.constant 0.000000e+00 : f32
    %51 = vector.broadcast %cst_30 : f32 to vector<8x512xf32>
    %52 = arith.maximumf %50, %51 : vector<8x512xf32>
    %53 = arith.truncf %52 : vector<8x512xf32> to vector<8x512xbf16>
    %c3 = arith.constant 3 : index
    %c0_31 = arith.constant 0 : index
    %c0_32 = arith.constant 0 : index
    %54 = vector.load %arg4[%c3, %c0_31, %c0_32] : memref<5x512x512xbf16, #tpu.memory_space<vmem>>, vector<1x512x512xbf16>
    %55 = vector.shape_cast %54 : vector<1x512x512xbf16> to vector<512x512xbf16>
    %cst_33 = arith.constant dense<0.000000e+00> : vector<8x512xf32>
    %56 = tpu.matmul %53, %55, %cst_33 {dimension_numbers = #tpu.dot_dimension_numbers<[1], [0], [0], [1], [0, 0, 1, 1], [], []>} : vector<8x512xbf16>, vector<512x512xbf16>, vector<8x512xf32> -> vector<8x512xf32>
    %c3_34 = arith.constant 3 : index
    %c0_35 = arith.constant 0 : index
    %c0_36 = arith.constant 0 : index
    %57 = vector.load %arg5[%c3_34, %c0_35, %c0_36] : memref<5x1x512xf32, #tpu.memory_space<vmem>>, vector<1x1x512xf32>
    %58 = vector.shape_cast %57 : vector<1x1x512xf32> to vector<1x512xf32>
    %59 = vector.broadcast %58 : vector<1x512xf32> to vector<8x512xf32>
    %60 = arith.addf %56, %59 : vector<8x512xf32>
    %cst_37 = arith.constant 0.000000e+00 : f32
    %61 = vector.broadcast %cst_37 : f32 to vector<8x512xf32>
    %62 = arith.maximumf %60, %61 : vector<8x512xf32>
    %63 = arith.truncf %62 : vector<8x512xf32> to vector<8x512xbf16>
    %c4 = arith.constant 4 : index
    %c0_38 = arith.constant 0 : index
    %c0_39 = arith.constant 0 : index
    %64 = vector.load %arg4[%c4, %c0_38, %c0_39] : memref<5x512x512xbf16, #tpu.memory_space<vmem>>, vector<1x512x512xbf16>
    %65 = vector.shape_cast %64 : vector<1x512x512xbf16> to vector<512x512xbf16>
    %cst_40 = arith.constant dense<0.000000e+00> : vector<8x512xf32>
    %66 = tpu.matmul %63, %65, %cst_40 {dimension_numbers = #tpu.dot_dimension_numbers<[1], [0], [0], [1], [0, 0, 1, 1], [], []>} : vector<8x512xbf16>, vector<512x512xbf16>, vector<8x512xf32> -> vector<8x512xf32>
    %c4_41 = arith.constant 4 : index
    %c0_42 = arith.constant 0 : index
    %c0_43 = arith.constant 0 : index
    %67 = vector.load %arg5[%c4_41, %c0_42, %c0_43] : memref<5x1x512xf32, #tpu.memory_space<vmem>>, vector<1x1x512xf32>
    %68 = vector.shape_cast %67 : vector<1x1x512xf32> to vector<1x512xf32>
    %69 = vector.broadcast %68 : vector<1x512xf32> to vector<8x512xf32>
    %70 = arith.addf %66, %69 : vector<8x512xf32>
    %cst_44 = arith.constant 0.000000e+00 : f32
    %71 = vector.broadcast %cst_44 : f32 to vector<8x512xf32>
    %72 = arith.maximumf %70, %71 : vector<8x512xf32>
    %73 = arith.truncf %72 : vector<8x512xf32> to vector<8x512xbf16>
    %c0_45 = arith.constant 0 : index
    %c0_46 = arith.constant 0 : index
    %74 = vector.load %arg6[%c0_45, %c0_46] : memref<512x128xbf16, #tpu.memory_space<vmem>>, vector<512x128xbf16>
    %cst_47 = arith.constant dense<0.000000e+00> : vector<8x128xf32>
    %75 = tpu.matmul %73, %74, %cst_47 {dimension_numbers = #tpu.dot_dimension_numbers<[1], [0], [0], [1], [0, 0, 1, 1], [], []>} : vector<8x512xbf16>, vector<512x128xbf16>, vector<8x128xf32> -> vector<8x128xf32>
    %c0_48 = arith.constant 0 : index
    %c0_49 = arith.constant 0 : index
    %76 = vector.load %arg7[%c0_48, %c0_49] : memref<1x128xf32, #tpu.memory_space<vmem>>, vector<1x128xf32>
    %77 = vector.broadcast %76 : vector<1x128xf32> to vector<8x128xf32>
    %78 = arith.addf %75, %77 : vector<8x128xf32>
    %c0_50 = arith.constant 0 : index
    %c0_51 = arith.constant 0 : index
    %79 = vector.load %arg8[%c0_50, %c0_51] : memref<8x128xf32, #tpu.memory_space<vmem>>, vector<8x128xf32>
    tpu.vector_store %arg8[%c0_50, %c0_51], %78 {strides = array<i32>} : memref<8x128xf32, #tpu.memory_space<vmem>>, vector<8x128xf32>,
    return
  }
  func.func @transform_0(%arg0: i32) -> (i32, i32) {
    %c0_i32 = arith.constant 0 : i32
    %c0_i32_0 = arith.constant 0 : i32
    return %arg0, %c0_i32 : i32, i32
  }
  func.func @transform_1(%arg0: i32) -> (i32, i32) {
    %c0_i32 = arith.constant 0 : i32
    %c0_i32_0 = arith.constant 0 : i32
    %c0_i32_1 = arith.constant 0 : i32
    return %c0_i32, %c0_i32_0 : i32, i32
  }
  func.func @transform_2(%arg0: i32) -> (i32, i32) {
    %c0_i32 = arith.constant 0 : i32
    %c0_i32_0 = arith.constant 0 : i32
    %c0_i32_1 = arith.constant 0 : i32
    return %c0_i32, %c0_i32_0 : i32, i32
  }
  func.func @transform_3(%arg0: i32) -> (i32, i32, i32) {
    %c0_i32 = arith.constant 0 : i32
    %c0_i32_0 = arith.constant 0 : i32
    %c0_i32_1 = arith.constant 0 : i32
    %c0_i32_2 = arith.constant 0 : i32
    return %c0_i32, %c0_i32_0, %c0_i32_1 : i32, i32, i32
  }
  func.func @transform_4(%arg0: i32) -> (i32, i32, i32) {
    %c0_i32 = arith.constant 0 : i32
    %c0_i32_0 = arith.constant 0 : i32
    %c0_i32_1 = arith.constant 0 : i32
    %c0_i32_2 = arith.constant 0 : i32
    return %c0_i32, %c0_i32_0, %c0_i32_1 : i32, i32, i32
  }
  func.func @transform_5(%arg0: i32) -> (i32, i32) {
    %c0_i32 = arith.constant 0 : i32
    %c0_i32_0 = arith.constant 0 : i32
    %c0_i32_1 = arith.constant 0 : i32
    return %c0_i32, %c0_i32_0 : i32, i32
  }
  func.func @transform_6(%arg0: i32) -> (i32, i32) {
    %c0_i32 = arith.constant 0 : i32
    %c0_i32_0 = arith.constant 0 : i32
    %c0_i32_1 = arith.constant 0 : i32
    return %c0_i32, %c0_i32_0 : i32, i32
  }
  func.func @transform_7(%arg0: i32) -> (i32, i32) {
    %c0_i32 = arith.constant 0 : i32
    %c0_i32_0 = arith.constant 0 : i32
    return %arg0, %c0_i32 : i32, i32
  }
}

</mosaic_0001>

<bundles_post_ra>
// kernel: tpu_custom_call.1
= control target key start
LH: loop header
LB: loop body
LE: loop exit
PB: predicated region body
PF: predicated region fallthrough
CT: control target
= control target key end

     0   :  { %12 = vsyncpa [#allocation3], 0  ;;  %s7615_s0 = inlined_call_operand.vmem [shape: f32[8,3], index: 0, kind: input, shape index: {}]   ;;  %s7616_s1 = inlined_call_operand.hbm [shape: f32[3,512], index: 1, kind: input, shape index: {}]   ;;  %s7617_s2 = inlined_call_operand.hbm [shape: f32[1,512], index: 2, kind: input, shape index: {}]   ;;  %s7618_s3 = inlined_call_operand.hbm [shape: bf16[5,512,512], index: 3, kind: input, shape index: {}]   ;;  %s7619_s4 = inlined_call_operand.hbm [shape: f32[5,1,512], index: 4, kind: input, shape index: {}]   ;;  %s7620_s5 = inlined_call_operand.hbm [shape: bf16[512,128], index: 5, kind: input, shape index: {}]   ;;  %s7621_s6 = inlined_call_operand.hbm [shape: f32[1,128], index: 6, kind: input, shape index: {}]   ;;  %s7622_s7 = inlined_call_operand.hbm [shape: f32[8,128], index: 7, kind: output, shape index: {}]  }
   0x1   :  { %13 = vsyncpa [#allocation6], 0 }
   0x2   :  { %14 = vsyncpa [#allocation9], 0 }
   0x3   :  { %15 = vsyncpa [#allocation12], 0 }
   0x4   :  { %16 = vsyncpa [#allocation4], 0  ;;  %s7371_s24 = smov [#allocation5]   ;;  %s7372_s26 = smov [#allocation8]  }
   0x5   :  { %s35_s25 = sshll.u32 %s7371_s24, 4  ;;  %s56_s27 = sshll.u32 %s7372_s26, 4  ;;  %s36_s25 = int_to_ptr.vmem [resolvable:$true] %s35_s25  ;;  %s7425_s27 = int_to_ptr.vmem [resolvable:$true] %s56_s27 }
   0x6   :  { %s7207_s30 = scalar_lea.hbm %s7617_s2, 64 }
   0x7   :  { %p7208_p0 = scmp.ne.s32.totalorder %s7617_s2, %s7207_s30  ;;  %p7211_p1 = scmp.lt.u32.totalorder %s7207_s30, %s7617_s2 }
   0x9   :  { %p7213_p2 = pnand %p7211_p1, %p7208_p0 }
   0xb   :  { %7216 = shalt.err (!%p7213_p2)
}
   0xc   :  { %s7217_s12 = scalar_lea.vmem %s36_s25, 64  ;;  %p7222_p4 = scmp.lt.s32.totalorder %s36_s25, %s36_s25 }
   0xd   :  { %p7218_p3 = scmp.ne.s32.totalorder %s36_s25, %s7217_s12  ;;  %p7223_p5 = scmp.lt.s32.totalorder %s7217_s12, %s7217_s12 }
   0xf   :  { %p7224_p6 = por %p7223_p5, %p7222_p4 }
  0x11   :  { %p7225_p7 = pnand %p7224_p6, %p7218_p3 }
  0x13   :  { %7228 = shalt.err (!%p7225_p7)
}
  0x14   :  { %38 = dma.hbm_to_vmem [thread:$0]  %s7617_s2, 64, %s36_s25, [#allocation6]  }
  0x15   :  { %s7229_s17 = scalar_lea.hbm %s7619_s4, 320 }
  0x16   :  { %p7230_p8 = scmp.ne.s32.totalorder %s7619_s4, %s7229_s17  ;;  %p7233_p9 = scmp.lt.u32.totalorder %s7229_s17, %s7619_s4 }
  0x18   :  { %p7235_p10 = pnand %p7233_p9, %p7230_p8 }
  0x1a   :  { %7238 = shalt.err (!%p7235_p10)
}
  0x1b   :  { %s7239_s22 = scalar_lea.vmem %s7425_s27, 320  ;;  %p7244_p12 = scmp.lt.s32.totalorder %s7425_s27, %s7425_s27 }
  0x1c   :  { %p7240_p11 = scmp.ne.s32.totalorder %s7425_s27, %s7239_s22  ;;  %p7245_p13 = scmp.lt.s32.totalorder %s7239_s22, %s7239_s22 }
  0x1e   :  { %p7246_p0 = por %p7245_p13, %p7244_p12 }
  0x20   :  { %p7247_p1 = pnand %p7246_p0, %p7240_p11 }
  0x22   :  { %7250 = shalt.err (!%p7247_p1)
}
  0x23   :  { %s7373_s2 = smov 64   ;;  %s7374_s23 = smov 4  }
  0x24   :  { %62 = dma.hbm_to_vmem [thread:$0]  %s7619_s4, 320, %s7425_s27, [#allocation9], %s7373_s2, %s7373_s2, %s7374_s23  }
  0x25   :  { %s7375_s26 = smov [#allocation2]   ;;  %s7376_s29 = smov [#allocation7]  }
  0x26   :  { %s25_s28 = sshll.u32 %s7375_s26, 4  ;;  %s44_s30 = sshll.u32 %s7376_s29, 4  ;;  %s26_s28 = int_to_ptr.vmem [resolvable:$true] %s25_s28  ;;  %s7459_s30 = int_to_ptr.vmem [resolvable:$true] %s44_s30 }
  0x27   :  { %s7251_s10 = scalar_lea.hbm %s7616_s1, 256 }
  0x28   :  { %p7252_p2 = scmp.ne.s32.totalorder %s7616_s1, %s7251_s10  ;;  %p7255_p3 = scmp.lt.u32.totalorder %s7251_s10, %s7616_s1 }
  0x2a   :  { %p7257_p4 = pnand %p7255_p3, %p7252_p2 }
  0x2c   :  { %7260 = shalt.err (!%p7257_p4)
}
  0x2d   :  { %s7261_s4 = scalar_lea.vmem %s26_s28, 256  ;;  %p7266_p6 = scmp.lt.s32.totalorder %s26_s28, %s26_s28 }
  0x2e   :  { %p7262_p5 = scmp.ne.s32.totalorder %s26_s28, %s7261_s4  ;;  %p7267_p7 = scmp.lt.s32.totalorder %s7261_s4, %s7261_s4 }
  0x30   :  { %p7268_p8 = por %p7267_p7, %p7266_p6 }
  0x32   :  { %p7269_p9 = pnand %p7268_p8, %p7262_p5 }
  0x34   :  { %7272 = shalt.err (!%p7269_p9)
}
  0x35   :  { %28 = dma.hbm_to_vmem [thread:$0]  %s7616_s1, 256, %s26_s28, [#allocation3]  }
  0x36   :  { %s7273_s18 = scalar_lea.hbm %s7618_s3, 81920 }
  0x37   :  { %p7274_p10 = scmp.ne.s32.totalorder %s7618_s3, %s7273_s18  ;;  %p7277_p11 = scmp.lt.u32.totalorder %s7273_s18, %s7618_s3 }
  0x39   :  { %p7279_p12 = pnand %p7277_p11, %p7274_p10 }
  0x3b   :  { %7282 = shalt.err (!%p7279_p12)
}
  0x3c   :  { %s7283_s24 = scalar_lea.vmem %s7459_s30, 81920  ;;  %p7288_p0 = scmp.lt.s32.totalorder %s7459_s30, %s7459_s30 }
  0x3d   :  { %p7284_p13 = scmp.ne.s32.totalorder %s7459_s30, %s7283_s24  ;;  %p7289_p1 = scmp.lt.s32.totalorder %s7283_s24, %s7283_s24 }
  0x3f   :  { %p7290_p2 = por %p7289_p1, %p7288_p0 }
  0x41   :  { %p7291_p3 = pnand %p7290_p2, %p7284_p13 }
  0x43   :  { %7294 = shalt.err (!%p7291_p3)
}
  0x44   :  { %s7377_s1 = smov 256   ;;  %s7378_s25 = smov 16  }
  0x45   :  { %50 = dma.hbm_to_vmem [thread:$0]  %s7618_s3, 81920, %s7459_s30, [#allocation6], %s7377_s1, %s7377_s1, %s7378_s25  }
  0x46   :  { %s7379_s29 = smov [#allocation10]   ;;  %s7380_s9 = smov [#allocation11]  }
  0x47   :  { %s68_s8 = sshll.u32 %s7379_s29, 4  ;;  %s81_s10 = sshll.u32 %s7380_s9, 4  ;;  %s69_s8 = int_to_ptr.vmem [resolvable:$true] %s68_s8  ;;  %s82_s10 = int_to_ptr.vmem [resolvable:$true] %s81_s10 }
  0x48   :  { %s7295_s13 = scalar_lea.hbm %s7620_s5, 4096 }
  0x49   :  { %p7296_p4 = scmp.ne.s32.totalorder %s7620_s5, %s7295_s13  ;;  %p7299_p5 = scmp.lt.u32.totalorder %s7295_s13, %s7620_s5 }
  0x4b   :  { %p7301_p6 = pnand %p7299_p5, %p7296_p4 }
  0x4d   :  { %7304 = shalt.err (!%p7301_p6)
}
  0x4e   :  { %s7305_s3 = scalar_lea.vmem %s69_s8, 4096  ;;  %p7310_p8 = scmp.lt.s32.totalorder %s69_s8, %s69_s8 }
  0x4f   :  { %p7306_p7 = scmp.ne.s32.totalorder %s69_s8, %s7305_s3  ;;  %p7311_p9 = scmp.lt.s32.totalorder %s7305_s3, %s7305_s3 }
  0x51   :  { %p7312_p10 = por %p7311_p9, %p7310_p8 }
  0x53   :  { %p7313_p11 = pnand %p7312_p10, %p7306_p7 }
  0x55   :  { %7316 = shalt.err (!%p7313_p11)
}
  0x56   :  { %74 = dma.hbm_to_vmem [thread:$0]  %s7620_s5, 4096, %s69_s8, [#allocation9], %s7373_s2, %s7373_s2, %s7374_s23  }
  0x57   :  { %s7317_s19 = scalar_lea.hbm %s7621_s6, 16 }
  0x58   :  { %p7318_p12 = scmp.ne.s32.totalorder %s7621_s6, %s7317_s19  ;;  %p7321_p13 = scmp.lt.u32.totalorder %s7317_s19, %s7621_s6 }
  0x5a   :  { %p7323_p0 = pnand %p7321_p13, %p7318_p12 }
  0x5c   :  { %7326 = shalt.err (!%p7323_p0)
}
  0x5d   :  { %s7327_s1 = scalar_lea.vmem %s82_s10, 16  ;;  %s7331_s25 = scalar_lea.vmem %s82_s10, 32 }
  0x5e   :  { %p7328_p1 = scmp.ne.s32.totalorder %s82_s10, %s7327_s1  ;;  %p7332_p2 = scmp.lt.s32.totalorder %s82_s10, %s82_s10 }
  0x5f   :  { %p7333_p3 = scmp.lt.s32.totalorder %s7331_s25, %s7327_s1 }
  0x61   :  { %p7334_p4 = por %p7333_p3, %p7332_p2 }
  0x63   :  { %p7335_p5 = pnand %p7334_p4, %p7328_p1 }
  0x65   :  { %7338 = shalt.err (!%p7335_p5)
}
  0x66   :  { %84 = dma.hbm_to_vmem [thread:$0]  %s7621_s6, 16, %s82_s10, [#allocation12]  }
  0x67   :  { %7361 = dma.done.wait [#allocation3], 256  }
  0x68   :  { %7362 = vsyncadd [#allocation3], 4294967040 }
  0x69   :  { %7363 = dma.done.wait [#allocation6], 81984  }
  0x6a   :  { %7364 = vsyncadd [#allocation6], 4294885312 }
  0x6b   :  { %7365 = dma.done.wait [#allocation9], 4416  }
  0x6c   :  { %7366 = vsyncadd [#allocation9], 4294962880 }
  0x6d   :  { %7367 = dma.done.wait [#allocation12], 16  }
  0x6e   :  { %7368 = vsyncadd [#allocation12], 4294967280  ;;  %v7381_v0 = vmov 0   ;;  %v7382_v1 = vmov 2   ;;  %v104_v2 = vld [vmem:[%s7615_s0] sm:$0xff]  ;;  %v7383_v9 = vmov 1  }
  0x6f   :  { %6211 = vset.pattern.permute.xlu0 %v7381_v0  ;;  %6213 = vset.pattern.permute.xlu1 %v7382_v1  ;;  %v6215_v3 = vld [vmem:[#allocation7 + $0x4] ss:$16 sps:$4 sm:$0xff]   ;;  %v6217_v4 = vld [vmem:[#allocation7 + $0xc] ss:$16 sps:$4 sm:$0xff]   ;;  %v6219_v5 = vld [vmem:[#allocation7] ss:$16 sps:$4 sm:$0xff]  }
  0x70   :  { %109 = vperm.xlu0 %6211, %v104_v2   ;;  %200 = vperm.xlu1 %6213, %v104_v2   ;;  %v6220_v6 = vld [vmem:[#allocation7 + $0x8] ss:$16 sps:$4 sm:$0xff]   ;;  %v6221_v7 = vld [vmem:[#allocation7 + $0x24] ss:$16 sps:$4 sm:$0xff]   ;;  %v6223_v8 = vld [vmem:[#allocation7 + $0x2c] ss:$16 sps:$4 sm:$0xff]  }
  0x71   :  { %1030 = vmatprep.subr.bf16.mxu0 %v6215_v3  ;;  %1112 = vmatprep.subr.bf16.mxu1 %v6217_v4  ;;  %v6225_v10 = vld [vmem:[#allocation7 + $0x20] ss:$16 sps:$4 sm:$0xff]   ;;  %v6226_v11 = vld [vmem:[#allocation7 + $0x28] ss:$16 sps:$4 sm:$0xff]   ;;  %v6227_v12 = vld [vmem:[#allocation7 + $0x44] ss:$16 sps:$4 sm:$0xff]  }
  0x72   :  { %1031 = vmatpush1.bf16.msra.mxu0 %v6219_v5  ;;  %1113 = vmatpush1.bf16.msra.mxu1 %v6220_v6  ;;  %v6229_v13 = vld [vmem:[#allocation7 + $0x4c] ss:$16 sps:$4 sm:$0xff]   ;;  %v6231_v14 = vld [vmem:[#allocation7 + $0x40] ss:$16 sps:$4 sm:$0xff]   ;;  %v6232_v15 = vld [vmem:[#allocation7 + $0x48] ss:$16 sps:$4 sm:$0xff]   ;;  %v113_v6 = vlaneseq }
  0x73   :  { %1032 = vmatprep.subr.bf16.mxu0 %v6221_v7  ;;  %1114 = vmatprep.subr.bf16.mxu1 %v6223_v8  ;;  %v6233_v16 = vld [vmem:[#allocation7 + $0x64] ss:$16 sps:$4 sm:$0xff]   ;;  %v6235_v17 = vld [vmem:[#allocation7 + $0x6c] ss:$16 sps:$4 sm:$0xff]   ;;  %v6237_v18 = vld [vmem:[#allocation7 + $0x60] ss:$16 sps:$4 sm:$0xff]  }
  0x74   :  { %6212 = vset.pattern.permute.xlu0 %v7383_v9  ;;  %v6238_v19 = vld [vmem:[#allocation7 + $0x68] ss:$16 sps:$4 sm:$0xff]   ;;  %v6239_v20 = vld [vmem:[#allocation7 + $0x84] ss:$16 sps:$4 sm:$0xff]   ;;  %v6241_v21 = vld [vmem:[#allocation7 + $0x8c] ss:$16 sps:$4 sm:$0xff]  }
  0x75   :  { %165 = vperm.xlu0 %6212, %v104_v2   ;;  %v6243_v22 = vld [vmem:[#allocation7 + $0x80] ss:$16 sps:$4 sm:$0xff]   ;;  %v6244_v23 = vld [vmem:[#allocation7 + $0x88] ss:$16 sps:$4 sm:$0xff]   ;;  %v6245_v24 = vld [vmem:[#allocation7 + $0xa4] ss:$16 sps:$4 sm:$0xff]  }
  0x76   :  { %1033 = vmatpush1.bf16.msra.mxu0 %v6225_v10  ;;  %1115 = vmatpush1.bf16.msra.mxu1 %v6226_v11  ;;  %v6247_v25 = vld [vmem:[#allocation7 + $0xac] ss:$16 sps:$4 sm:$0xff]   ;;  %v6249_v26 = vld [vmem:[#allocation7 + $0xa0] ss:$16 sps:$4 sm:$0xff]   ;;  %v6250_v27 = vld [vmem:[#allocation7 + $0xa8] ss:$16 sps:$4 sm:$0xff]  }
  0x77   :  { %1034 = vmatprep.subr.bf16.mxu0 %v6227_v12  ;;  %1116 = vmatprep.subr.bf16.mxu1 %v6229_v13  ;;  %v6251_v28 = vld [vmem:[#allocation7 + $0xc4] ss:$16 sps:$4 sm:$0xff]   ;;  %v6253_v29 = vld [vmem:[#allocation7 + $0xcc] ss:$16 sps:$4 sm:$0xff]   ;;  %v6255_v30 = vld [vmem:[#allocation7 + $0xc0] ss:$16 sps:$4 sm:$0xff]  }
  0x78   :  { %v6256_v31 = vld [vmem:[#allocation7 + $0xc8] ss:$16 sps:$4 sm:$0xff]   ;;  %v6257_v32 = vld [vmem:[#allocation7 + $0xe4] ss:$16 sps:$4 sm:$0xff]   ;;  %v6259_v33 = vld [vmem:[#allocation7 + $0xec] ss:$16 sps:$4 sm:$0xff]  }
  0x79   :  { %6214 = vset.pattern.permute.xlu0 %v7382_v1  ;;  %v6261_v34 = vld [vmem:[#allocation7 + $0xe0] ss:$16 sps:$4 sm:$0xff]   ;;  %v6262_v35 = vld [vmem:[#allocation7 + $0xe8] ss:$16 sps:$4 sm:$0xff]   ;;  %v6263_v36 = vld [vmem:[#allocation7 + $0x104] ss:$16 sps:$4 sm:$0xff]  }
  0x7a   :  { %1035 = vmatpush1.bf16.msra.mxu0 %v6231_v14  ;;  %1117 = vmatpush1.bf16.msra.mxu1 %v6232_v15  ;;  %v6265_v37 = vld [vmem:[#allocation7 + $0x10c] ss:$16 sps:$4 sm:$0xff]   ;;  %v6267_v38 = vld [vmem:[#allocation7 + $0x100] ss:$16 sps:$4 sm:$0xff]   ;;  %v6268_v39 = vld [vmem:[#allocation7 + $0x108] ss:$16 sps:$4 sm:$0xff]  }
  0x7b   :  { %1036 = vmatprep.subr.bf16.mxu0 %v6233_v16  ;;  %1118 = vmatprep.subr.bf16.mxu1 %v6235_v17  ;;  %v6269_v40 = vld [vmem:[#allocation7 + $0x124] ss:$16 sps:$4 sm:$0xff]   ;;  %v6271_v41 = vld [vmem:[#allocation7 + $0x12c] ss:$16 sps:$4 sm:$0xff]   ;;  %v6273_v42 = vld [vmem:[#allocation7 + $0x120] ss:$16 sps:$4 sm:$0xff]  }
  0x7c   :  { %v6274_v43 = vld [vmem:[#allocation7 + $0x128] ss:$16 sps:$4 sm:$0xff]   ;;  %v6275_v44 = vld [vmem:[#allocation7 + $0x144] ss:$16 sps:$4 sm:$0xff]   ;;  %v6277_v45 = vld [vmem:[#allocation7 + $0x14c] ss:$16 sps:$4 sm:$0xff]  }
  0x7d   :  { %v6279_v46 = vld [vmem:[#allocation7 + $0x140] ss:$16 sps:$4 sm:$0xff]   ;;  %v6280_v47 = vld [vmem:[#allocation7 + $0x148] ss:$16 sps:$4 sm:$0xff]   ;;  %v6281_v48 = vld [vmem:[#allocation7 + $0x164] ss:$16 sps:$4 sm:$0xff]  }
  0x7e   :  { %1037 = vmatpush1.bf16.msra.mxu0 %v6237_v18  ;;  %1119 = vmatpush1.bf16.msra.mxu1 %v6238_v19  ;;  %v6283_v49 = vld [vmem:[#allocation7 + $0x16c] ss:$16 sps:$4 sm:$0xff]   ;;  %v6285_v50 = vld [vmem:[#allocation7 + $0x160] ss:$16 sps:$4 sm:$0xff]   ;;  %v6286_v51 = vld [vmem:[#allocation7 + $0x168] ss:$16 sps:$4 sm:$0xff]  }
  0x7f   :  { %1038 = vmatprep.subr.bf16.mxu0 %v6239_v20  ;;  %1120 = vmatprep.subr.bf16.mxu1 %v6241_v21  ;;  %v6287_v52 = vld [vmem:[#allocation7 + $0x184] ss:$16 sps:$4 sm:$0xff]   ;;  %v6289_v53 = vld [vmem:[#allocation7 + $0x18c] ss:$16 sps:$4 sm:$0xff]   ;;  %v6291_v54 = vld [vmem:[#allocation7 + $0x180] ss:$16 sps:$4 sm:$0xff]  }
  0x80   :  { %v6292_v55 = vld [vmem:[#allocation7 + $0x188] ss:$16 sps:$4 sm:$0xff]   ;;  %v6293_v56 = vld [vmem:[#allocation7 + $0x1a4] ss:$16 sps:$4 sm:$0xff]   ;;  %v6295_v57 = vld [vmem:[#allocation7 + $0x1ac] ss:$16 sps:$4 sm:$0xff]  }
  0x81   :  { %v6297_v58 = vld [vmem:[#allocation7 + $0x1a0] ss:$16 sps:$4 sm:$0xff]   ;;  %v6298_v59 = vld [vmem:[#allocation7 + $0x1a8] ss:$16 sps:$4 sm:$0xff]   ;;  %v6299_v60 = vld [vmem:[#allocation7 + $0x1c4] ss:$16 sps:$4 sm:$0xff]  }
  0x82   :  { %1039 = vmatpush1.bf16.msra.mxu0 %v6243_v22  ;;  %1121 = vmatpush1.bf16.msra.mxu1 %v6244_v23  ;;  %v6301_v61 = vld [vmem:[#allocation7 + $0x1cc] ss:$16 sps:$4 sm:$0xff]   ;;  %v6303_v62 = vld [vmem:[#allocation7 + $0x1c0] ss:$16 sps:$4 sm:$0xff]   ;;  %v6304_v63 = vld [vmem:[#allocation7 + $0x1c8] ss:$16 sps:$4 sm:$0xff]  }
  0x83   :  { %1040 = vmatprep.subr.bf16.mxu0 %v6245_v24  ;;  %1122 = vmatprep.subr.bf16.mxu1 %v6247_v25  ;;  %v6305_v0 = vld [vmem:[#allocation7 + $0x1e4] ss:$16 sps:$4 sm:$0xff]   ;;  %v6307_v1 = vld [vmem:[#allocation7 + $0x1ec] ss:$16 sps:$4 sm:$0xff]   ;;  %v6309_v2 = vld [vmem:[#allocation7 + $0x1e0] ss:$16 sps:$4 sm:$0xff]  }
  0x84   :  { %v6310_v3 = vld [vmem:[#allocation7 + $0x1e8] ss:$16 sps:$4 sm:$0xff]   ;;  %v6313_v4 = vld [vmem:[#allocation7 + $0x204] ss:$16 sps:$4 sm:$0xff]   ;;  %v6316_v5 = vld [vmem:[#allocation7 + $0x20c] ss:$16 sps:$4 sm:$0xff]  }
  0x85   :  { %v114_v7 = vshrl.u32 %v113_v6, 7  ;;  %v106_v8 = vld [vmem:[#allocation2] ss:$4 sm:$0xf]  ;;  %v105_v14 = vld [vmem:[#allocation5] sm:$0xf] }
  0x86   :  { %1041 = vmatpush1.bf16.msra.mxu0 %v6249_v26  ;;  %1123 = vmatpush1.bf16.msra.mxu1 %v6250_v27  ;;  %v163_v13 = vld [vmem:[#allocation2 + $0x1] ss:$4 sm:$0xf]  ;;  %v198_v15 = vld [vmem:[#allocation2 + $0x2] ss:$4 sm:$0xf] }
  0x87   :  { %1042 = vmatprep.subr.bf16.mxu0 %v6251_v28  ;;  %1124 = vmatprep.subr.bf16.mxu1 %v6253_v29  ;;  %v7520_v9 = vsub.s32 0, %v114_v7  ;;  %v7522_v10 = vsub.s32 1, %v114_v7  ;;  %v7524_v11 = vsub.s32 2, %v114_v7  ;;  %v7526_v12 = vsub.s32 3, %v114_v7  ;;  %v6325_v7 = vld [vmem:[#allocation7 + $0x244] ss:$16 sps:$4 sm:$0xff]  }
  0x88   :  { %s7384_s0 = smov [#allocation13]  }
  0x89   :  { %v116_v16 = vrot.slane %v106_v8, %v7520_v9  ;;  %v120_v17 = vrot.slane %v106_v8, %v7522_v10  ;;  %v124_v18 = vrot.slane %v106_v8, %v7524_v11  ;;  %v128_v19 = vrot.slane %v106_v8, %v7526_v12  ;;  %v6328_v8 = vld [vmem:[#allocation7 + $0x24c] ss:$16 sps:$4 sm:$0xff]   ;;  %s5408_s6 = sshll.u32 %s7384_s0, 4  ;;  %s5409_s6 = int_to_ptr.vmem [resolvable:$true] %s5408_s6 }
  0x8a   :  { %1043 = vmatpush1.bf16.msra.mxu0 %v6255_v30  ;;  %1125 = vmatpush1.bf16.msra.mxu1 %v6256_v31  ;;  %v215_v20 = vrot.slane %v198_v15, %v7524_v11  ;;  %v141_v21 = vrot.slane %v105_v14, %v7520_v9  ;;  %v149_v22 = vrot.slane %v105_v14, %v7524_v11  ;;  %s7339_s28 = scalar_lea.vmem %s5409_s6, 128  ;;  %p7344_p7 = scmp.lt.s32.totalorder %s5409_s6, %s5409_s6 }
  0x8b   :  { %1044 = vmatprep.subr.bf16.mxu0 %v6257_v32  ;;  %1126 = vmatprep.subr.bf16.mxu1 %v6259_v33  ;;  %v153_v23 = vrot.slane %v105_v14, %v7526_v12  ;;  %v172_v24 = vrot.slane %v163_v13, %v7520_v9  ;;  %v207_v26 = vrot.slane %v198_v15, %v7520_v9  ;;  %p7340_p6 = scmp.ne.s32.totalorder %s5409_s6, %s7339_s28  ;;  %p7345_p8 = scmp.lt.s32.totalorder %s7339_s28, %s7339_s28 }
  0x8c   :  { %v211_v27 = vrot.slane %v198_v15, %v7522_v10  ;;  %v219_v28 = vrot.slane %v198_v15, %v7526_v12  ;;  %v145_v30 = vrot.slane %v105_v14, %v7522_v10  ;;  %v6326_v14 = vld [vmem:[#allocation7 + $0x248] ss:$16 sps:$4 sm:$0xff]   ;;  %v6331_v15 = vld [vmem:[#allocation7 + $0x264] ss:$16 sps:$4 sm:$0xff]  }
  0x8d   :  { %p7346_p9 = por %p7345_p8, %p7344_p7 }
  0x8e   :  { %1045 = vmatpush1.bf16.msra.mxu0 %v6261_v34  ;;  %1127 = vmatpush1.bf16.msra.mxu1 %v6262_v35  ;;  %v176_v35 = vrot.slane %v163_v13, %v7522_v10 }
  0x8f   :  { %1046 = vmatprep.subr.bf16.mxu0 %v6263_v36  ;;  %1128 = vmatprep.subr.bf16.mxu1 %v6265_v37  ;;  %v180_v36 = vrot.slane %v163_v13, %v7524_v11  ;;  %v184_v37 = vrot.slane %v163_v13, %v7526_v12  ;;  %v6323_v13 = vld [vmem:[#allocation7 + $0x240] ss:$16 sps:$4 sm:$0xff]   ;;  %p7347_p10 = pnand %p7346_p9, %p7340_p6 }
  0x92   :  { %1047 = vmatpush1.bf16.msra.mxu0 %v6267_v38  ;;  %1129 = vmatpush1.bf16.msra.mxu1 %v6268_v39 }
  0x93   :  { %1048 = vmatprep.subr.bf16.mxu0 %v6269_v40  ;;  %1130 = vmatprep.subr.bf16.mxu1 %v6271_v41 }
  0x96   :  { %1049 = vmatpush1.bf16.msra.mxu0 %v6273_v42  ;;  %1131 = vmatpush1.bf16.msra.mxu1 %v6274_v43 }
  0x97   :  { %1050 = vmatprep.subr.bf16.mxu0 %v6275_v44  ;;  %1132 = vmatprep.subr.bf16.mxu1 %v6277_v45 }
  0x9a   :  { %1051 = vmatpush1.bf16.msra.mxu0 %v6279_v46  ;;  %1133 = vmatpush1.bf16.msra.mxu1 %v6280_v47 }
  0x9b   :  { %1052 = vmatprep.subr.bf16.mxu0 %v6281_v48  ;;  %1134 = vmatprep.subr.bf16.mxu1 %v6283_v49 }
  0x9e   :  { %1053 = vmatpush1.bf16.msra.mxu0 %v6285_v50  ;;  %1135 = vmatpush1.bf16.msra.mxu1 %v6286_v51 }
  0x9f   :  { %1054 = vmatprep.subr.bf16.mxu0 %v6287_v52  ;;  %1136 = vmatprep.subr.bf16.mxu1 %v6289_v53 }
  0xa2   :  { %1055 = vmatpush1.bf16.msra.mxu0 %v6291_v54  ;;  %1137 = vmatpush1.bf16.msra.mxu1 %v6292_v55 }
  0xa3   :  { %1056 = vmatprep.subr.bf16.mxu0 %v6293_v56  ;;  %1138 = vmatprep.subr.bf16.mxu1 %v6295_v57 }
  0xa6   :  { %1057 = vmatpush1.bf16.msra.mxu0 %v6297_v58  ;;  %1139 = vmatpush1.bf16.msra.mxu1 %v6298_v59 }
  0xa7   :  { %1058 = vmatprep.subr.bf16.mxu0 %v6299_v60  ;;  %1140 = vmatprep.subr.bf16.mxu1 %v6301_v61  ;;  %v6311_v60 = vld [vmem:[#allocation7 + $0x200] ss:$16 sps:$4 sm:$0xff]   ;;  %v6314_v61 = vld [vmem:[#allocation7 + $0x208] ss:$16 sps:$4 sm:$0xff]  }
  0xaa   :  { %1059 = vmatpush1.bf16.msra.mxu0 %v6303_v62  ;;  %1141 = vmatpush1.bf16.msra.mxu1 %v6304_v63 }
  0xab   :  { %1060 = vmatprep.subr.bf16.mxu0 %v6305_v0  ;;  %1142 = vmatprep.subr.bf16.mxu1 %v6307_v1 }
  0xae   :  { %1061 = vmatpush1.bf16.msra.mxu0 %v6309_v2  ;;  %1143 = vmatpush1.bf16.msra.mxu1 %v6310_v3  ;;  %v6319_v2 = vld [vmem:[#allocation7 + $0x224] ss:$16 sps:$4 sm:$0xff]   ;;  %v6322_v3 = vld [vmem:[#allocation7 + $0x22c] ss:$16 sps:$4 sm:$0xff]  }
  0xaf   :  { %1071 = vmatprep.subr.bf16.mxu0 %v6313_v4  ;;  %1153 = vmatprep.subr.bf16.mxu1 %v6316_v5  ;;  %v6317_v4 = vld [vmem:[#allocation7 + $0x220] ss:$16 sps:$4 sm:$0xff]   ;;  %v6320_v5 = vld [vmem:[#allocation7 + $0x228] ss:$16 sps:$4 sm:$0xff]  }
  0xef   :  { %v110_v25 = vpop.permute.xlu0 %109  ;;  %v201_v29 = vpop.permute.xlu1 %200 }
  0xf0   :  { %v133_v31 = vmul.f32 %v116_v16, %v110_v25  ;;  %v134_v32 = vmul.f32 %v120_v17, %v110_v25  ;;  %v135_v33 = vmul.f32 %v124_v18, %v110_v25  ;;  %v136_v34 = vmul.f32 %v128_v19, %v110_v25  ;;  %v6334_v16 = vld [vmem:[#allocation7 + $0x26c] ss:$16 sps:$4 sm:$0xff]   ;;  %v6329_v17 = vld [vmem:[#allocation7 + $0x260] ss:$16 sps:$4 sm:$0xff]   ;;  %v6332_v18 = vld [vmem:[#allocation7 + $0x268] ss:$16 sps:$4 sm:$0xff]  }
  0xf1   :  { %v226_v38 = vmul.f32 %v215_v20, %v201_v29  ;;  %v224_v40 = vmul.f32 %v207_v26, %v201_v29  ;;  %v225_v41 = vmul.f32 %v211_v27, %v201_v29  ;;  %v227_v45 = vmul.f32 %v219_v28, %v201_v29  ;;  %v6337_v19 = vld [vmem:[#allocation7 + $0x284] ss:$16 sps:$4 sm:$0xff]   ;;  %v6340_v20 = vld [vmem:[#allocation7 + $0x28c] ss:$16 sps:$4 sm:$0xff]   ;;  %v6341_v25 = vld [vmem:[#allocation7 + $0x2a0] ss:$16 sps:$4 sm:$0xff]  }
  0xf2   :  { %v160_v39 = vadd.f32 %v149_v22, %v135_v33  ;;  %v158_v42 = vadd.f32 %v141_v21, %v133_v31  ;;  %v161_v43 = vadd.f32 %v153_v23, %v136_v34  ;;  %v159_v46 = vadd.f32 %v145_v30, %v134_v32  ;;  %v6335_v21 = vld [vmem:[#allocation7 + $0x280] ss:$16 sps:$4 sm:$0xff]   ;;  %v6338_v22 = vld [vmem:[#allocation7 + $0x288] ss:$16 sps:$4 sm:$0xff]   ;;  %v6343_v23 = vld [vmem:[#allocation7 + $0x2a4] ss:$16 sps:$4 sm:$0xff]  }
  0xf3   :  { %v6344_v26 = vld [vmem:[#allocation7 + $0x2a8] ss:$16 sps:$4 sm:$0xff]   ;;  %v6349_v27 = vld [vmem:[#allocation7 + $0x2c4] ss:$16 sps:$4 sm:$0xff]   ;;  %v6352_v28 = vld [vmem:[#allocation7 + $0x2cc] ss:$16 sps:$4 sm:$0xff]  }
  0xf4   :  { %v166_v44 = vpop.permute.xlu0 %165  ;;  %v6347_v29 = vld [vmem:[#allocation7 + $0x2c0] ss:$16 sps:$4 sm:$0xff]   ;;  %v6350_v30 = vld [vmem:[#allocation7 + $0x2c8] ss:$16 sps:$4 sm:$0xff]   ;;  %v6355_v31 = vld [vmem:[#allocation7 + $0x2e4] ss:$16 sps:$4 sm:$0xff]  }
  0xf5   :  { %v189_v47 = vmul.f32 %v172_v24, %v166_v44  ;;  %v190_v48 = vmul.f32 %v176_v35, %v166_v44  ;;  %v191_v49 = vmul.f32 %v180_v36, %v166_v44  ;;  %v192_v50 = vmul.f32 %v184_v37, %v166_v44  ;;  %v6346_v24 = vld [vmem:[#allocation7 + $0x2ac] ss:$16 sps:$4 sm:$0xff]   ;;  %v6353_v33 = vld [vmem:[#allocation7 + $0x2e0] ss:$16 sps:$4 sm:$0xff]   ;;  %v6356_v34 = vld [vmem:[#allocation7 + $0x2e8] ss:$16 sps:$4 sm:$0xff]  }
  0xf6   :  { %v6358_v32 = vld [vmem:[#allocation7 + $0x2ec] ss:$16 sps:$4 sm:$0xff]   ;;  %v6361_v35 = vld [vmem:[#allocation7 + $0x304] ss:$16 sps:$4 sm:$0xff]   ;;  %v6359_v37 = vld [vmem:[#allocation7 + $0x300] ss:$16 sps:$4 sm:$0xff]  }
  0xf7   :  { %v193_v51 = vadd.f32 %v189_v47, %v158_v42  ;;  %v195_v52 = vadd.f32 %v191_v49, %v160_v39  ;;  %v196_v53 = vadd.f32 %v192_v50, %v161_v43  ;;  %v194_v54 = vadd.f32 %v190_v48, %v159_v46  ;;  %v6364_v36 = vld [vmem:[#allocation7 + $0x30c] ss:$16 sps:$4 sm:$0xff]   ;;  %v6367_v39 = vld [vmem:[#allocation7 + $0x324] ss:$16 sps:$4 sm:$0xff]   ;;  %v6368_v42 = vld [vmem:[#allocation7 + $0x328] ss:$16 sps:$4 sm:$0xff]  }
  0xf8   :  { %v6373_v43 = vld [vmem:[#allocation7 + $0x344] ss:$16 sps:$4 sm:$0xff]   ;;  %v6376_v44 = vld [vmem:[#allocation7 + $0x34c] ss:$16 sps:$4 sm:$0xff]   ;;  %v6374_v46 = vld [vmem:[#allocation7 + $0x348] ss:$16 sps:$4 sm:$0xff]  }
  0xf9   :  { %v7544_v55 = vadd.f32 %v226_v38, %v195_v52  ;;  %v229_v56 = vadd.f32 %v225_v41, %v194_v54  ;;  %v228_v57 = vadd.f32 %v224_v40, %v193_v51  ;;  %v231_v58 = vadd.f32 %v227_v45, %v196_v53  ;;  %v6362_v38 = vld [vmem:[#allocation7 + $0x308] ss:$16 sps:$4 sm:$0xff]   ;;  %v6370_v40 = vld [vmem:[#allocation7 + $0x32c] ss:$16 sps:$4 sm:$0xff]   ;;  %v6365_v41 = vld [vmem:[#allocation7 + $0x320] ss:$16 sps:$4 sm:$0xff]  }
  0xfa   :  { %v6371_v45 = vld [vmem:[#allocation7 + $0x340] ss:$16 sps:$4 sm:$0xff]   ;;  %v6379_v47 = vld [vmem:[#allocation7 + $0x364] ss:$16 sps:$4 sm:$0xff]   ;;  %v6382_v48 = vld [vmem:[#allocation7 + $0x36c] ss:$16 sps:$4 sm:$0xff]  }
  0xfb   :  { %v233_v59 = vmax.f32 %v229_v56, 0.0  ;;  %v232_v62 = vmax.f32 %v228_v57, 0.0  ;;  %v235_v63 = vmax.f32 %v231_v58, 0.0  ;;  %v6377_v49 = vld [vmem:[#allocation7 + $0x360] ss:$16 sps:$4 sm:$0xff]  }
  0xfc   :  { %v6380_v50 = vld [vmem:[#allocation7 + $0x368] ss:$16 sps:$4 sm:$0xff]   ;;  %v6385_v51 = vld [vmem:[#allocation7 + $0x384] ss:$16 sps:$4 sm:$0xff]   ;;  %v6388_v52 = vld [vmem:[#allocation7 + $0x38c] ss:$16 sps:$4 sm:$0xff]  }
  0xfd   :  { %v237_v0 = vpack.c.bf16 %v233_v59, %v233_v59  ;;  %v236_v1 = vpack.c.bf16 %v232_v62, %v232_v62  ;;  %v239_v6 = vpack.c.bf16 %v235_v63, %v235_v63  ;;  %v6383_v53 = vld [vmem:[#allocation7 + $0x380] ss:$16 sps:$4 sm:$0xff]   ;;  %v6386_v54 = vld [vmem:[#allocation7 + $0x388] ss:$16 sps:$4 sm:$0xff]   ;;  %v6391_v56 = vld [vmem:[#allocation7 + $0x3a4] ss:$16 sps:$4 sm:$0xff]  }
  0xfe   :  { %v6394_v57 = vld [vmem:[#allocation7 + $0x3ac] ss:$16 sps:$4 sm:$0xff]   ;;  %v6389_v58 = vld [vmem:[#allocation7 + $0x3a0] ss:$16 sps:$4 sm:$0xff]   ;;  %v6392_v59 = vld [vmem:[#allocation7 + $0x3a8] ss:$16 sps:$4 sm:$0xff]  }
  0xff   :  { %1062 = vmatprep.mubr.bf16.mxu0 %v237_v0  ;;  %1144 = vmatprep.mubr.bf16.mxu1 %v237_v0  ;;  %v6395_v62 = vld [vmem:[#allocation7 + $0x3c0] ss:$16 sps:$4 sm:$0xff]   ;;  %v6398_v63 = vld [vmem:[#allocation7 + $0x3c8] ss:$16 sps:$4 sm:$0xff]   ;;  %v6403_v0 = vld [vmem:[#allocation7 + $0x3e4] ss:$16 sps:$4 sm:$0xff]  }
 0x100   :  { %1063 = vmatmul.mubr.bf16.vlgmr.msra.gmra.mrb[0].mxu0 %v236_v1  ;;  %1145 = vmatmul.mubr.bf16.vlgmr.msra.gmra.mrb[0].mxu1 %v236_v1  ;;  %v6406_v1 = vld [vmem:[#allocation7 + $0x3ec] ss:$16 sps:$4 sm:$0xff]  }
 0x101   :  { %1072 = vmatpush1.bf16.msra.mxu0 %v6311_v60  ;;  %1154 = vmatpush1.bf16.msra.mxu1 %v6314_v61  ;;  %v6397_v60 = vld [vmem:[#allocation7 + $0x3c4] ss:$16 sps:$4 sm:$0xff]   ;;  %v6400_v61 = vld [vmem:[#allocation7 + $0x3cc] ss:$16 sps:$4 sm:$0xff]  }
 0x102   :  { %1103 = vmatprep.mubr.bf16.mxu0 %v239_v6  ;;  %1185 = vmatprep.mubr.bf16.mxu1 %v239_v6  ;;  %v234_v6 = vmax.f32 %v7544_v55, 0.0  ;;  %v6419_v55 = vld [vmem:[#allocation7 + $0x440] ss:$16 sps:$4 sm:$0xff]  }
 0x103   :  { %1073 = vmatprep.subr.bf16.mxu0 %v6319_v2  ;;  %1155 = vmatprep.subr.bf16.mxu1 %v6322_v3  ;;  %v6401_v2 = vld [vmem:[#allocation7 + $0x3e0] ss:$16 sps:$4 sm:$0xff]   ;;  %v6404_v3 = vld [vmem:[#allocation7 + $0x3e8] ss:$16 sps:$4 sm:$0xff]  }
 0x105   :  { %1074 = vmatpush1.bf16.msra.mxu0 %v6317_v4  ;;  %1156 = vmatpush1.bf16.msra.mxu1 %v6320_v5  ;;  %v6409_v4 = vld [vmem:[#allocation7 + $0x404] ss:$16 sps:$4 sm:$0xff]   ;;  %v6412_v5 = vld [vmem:[#allocation7 + $0x40c] ss:$16 sps:$4 sm:$0xff]  }
 0x106   :  { %1075 = vmatprep.subr.bf16.mxu0 %v6325_v7  ;;  %1157 = vmatprep.subr.bf16.mxu1 %v6328_v8  ;;  %v6407_v7 = vld [vmem:[#allocation7 + $0x400] ss:$16 sps:$4 sm:$0xff]   ;;  %v6410_v8 = vld [vmem:[#allocation7 + $0x408] ss:$16 sps:$4 sm:$0xff]  }
 0x109   :  { %1076 = vmatpush1.bf16.msra.mxu0 %v6323_v13  ;;  %1158 = vmatpush1.bf16.msra.mxu1 %v6326_v14  ;;  %v6415_v13 = vld [vmem:[#allocation7 + $0x424] ss:$16 sps:$4 sm:$0xff]   ;;  %v6418_v14 = vld [vmem:[#allocation7 + $0x42c] ss:$16 sps:$4 sm:$0xff]  }
 0x10a   :  { %1077 = vmatprep.subr.bf16.mxu0 %v6331_v15  ;;  %1159 = vmatprep.subr.bf16.mxu1 %v6334_v16  ;;  %v238_v15 = vpack.c.bf16 %v234_v6, %v234_v6  ;;  %v6413_v16 = vld [vmem:[#allocation7 + $0x420] ss:$16 sps:$4 sm:$0xff]   ;;  %v6499_v6 = vld [vmem:[#allocation7 + $0x5e4] ss:$16 sps:$4 sm:$0xff]  }
 0x10d   :  { %1078 = vmatpush1.bf16.msra.mxu0 %v6329_v17  ;;  %1160 = vmatpush1.bf16.msra.mxu1 %v6332_v18  ;;  %v6416_v17 = vld [vmem:[#allocation7 + $0x428] ss:$16 sps:$4 sm:$0xff]   ;;  %v6421_v18 = vld [vmem:[#allocation7 + $0x444] ss:$16 sps:$4 sm:$0xff]  }
 0x10e   :  { %1079 = vmatprep.subr.bf16.mxu0 %v6337_v19  ;;  %1161 = vmatprep.subr.bf16.mxu1 %v6340_v20  ;;  %v6424_v19 = vld [vmem:[#allocation7 + $0x44c] ss:$16 sps:$4 sm:$0xff]   ;;  %v6422_v20 = vld [vmem:[#allocation7 + $0x448] ss:$16 sps:$4 sm:$0xff]  }
 0x111   :  { %1080 = vmatpush1.bf16.msra.mxu0 %v6335_v21  ;;  %1162 = vmatpush1.bf16.msra.mxu1 %v6338_v22  ;;  %v6427_v21 = vld [vmem:[#allocation7 + $0x464] ss:$16 sps:$4 sm:$0xff]   ;;  %v6430_v22 = vld [vmem:[#allocation7 + $0x46c] ss:$16 sps:$4 sm:$0xff]  }
 0x112   :  { %1081 = vmatprep.subr.bf16.mxu0 %v6343_v23  ;;  %1163 = vmatprep.subr.bf16.mxu1 %v6346_v24  ;;  %v6425_v23 = vld [vmem:[#allocation7 + $0x460] ss:$16 sps:$4 sm:$0xff]   ;;  %v6428_v24 = vld [vmem:[#allocation7 + $0x468] ss:$16 sps:$4 sm:$0xff]  }
 0x115   :  { %1082 = vmatpush1.bf16.msra.mxu0 %v6341_v25  ;;  %1164 = vmatpush1.bf16.msra.mxu1 %v6344_v26  ;;  %v6433_v25 = vld [vmem:[#allocation7 + $0x484] ss:$16 sps:$4 sm:$0xff]   ;;  %v6436_v26 = vld [vmem:[#allocation7 + $0x48c] ss:$16 sps:$4 sm:$0xff]  }
 0x116   :  { %1083 = vmatprep.subr.bf16.mxu0 %v6349_v27  ;;  %1165 = vmatprep.subr.bf16.mxu1 %v6352_v28  ;;  %v6431_v27 = vld [vmem:[#allocation7 + $0x480] ss:$16 sps:$4 sm:$0xff]   ;;  %v6434_v28 = vld [vmem:[#allocation7 + $0x488] ss:$16 sps:$4 sm:$0xff]  }
 0x119   :  { %1084 = vmatpush1.bf16.msra.mxu0 %v6347_v29  ;;  %1166 = vmatpush1.bf16.msra.mxu1 %v6350_v30  ;;  %v6439_v29 = vld [vmem:[#allocation7 + $0x4a4] ss:$16 sps:$4 sm:$0xff]   ;;  %v6442_v30 = vld [vmem:[#allocation7 + $0x4ac] ss:$16 sps:$4 sm:$0xff]  }
 0x11a   :  { %1085 = vmatprep.subr.bf16.mxu0 %v6355_v31  ;;  %1167 = vmatprep.subr.bf16.mxu1 %v6358_v32  ;;  %v6437_v31 = vld [vmem:[#allocation7 + $0x4a0] ss:$16 sps:$4 sm:$0xff]   ;;  %v6440_v32 = vld [vmem:[#allocation7 + $0x4a8] ss:$16 sps:$4 sm:$0xff]  }
 0x11d   :  { %1086 = vmatpush1.bf16.msra.mxu0 %v6353_v33  ;;  %1168 = vmatpush1.bf16.msra.mxu1 %v6356_v34  ;;  %v6445_v33 = vld [vmem:[#allocation7 + $0x4c4] ss:$16 sps:$4 sm:$0xff]   ;;  %v6448_v34 = vld [vmem:[#allocation7 + $0x4cc] ss:$16 sps:$4 sm:$0xff]  }
 0x11e   :  { %1087 = vmatprep.subr.bf16.mxu0 %v6361_v35  ;;  %1169 = vmatprep.subr.bf16.mxu1 %v6364_v36  ;;  %v6443_v35 = vld [vmem:[#allocation7 + $0x4c0] ss:$16 sps:$4 sm:$0xff]   ;;  %v6446_v36 = vld [vmem:[#allocation7 + $0x4c8] ss:$16 sps:$4 sm:$0xff]  }
 0x121   :  { %1088 = vmatpush1.bf16.msra.mxu0 %v6359_v37  ;;  %1170 = vmatpush1.bf16.msra.mxu1 %v6362_v38  ;;  %v6451_v37 = vld [vmem:[#allocation7 + $0x4e4] ss:$16 sps:$4 sm:$0xff]   ;;  %v6454_v38 = vld [vmem:[#allocation7 + $0x4ec] ss:$16 sps:$4 sm:$0xff]  }
 0x122   :  { %1089 = vmatprep.subr.bf16.mxu0 %v6367_v39  ;;  %1171 = vmatprep.subr.bf16.mxu1 %v6370_v40  ;;  %v6449_v39 = vld [vmem:[#allocation7 + $0x4e0] ss:$16 sps:$4 sm:$0xff]   ;;  %v6452_v40 = vld [vmem:[#allocation7 + $0x4e8] ss:$16 sps:$4 sm:$0xff]  }
 0x125   :  { %1090 = vmatpush1.bf16.msra.mxu0 %v6365_v41  ;;  %1172 = vmatpush1.bf16.msra.mxu1 %v6368_v42  ;;  %v6457_v41 = vld [vmem:[#allocation7 + $0x504] ss:$16 sps:$4 sm:$0xff]   ;;  %v6460_v42 = vld [vmem:[#allocation7 + $0x50c] ss:$16 sps:$4 sm:$0xff]  }
 0x126   :  { %1091 = vmatprep.subr.bf16.mxu0 %v6373_v43  ;;  %1173 = vmatprep.subr.bf16.mxu1 %v6376_v44  ;;  %v6455_v43 = vld [vmem:[#allocation7 + $0x500] ss:$16 sps:$4 sm:$0xff]   ;;  %v6458_v44 = vld [vmem:[#allocation7 + $0x508] ss:$16 sps:$4 sm:$0xff]  }
 0x129   :  { %1092 = vmatpush1.bf16.msra.mxu0 %v6371_v45  ;;  %1174 = vmatpush1.bf16.msra.mxu1 %v6374_v46  ;;  %v6463_v45 = vld [vmem:[#allocation7 + $0x524] ss:$16 sps:$4 sm:$0xff]   ;;  %v6466_v46 = vld [vmem:[#allocation7 + $0x52c] ss:$16 sps:$4 sm:$0xff]  }
 0x12a   :  { %1093 = vmatprep.subr.bf16.mxu0 %v6379_v47  ;;  %1175 = vmatprep.subr.bf16.mxu1 %v6382_v48  ;;  %v6461_v47 = vld [vmem:[#allocation7 + $0x520] ss:$16 sps:$4 sm:$0xff]   ;;  %v6464_v48 = vld [vmem:[#allocation7 + $0x528] ss:$16 sps:$4 sm:$0xff]  }
 0x12d   :  { %1094 = vmatpush1.bf16.msra.mxu0 %v6377_v49  ;;  %1176 = vmatpush1.bf16.msra.mxu1 %v6380_v50  ;;  %v6469_v49 = vld [vmem:[#allocation7 + $0x544] ss:$16 sps:$4 sm:$0xff]   ;;  %v6472_v50 = vld [vmem:[#allocation7 + $0x54c] ss:$16 sps:$4 sm:$0xff]  }
 0x12e   :  { %1095 = vmatprep.subr.bf16.mxu0 %v6385_v51  ;;  %1177 = vmatprep.subr.bf16.mxu1 %v6388_v52  ;;  %v6467_v51 = vld [vmem:[#allocation7 + $0x540] ss:$16 sps:$4 sm:$0xff]   ;;  %v6470_v52 = vld [vmem:[#allocation7 + $0x548] ss:$16 sps:$4 sm:$0xff]  }
 0x131   :  { %1096 = vmatpush1.bf16.msra.mxu0 %v6383_v53  ;;  %1178 = vmatpush1.bf16.msra.mxu1 %v6386_v54  ;;  %v6475_v53 = vld [vmem:[#allocation7 + $0x564] ss:$16 sps:$4 sm:$0xff]   ;;  %v6478_v54 = vld [vmem:[#allocation7 + $0x56c] ss:$16 sps:$4 sm:$0xff]  }
 0x132   :  { %1097 = vmatprep.subr.bf16.mxu0 %v6391_v56  ;;  %1179 = vmatprep.subr.bf16.mxu1 %v6394_v57  ;;  %v6473_v56 = vld [vmem:[#allocation7 + $0x560] ss:$16 sps:$4 sm:$0xff]   ;;  %v6476_v57 = vld [vmem:[#allocation7 + $0x568] ss:$16 sps:$4 sm:$0xff]  }
 0x135   :  { %1098 = vmatpush1.bf16.msra.mxu0 %v6389_v58  ;;  %1180 = vmatpush1.bf16.msra.mxu1 %v6392_v59  ;;  %v6481_v58 = vld [vmem:[#allocation7 + $0x584] ss:$16 sps:$4 sm:$0xff]   ;;  %v6484_v59 = vld [vmem:[#allocation7 + $0x58c] ss:$16 sps:$4 sm:$0xff]  }
 0x136   :  { %1099 = vmatprep.subr.bf16.mxu0 %v6397_v60  ;;  %1181 = vmatprep.subr.bf16.mxu1 %v6400_v61  ;;  %v6479_v60 = vld [vmem:[#allocation7 + $0x580] ss:$16 sps:$4 sm:$0xff]   ;;  %v6482_v61 = vld [vmem:[#allocation7 + $0x588] ss:$16 sps:$4 sm:$0xff]  }
 0x139   :  { %1100 = vmatpush1.bf16.msra.mxu0 %v6395_v62  ;;  %1182 = vmatpush1.bf16.msra.mxu1 %v6398_v63  ;;  %v6487_v62 = vld [vmem:[#allocation7 + $0x5a4] ss:$16 sps:$4 sm:$0xff]   ;;  %v6490_v63 = vld [vmem:[#allocation7 + $0x5ac] ss:$16 sps:$4 sm:$0xff]  }
 0x13a   :  { %1101 = vmatprep.subr.bf16.mxu0 %v6403_v0  ;;  %1183 = vmatprep.subr.bf16.mxu1 %v6406_v1  ;;  %v6485_v0 = vld [vmem:[#allocation7 + $0x5a0] ss:$16 sps:$4 sm:$0xff]   ;;  %v6488_v1 = vld [vmem:[#allocation7 + $0x5a8] ss:$16 sps:$4 sm:$0xff]  }
 0x13d   :  { %1102 = vmatpush1.bf16.msra.mxu0 %v6401_v2  ;;  %1184 = vmatpush1.bf16.msra.mxu1 %v6404_v3  ;;  %v6493_v2 = vld [vmem:[#allocation7 + $0x5c4] ss:$16 sps:$4 sm:$0xff]   ;;  %v6496_v3 = vld [vmem:[#allocation7 + $0x5cc] ss:$16 sps:$4 sm:$0xff]  }
 0x13e   :  { %1994 = vmatprep.subr.bf16.mxu0 %v6409_v4  ;;  %2076 = vmatprep.subr.bf16.mxu1 %v6412_v5  ;;  %v6491_v4 = vld [vmem:[#allocation7 + $0x5c0] ss:$16 sps:$4 sm:$0xff]   ;;  %v6494_v5 = vld [vmem:[#allocation7 + $0x5c8] ss:$16 sps:$4 sm:$0xff]  }
 0x140   :  { %1104 = vmatmul.mubr.bf16.vlgmr.msra.gmra.mrb[0].mxu0 %v238_v15  ;;  %1186 = vmatmul.mubr.bf16.vlgmr.msra.gmra.mrb[0].mxu1 %v238_v15  ;;  %v6508_v15 = vld [vmem:[#allocation7 + $0x60c] ss:$16 sps:$4 sm:$0xff]  }
 0x141   :  { %1995 = vmatpush1.bf16.msra.mxu0 %v6407_v7  ;;  %2077 = vmatpush1.bf16.msra.mxu1 %v6410_v8  ;;  %v6502_v7 = vld [vmem:[#allocation7 + $0x5ec] ss:$16 sps:$4 sm:$0xff]   ;;  %v6497_v8 = vld [vmem:[#allocation7 + $0x5e0] ss:$16 sps:$4 sm:$0xff]  }
 0x142   :  { %1996 = vmatprep.subr.bf16.mxu0 %v6415_v13  ;;  %2078 = vmatprep.subr.bf16.mxu1 %v6418_v14  ;;  %v6500_v13 = vld [vmem:[#allocation7 + $0x5e8] ss:$16 sps:$4 sm:$0xff]   ;;  %v6505_v14 = vld [vmem:[#allocation7 + $0x604] ss:$16 sps:$4 sm:$0xff]  }
 0x145   :  { %1997 = vmatpush1.bf16.msra.mxu0 %v6413_v16  ;;  %2079 = vmatpush1.bf16.msra.mxu1 %v6416_v17  ;;  %v7547_v16 = vld [vmem:[#allocation8] sm:$0xf] }
 0x146   :  { %1998 = vmatprep.subr.bf16.mxu0 %v6421_v18  ;;  %2080 = vmatprep.subr.bf16.mxu1 %v6424_v19  ;;  %v373_v17 = vrot.slane %v7547_v16, %v7520_v9  ;;  %v377_v18 = vrot.slane %v7547_v16, %v7522_v10  ;;  %v385_v19 = vrot.slane %v7547_v16, %v7526_v12 }
 0x149   :  { %1999 = vmatpush1.bf16.msra.mxu0 %v6419_v55  ;;  %2081 = vmatpush1.bf16.msra.mxu1 %v6422_v20 }
 0x14a   :  { %2000 = vmatprep.subr.bf16.mxu0 %v6427_v21  ;;  %2082 = vmatprep.subr.bf16.mxu1 %v6430_v22 }
 0x14d   :  { %2001 = vmatpush1.bf16.msra.mxu0 %v6425_v23  ;;  %2083 = vmatpush1.bf16.msra.mxu1 %v6428_v24 }
 0x14e   :  { %2002 = vmatprep.subr.bf16.mxu0 %v6433_v25  ;;  %2084 = vmatprep.subr.bf16.mxu1 %v6436_v26 }
 0x151   :  { %2003 = vmatpush1.bf16.msra.mxu0 %v6431_v27  ;;  %2085 = vmatpush1.bf16.msra.mxu1 %v6434_v28 }
 0x152   :  { %2004 = vmatprep.subr.bf16.mxu0 %v6439_v29  ;;  %2086 = vmatprep.subr.bf16.mxu1 %v6442_v30 }
 0x155   :  { %2005 = vmatpush1.bf16.msra.mxu0 %v6437_v31  ;;  %2087 = vmatpush1.bf16.msra.mxu1 %v6440_v32 }
 0x156   :  { %2006 = vmatprep.subr.bf16.mxu0 %v6445_v33  ;;  %2088 = vmatprep.subr.bf16.mxu1 %v6448_v34  ;;  %v6503_v34 = vld [vmem:[#allocation7 + $0x600] ss:$16 sps:$4 sm:$0xff]  }
 0x159   :  { %2007 = vmatpush1.bf16.msra.mxu0 %v6443_v35  ;;  %2089 = vmatpush1.bf16.msra.mxu1 %v6446_v36  ;;  %v6506_v35 = vld [vmem:[#allocation7 + $0x608] ss:$16 sps:$4 sm:$0xff]  }
 0x15a   :  { %2008 = vmatprep.subr.bf16.mxu0 %v6451_v37  ;;  %2090 = vmatprep.subr.bf16.mxu1 %v6454_v38  ;;  %v6511_v37 = vld [vmem:[#allocation7 + $0x624] ss:$16 sps:$4 sm:$0xff]   ;;  %v6514_v38 = vld [vmem:[#allocation7 + $0x62c] ss:$16 sps:$4 sm:$0xff]  }
 0x15d   :  { %2009 = vmatpush1.bf16.msra.mxu0 %v6449_v39  ;;  %2091 = vmatpush1.bf16.msra.mxu1 %v6452_v40  ;;  %v6509_v40 = vld [vmem:[#allocation7 + $0x620] ss:$16 sps:$4 sm:$0xff]  }
 0x15e   :  { %2010 = vmatprep.subr.bf16.mxu0 %v6457_v41  ;;  %2092 = vmatprep.subr.bf16.mxu1 %v6460_v42  ;;  %v6512_v41 = vld [vmem:[#allocation7 + $0x628] ss:$16 sps:$4 sm:$0xff]   ;;  %v6517_v42 = vld [vmem:[#allocation7 + $0x644] ss:$16 sps:$4 sm:$0xff]  }
 0x161   :  { %2011 = vmatpush1.bf16.msra.mxu0 %v6455_v43  ;;  %2093 = vmatpush1.bf16.msra.mxu1 %v6458_v44  ;;  %v6520_v43 = vld [vmem:[#allocation7 + $0x64c] ss:$16 sps:$4 sm:$0xff]   ;;  %v6515_v44 = vld [vmem:[#allocation7 + $0x640] ss:$16 sps:$4 sm:$0xff]  }
 0x162   :  { %2012 = vmatprep.subr.bf16.mxu0 %v6463_v45  ;;  %2094 = vmatprep.subr.bf16.mxu1 %v6466_v46  ;;  %v6518_v45 = vld [vmem:[#allocation7 + $0x648] ss:$16 sps:$4 sm:$0xff]   ;;  %v6523_v46 = vld [vmem:[#allocation7 + $0x664] ss:$16 sps:$4 sm:$0xff]  }
 0x165   :  { %2013 = vmatpush1.bf16.msra.mxu0 %v6461_v47  ;;  %2095 = vmatpush1.bf16.msra.mxu1 %v6464_v48  ;;  %v6526_v47 = vld [vmem:[#allocation7 + $0x66c] ss:$16 sps:$4 sm:$0xff]   ;;  %v6521_v48 = vld [vmem:[#allocation7 + $0x660] ss:$16 sps:$4 sm:$0xff]  }
 0x166   :  { %2014 = vmatprep.subr.bf16.mxu0 %v6469_v49  ;;  %2096 = vmatprep.subr.bf16.mxu1 %v6472_v50  ;;  %v6524_v49 = vld [vmem:[#allocation7 + $0x668] ss:$16 sps:$4 sm:$0xff]   ;;  %v6529_v50 = vld [vmem:[#allocation7 + $0x684] ss:$16 sps:$4 sm:$0xff]  }
 0x169   :  { %2015 = vmatpush1.bf16.msra.mxu0 %v6467_v51  ;;  %2097 = vmatpush1.bf16.msra.mxu1 %v6470_v52  ;;  %v6532_v51 = vld [vmem:[#allocation7 + $0x68c] ss:$16 sps:$4 sm:$0xff]   ;;  %v6527_v52 = vld [vmem:[#allocation7 + $0x680] ss:$16 sps:$4 sm:$0xff]  }
 0x16a   :  { %2016 = vmatprep.subr.bf16.mxu0 %v6475_v53  ;;  %2098 = vmatprep.subr.bf16.mxu1 %v6478_v54  ;;  %v6530_v53 = vld [vmem:[#allocation7 + $0x688] ss:$16 sps:$4 sm:$0xff]   ;;  %v6535_v54 = vld [vmem:[#allocation7 + $0x6a4] ss:$16 sps:$4 sm:$0xff]  }
 0x16d   :  { %2017 = vmatpush1.bf16.msra.mxu0 %v6473_v56  ;;  %2099 = vmatpush1.bf16.msra.mxu1 %v6476_v57  ;;  %v6538_v56 = vld [vmem:[#allocation7 + $0x6ac] ss:$16 sps:$4 sm:$0xff]   ;;  %v6533_v57 = vld [vmem:[#allocation7 + $0x6a0] ss:$16 sps:$4 sm:$0xff]  }
 0x16e   :  { %2018 = vmatprep.subr.bf16.mxu0 %v6481_v58  ;;  %2100 = vmatprep.subr.bf16.mxu1 %v6484_v59  ;;  %v6536_v58 = vld [vmem:[#allocation7 + $0x6a8] ss:$16 sps:$4 sm:$0xff]   ;;  %v6541_v59 = vld [vmem:[#allocation7 + $0x6c4] ss:$16 sps:$4 sm:$0xff]  }
 0x171   :  { %2019 = vmatpush1.bf16.msra.mxu0 %v6479_v60  ;;  %2101 = vmatpush1.bf16.msra.mxu1 %v6482_v61  ;;  %v6544_v60 = vld [vmem:[#allocation7 + $0x6cc] ss:$16 sps:$4 sm:$0xff]   ;;  %v6539_v61 = vld [vmem:[#allocation7 + $0x6c0] ss:$16 sps:$4 sm:$0xff]  }
 0x172   :  { %2020 = vmatprep.subr.bf16.mxu0 %v6487_v62  ;;  %2102 = vmatprep.subr.bf16.mxu1 %v6490_v63  ;;  %v6542_v62 = vld [vmem:[#allocation7 + $0x6c8] ss:$16 sps:$4 sm:$0xff]   ;;  %v6547_v63 = vld [vmem:[#allocation7 + $0x6e4] ss:$16 sps:$4 sm:$0xff]  }
 0x175   :  { %2021 = vmatpush1.bf16.msra.mxu0 %v6485_v0  ;;  %2103 = vmatpush1.bf16.msra.mxu1 %v6488_v1  ;;  %v6550_v0 = vld [vmem:[#allocation7 + $0x6ec] ss:$16 sps:$4 sm:$0xff]   ;;  %v6545_v1 = vld [vmem:[#allocation7 + $0x6e0] ss:$16 sps:$4 sm:$0xff]  }
 0x176   :  { %2022 = vmatprep.subr.bf16.mxu0 %v6493_v2  ;;  %2104 = vmatprep.subr.bf16.mxu1 %v6496_v3  ;;  %v6548_v2 = vld [vmem:[#allocation7 + $0x6e8] ss:$16 sps:$4 sm:$0xff]   ;;  %v6553_v3 = vld [vmem:[#allocation7 + $0x704] ss:$16 sps:$4 sm:$0xff]  }
 0x179   :  { %2023 = vmatpush1.bf16.msra.mxu0 %v6491_v4  ;;  %2105 = vmatpush1.bf16.msra.mxu1 %v6494_v5  ;;  %v6556_v4 = vld [vmem:[#allocation7 + $0x70c] ss:$16 sps:$4 sm:$0xff]   ;;  %v6551_v5 = vld [vmem:[#allocation7 + $0x700] ss:$16 sps:$4 sm:$0xff]  }
 0x17a   :  { %2024 = vmatprep.subr.bf16.mxu0 %v6499_v6  ;;  %2106 = vmatprep.subr.bf16.mxu1 %v6502_v7  ;;  %v6554_v6 = vld [vmem:[#allocation7 + $0x708] ss:$16 sps:$4 sm:$0xff]   ;;  %v6559_v7 = vld [vmem:[#allocation7 + $0x724] ss:$16 sps:$4 sm:$0xff]  }
 0x17d   :  { %2025 = vmatpush1.bf16.msra.mxu0 %v6497_v8  ;;  %2107 = vmatpush1.bf16.msra.mxu1 %v6500_v13  ;;  %v6562_v8 = vld [vmem:[#allocation7 + $0x72c] ss:$16 sps:$4 sm:$0xff]   ;;  %v6557_v13 = vld [vmem:[#allocation7 + $0x720] ss:$16 sps:$4 sm:$0xff]  }
 0x17e   :  { %2035 = vmatprep.subr.bf16.mxu0 %v6505_v14  ;;  %2117 = vmatprep.subr.bf16.mxu1 %v6508_v15  ;;  %v6560_v14 = vld [vmem:[#allocation7 + $0x728] ss:$16 sps:$4 sm:$0xff]   ;;  %v6565_v15 = vld [vmem:[#allocation7 + $0x744] ss:$16 sps:$4 sm:$0xff]  }
 0x213   :  { %v1105_v55 = vpop.f32.mrb[0].mxu0  ;;  %v7555_v20 = vpop.f32.mrb[0].mxu1 }
 0x214   :  { %v6137_v21 = vadd.f32 %v1105_v55, %v373_v17  ;;  %v1107_v22 = vpop.f32.mrb[1].mxu0  ;;  %v1189_v23 = vpop.f32.mrb[1].mxu1  ;;  %v6568_v17 = vld [vmem:[#allocation7 + $0x74c] ss:$16 sps:$4 sm:$0xff]   ;;  %v6571_v55 = vld [vmem:[#allocation7 + $0x764] ss:$16 sps:$4 sm:$0xff]  }
 0x215   :  { %v6138_v24 = vadd.f32 %v1107_v22, %v377_v18  ;;  %v6140_v25 = vadd.f32 %v1189_v23, %v385_v19  ;;  %v1109_v26 = vpop.f32.mrb[2].mxu0  ;;  %v1191_v27 = vpop.f32.mrb[2].mxu1  ;;  %v6563_v18 = vld [vmem:[#allocation7 + $0x740] ss:$16 sps:$4 sm:$0xff]   ;;  %v6566_v19 = vld [vmem:[#allocation7 + $0x748] ss:$16 sps:$4 sm:$0xff]  }
 0x216   :  { %v1194_v28 = vmax.f32 %v6137_v21, 0.0  ;;  %v1110_v29 = vpop.f32.mrb[3].mxu0  ;;  %v1192_v30 = vpop.f32.mrb[3].mxu1  ;;  %v6574_v21 = vld [vmem:[#allocation7 + $0x76c] ss:$16 sps:$4 sm:$0xff]  }
 0x217   :  { %v1195_v31 = vmax.f32 %v6138_v24, 0.0  ;;  %v1197_v32 = vmax.f32 %v6140_v25, 0.0  ;;  %v6569_v22 = vld [vmem:[#allocation7 + $0x760] ss:$16 sps:$4 sm:$0xff]   ;;  %v6572_v23 = vld [vmem:[#allocation7 + $0x768] ss:$16 sps:$4 sm:$0xff]  }
 0x218   :  { %v1198_v36 = vpack.c.bf16 %v1194_v28, %v1194_v28  ;;  %v6577_v24 = vld [vmem:[#allocation7 + $0x784] ss:$16 sps:$4 sm:$0xff]   ;;  %v6580_v25 = vld [vmem:[#allocation7 + $0x78c] ss:$16 sps:$4 sm:$0xff]   ;;  %v6575_v26 = vld [vmem:[#allocation7 + $0x780] ss:$16 sps:$4 sm:$0xff]  }
 0x219   :  { %v1199_v33 = vpack.c.bf16 %v1195_v31, %v1195_v31  ;;  %v1201_v39 = vpack.c.bf16 %v1197_v32, %v1197_v32  ;;  %v6578_v27 = vld [vmem:[#allocation7 + $0x788] ss:$16 sps:$4 sm:$0xff]   ;;  %v6583_v28 = vld [vmem:[#allocation7 + $0x7a4] ss:$16 sps:$4 sm:$0xff]   ;;  %v6586_v29 = vld [vmem:[#allocation7 + $0x7ac] ss:$16 sps:$4 sm:$0xff]   ;;  %v381_v32 = vrot.slane %v7547_v16, %v7524_v11 }
 0x21a   :  { %v6581_v30 = vld [vmem:[#allocation7 + $0x7a0] ss:$16 sps:$4 sm:$0xff]   ;;  %v6584_v31 = vld [vmem:[#allocation7 + $0x7a8] ss:$16 sps:$4 sm:$0xff]   ;;  %v6601_v16 = vld [vmem:[#allocation7 + $0x804] ss:$16 sps:$4 sm:$0xff]  }
 0x21b   :  { %2026 = vmatprep.mubr.bf16.mxu0 %v1199_v33  ;;  %2108 = vmatprep.mubr.bf16.mxu1 %v1199_v33  ;;  %v6589_v33 = vld [vmem:[#allocation7 + $0x7c4] ss:$16 sps:$4 sm:$0xff]  }
 0x21c   :  { %2027 = vmatmul.mubr.bf16.vlgmr.msra.gmra.mrb[4].mxu0 %v1198_v36  ;;  %2109 = vmatmul.mubr.bf16.vlgmr.msra.gmra.mrb[4].mxu1 %v1198_v36  ;;  %v6590_v36 = vld [vmem:[#allocation7 + $0x7c8] ss:$16 sps:$4 sm:$0xff]  }
 0x21d   :  { %2036 = vmatpush1.bf16.msra.mxu0 %v6503_v34  ;;  %2118 = vmatpush1.bf16.msra.mxu1 %v6506_v35  ;;  %v6592_v34 = vld [vmem:[#allocation7 + $0x7cc] ss:$16 sps:$4 sm:$0xff]   ;;  %v6587_v35 = vld [vmem:[#allocation7 + $0x7c0] ss:$16 sps:$4 sm:$0xff]  }
 0x21e   :  { %2067 = vmatprep.mubr.bf16.mxu0 %v1201_v39  ;;  %2149 = vmatprep.mubr.bf16.mxu1 %v1201_v39  ;;  %v6598_v39 = vld [vmem:[#allocation7 + $0x7ec] ss:$16 sps:$4 sm:$0xff]  }
 0x21f   :  { %2037 = vmatprep.subr.bf16.mxu0 %v6511_v37  ;;  %2119 = vmatprep.subr.bf16.mxu1 %v6514_v38  ;;  %v6139_v37 = vadd.f32 %v7555_v20, %v381_v32  ;;  %v6595_v38 = vld [vmem:[#allocation7 + $0x7e4] ss:$16 sps:$4 sm:$0xff]  }
 0x220   :  { %v6607_v20 = vld [vmem:[#allocation7 + $0x824] ss:$16 sps:$4 sm:$0xff]  }
 0x221   :  { %2038 = vmatpush1.bf16.msra.mxu0 %v6509_v40  ;;  %2120 = vmatpush1.bf16.msra.mxu1 %v6512_v41  ;;  %v6593_v40 = vld [vmem:[#allocation7 + $0x7e0] ss:$16 sps:$4 sm:$0xff]   ;;  %v6596_v41 = vld [vmem:[#allocation7 + $0x7e8] ss:$16 sps:$4 sm:$0xff]   ;;  %v6673_v32 = vld [vmem:[#allocation7 + $0x984] ss:$16 sps:$4 sm:$0xff]  }
 0x222   :  { %2039 = vmatprep.subr.bf16.mxu0 %v6517_v42  ;;  %2121 = vmatprep.subr.bf16.mxu1 %v6520_v43  ;;  %v1196_v42 = vmax.f32 %v6139_v37, 0.0  ;;  %v6604_v43 = vld [vmem:[#allocation7 + $0x80c] ss:$16 sps:$4 sm:$0xff]  }
 0x223   :  { %v6682_v37 = vld [vmem:[#allocation7 + $0x9ac] ss:$16 sps:$4 sm:$0xff]  }
 0x225   :  { %2040 = vmatpush1.bf16.msra.mxu0 %v6515_v44  ;;  %2122 = vmatpush1.bf16.msra.mxu1 %v6518_v45  ;;  %v6599_v44 = vld [vmem:[#allocation7 + $0x800] ss:$16 sps:$4 sm:$0xff]   ;;  %v6602_v45 = vld [vmem:[#allocation7 + $0x808] ss:$16 sps:$4 sm:$0xff]  }
 0x226   :  { %2041 = vmatprep.subr.bf16.mxu0 %v6523_v46  ;;  %2123 = vmatprep.subr.bf16.mxu1 %v6526_v47  ;;  %v1200_v46 = vpack.c.bf16 %v1196_v42, %v1196_v42  ;;  %v6610_v47 = vld [vmem:[#allocation7 + $0x82c] ss:$16 sps:$4 sm:$0xff]   ;;  %v6683_v42 = vld [vmem:[#allocation7 + $0x9c0] ss:$16 sps:$4 sm:$0xff]  }
 0x229   :  { %2042 = vmatpush1.bf16.msra.mxu0 %v6521_v48  ;;  %2124 = vmatpush1.bf16.msra.mxu1 %v6524_v49  ;;  %v6605_v48 = vld [vmem:[#allocation7 + $0x820] ss:$16 sps:$4 sm:$0xff]   ;;  %v6608_v49 = vld [vmem:[#allocation7 + $0x828] ss:$16 sps:$4 sm:$0xff]  }
 0x22a   :  { %2043 = vmatprep.subr.bf16.mxu0 %v6529_v50  ;;  %2125 = vmatprep.subr.bf16.mxu1 %v6532_v51  ;;  %v6613_v50 = vld [vmem:[#allocation7 + $0x844] ss:$16 sps:$4 sm:$0xff]   ;;  %v6616_v51 = vld [vmem:[#allocation7 + $0x84c] ss:$16 sps:$4 sm:$0xff]  }
 0x22d   :  { %2044 = vmatpush1.bf16.msra.mxu0 %v6527_v52  ;;  %2126 = vmatpush1.bf16.msra.mxu1 %v6530_v53  ;;  %v6611_v52 = vld [vmem:[#allocation7 + $0x840] ss:$16 sps:$4 sm:$0xff]   ;;  %v6614_v53 = vld [vmem:[#allocation7 + $0x848] ss:$16 sps:$4 sm:$0xff]  }
 0x22e   :  { %2045 = vmatprep.subr.bf16.mxu0 %v6535_v54  ;;  %2127 = vmatprep.subr.bf16.mxu1 %v6538_v56  ;;  %v6619_v54 = vld [vmem:[#allocation7 + $0x864] ss:$16 sps:$4 sm:$0xff]   ;;  %v6622_v56 = vld [vmem:[#allocation7 + $0x86c] ss:$16 sps:$4 sm:$0xff]  }
 0x231   :  { %2046 = vmatpush1.bf16.msra.mxu0 %v6533_v57  ;;  %2128 = vmatpush1.bf16.msra.mxu1 %v6536_v58  ;;  %v6617_v57 = vld [vmem:[#allocation7 + $0x860] ss:$16 sps:$4 sm:$0xff]   ;;  %v6620_v58 = vld [vmem:[#allocation7 + $0x868] ss:$16 sps:$4 sm:$0xff]  }
 0x232   :  { %2047 = vmatprep.subr.bf16.mxu0 %v6541_v59  ;;  %2129 = vmatprep.subr.bf16.mxu1 %v6544_v60  ;;  %v6625_v59 = vld [vmem:[#allocation7 + $0x884] ss:$16 sps:$4 sm:$0xff]   ;;  %v6628_v60 = vld [vmem:[#allocation7 + $0x88c] ss:$16 sps:$4 sm:$0xff]  }
 0x235   :  { %2048 = vmatpush1.bf16.msra.mxu0 %v6539_v61  ;;  %2130 = vmatpush1.bf16.msra.mxu1 %v6542_v62  ;;  %v6623_v61 = vld [vmem:[#allocation7 + $0x880] ss:$16 sps:$4 sm:$0xff]   ;;  %v6626_v62 = vld [vmem:[#allocation7 + $0x888] ss:$16 sps:$4 sm:$0xff]  }
 0x236   :  { %2049 = vmatprep.subr.bf16.mxu0 %v6547_v63  ;;  %2131 = vmatprep.subr.bf16.mxu1 %v6550_v0  ;;  %v6631_v63 = vld [vmem:[#allocation7 + $0x8a4] ss:$16 sps:$4 sm:$0xff]   ;;  %v6634_v0 = vld [vmem:[#allocation7 + $0x8ac] ss:$16 sps:$4 sm:$0xff]  }
 0x239   :  { %2050 = vmatpush1.bf16.msra.mxu0 %v6545_v1  ;;  %2132 = vmatpush1.bf16.msra.mxu1 %v6548_v2  ;;  %v6629_v1 = vld [vmem:[#allocation7 + $0x8a0] ss:$16 sps:$4 sm:$0xff]   ;;  %v6632_v2 = vld [vmem:[#allocation7 + $0x8a8] ss:$16 sps:$4 sm:$0xff]  }
 0x23a   :  { %2051 = vmatprep.subr.bf16.mxu0 %v6553_v3  ;;  %2133 = vmatprep.subr.bf16.mxu1 %v6556_v4  ;;  %v6637_v3 = vld [vmem:[#allocation7 + $0x8c4] ss:$16 sps:$4 sm:$0xff]   ;;  %v6640_v4 = vld [vmem:[#allocation7 + $0x8cc] ss:$16 sps:$4 sm:$0xff]  }
 0x23d   :  { %2052 = vmatpush1.bf16.msra.mxu0 %v6551_v5  ;;  %2134 = vmatpush1.bf16.msra.mxu1 %v6554_v6  ;;  %v6635_v5 = vld [vmem:[#allocation7 + $0x8c0] ss:$16 sps:$4 sm:$0xff]   ;;  %v6638_v6 = vld [vmem:[#allocation7 + $0x8c8] ss:$16 sps:$4 sm:$0xff]  }
 0x23e   :  { %2053 = vmatprep.subr.bf16.mxu0 %v6559_v7  ;;  %2135 = vmatprep.subr.bf16.mxu1 %v6562_v8  ;;  %v6643_v7 = vld [vmem:[#allocation7 + $0x8e4] ss:$16 sps:$4 sm:$0xff]   ;;  %v6646_v8 = vld [vmem:[#allocation7 + $0x8ec] ss:$16 sps:$4 sm:$0xff]  }
 0x241   :  { %2054 = vmatpush1.bf16.msra.mxu0 %v6557_v13  ;;  %2136 = vmatpush1.bf16.msra.mxu1 %v6560_v14  ;;  %v6641_v13 = vld [vmem:[#allocation7 + $0x8e0] ss:$16 sps:$4 sm:$0xff]   ;;  %v6644_v14 = vld [vmem:[#allocation7 + $0x8e8] ss:$16 sps:$4 sm:$0xff]  }
 0x242   :  { %2055 = vmatprep.subr.bf16.mxu0 %v6565_v15  ;;  %2137 = vmatprep.subr.bf16.mxu1 %v6568_v17  ;;  %v6649_v15 = vld [vmem:[#allocation7 + $0x904] ss:$16 sps:$4 sm:$0xff]   ;;  %v6652_v17 = vld [vmem:[#allocation7 + $0x90c] ss:$16 sps:$4 sm:$0xff]  }
 0x245   :  { %2056 = vmatpush1.bf16.msra.mxu0 %v6563_v18  ;;  %2138 = vmatpush1.bf16.msra.mxu1 %v6566_v19  ;;  %v6647_v18 = vld [vmem:[#allocation7 + $0x900] ss:$16 sps:$4 sm:$0xff]   ;;  %v6650_v19 = vld [vmem:[#allocation7 + $0x908] ss:$16 sps:$4 sm:$0xff]  }
 0x246   :  { %2057 = vmatprep.subr.bf16.mxu0 %v6571_v55  ;;  %2139 = vmatprep.subr.bf16.mxu1 %v6574_v21  ;;  %v6655_v55 = vld [vmem:[#allocation7 + $0x924] ss:$16 sps:$4 sm:$0xff]   ;;  %v6658_v21 = vld [vmem:[#allocation7 + $0x92c] ss:$16 sps:$4 sm:$0xff]  }
 0x249   :  { %2058 = vmatpush1.bf16.msra.mxu0 %v6569_v22  ;;  %2140 = vmatpush1.bf16.msra.mxu1 %v6572_v23  ;;  %v6653_v22 = vld [vmem:[#allocation7 + $0x920] ss:$16 sps:$4 sm:$0xff]   ;;  %v6656_v23 = vld [vmem:[#allocation7 + $0x928] ss:$16 sps:$4 sm:$0xff]  }
 0x24a   :  { %2059 = vmatprep.subr.bf16.mxu0 %v6577_v24  ;;  %2141 = vmatprep.subr.bf16.mxu1 %v6580_v25  ;;  %v6661_v24 = vld [vmem:[#allocation7 + $0x944] ss:$16 sps:$4 sm:$0xff]   ;;  %v6664_v25 = vld [vmem:[#allocation7 + $0x94c] ss:$16 sps:$4 sm:$0xff]  }
 0x24d   :  { %2060 = vmatpush1.bf16.msra.mxu0 %v6575_v26  ;;  %2142 = vmatpush1.bf16.msra.mxu1 %v6578_v27  ;;  %v6659_v26 = vld [vmem:[#allocation7 + $0x940] ss:$16 sps:$4 sm:$0xff]   ;;  %v6662_v27 = vld [vmem:[#allocation7 + $0x948] ss:$16 sps:$4 sm:$0xff]  }
 0x24e   :  { %2061 = vmatprep.subr.bf16.mxu0 %v6583_v28  ;;  %2143 = vmatprep.subr.bf16.mxu1 %v6586_v29  ;;  %v6667_v28 = vld [vmem:[#allocation7 + $0x964] ss:$16 sps:$4 sm:$0xff]   ;;  %v6670_v29 = vld [vmem:[#allocation7 + $0x96c] ss:$16 sps:$4 sm:$0xff]  }
 0x251   :  { %2062 = vmatpush1.bf16.msra.mxu0 %v6581_v30  ;;  %2144 = vmatpush1.bf16.msra.mxu1 %v6584_v31  ;;  %v6665_v30 = vld [vmem:[#allocation7 + $0x960] ss:$16 sps:$4 sm:$0xff]   ;;  %v6668_v31 = vld [vmem:[#allocation7 + $0x968] ss:$16 sps:$4 sm:$0xff]  }
 0x252   :  { %2063 = vmatprep.subr.bf16.mxu0 %v6589_v33  ;;  %2145 = vmatprep.subr.bf16.mxu1 %v6592_v34  ;;  %v6676_v33 = vld [vmem:[#allocation7 + $0x98c] ss:$16 sps:$4 sm:$0xff]   ;;  %v6671_v34 = vld [vmem:[#allocation7 + $0x980] ss:$16 sps:$4 sm:$0xff]  }
 0x255   :  { %2064 = vmatpush1.bf16.msra.mxu0 %v6587_v35  ;;  %2146 = vmatpush1.bf16.msra.mxu1 %v6590_v36  ;;  %v6674_v35 = vld [vmem:[#allocation7 + $0x988] ss:$16 sps:$4 sm:$0xff]   ;;  %v6679_v36 = vld [vmem:[#allocation7 + $0x9a4] ss:$16 sps:$4 sm:$0xff]  }
 0x256   :  { %2065 = vmatprep.subr.bf16.mxu0 %v6595_v38  ;;  %2147 = vmatprep.subr.bf16.mxu1 %v6598_v39  ;;  %v6677_v38 = vld [vmem:[#allocation7 + $0x9a0] ss:$16 sps:$4 sm:$0xff]   ;;  %v6680_v39 = vld [vmem:[#allocation7 + $0x9a8] ss:$16 sps:$4 sm:$0xff]  }
 0x259   :  { %2066 = vmatpush1.bf16.msra.mxu0 %v6593_v40  ;;  %2148 = vmatpush1.bf16.msra.mxu1 %v6596_v41  ;;  %v6685_v40 = vld [vmem:[#allocation7 + $0x9c4] ss:$16 sps:$4 sm:$0xff]   ;;  %v6688_v41 = vld [vmem:[#allocation7 + $0x9cc] ss:$16 sps:$4 sm:$0xff]  }
 0x25a   :  { %2958 = vmatprep.subr.bf16.mxu0 %v6601_v16  ;;  %3040 = vmatprep.subr.bf16.mxu1 %v6604_v43  ;;  %v6686_v16 = vld [vmem:[#allocation7 + $0x9c8] ss:$16 sps:$4 sm:$0xff]   ;;  %v6691_v43 = vld [vmem:[#allocation7 + $0x9e4] ss:$16 sps:$4 sm:$0xff]  }
 0x25c   :  { %2068 = vmatmul.mubr.bf16.vlgmr.msra.gmra.mrb[4].mxu0 %v1200_v46  ;;  %2150 = vmatmul.mubr.bf16.vlgmr.msra.gmra.mrb[4].mxu1 %v1200_v46  ;;  %v6692_v46 = vld [vmem:[#allocation7 + $0x9e8] ss:$16 sps:$4 sm:$0xff]  }
 0x25d   :  { %2959 = vmatpush1.bf16.msra.mxu0 %v6599_v44  ;;  %3041 = vmatpush1.bf16.msra.mxu1 %v6602_v45  ;;  %v6694_v44 = vld [vmem:[#allocation7 + $0x9ec] ss:$16 sps:$4 sm:$0xff]   ;;  %v6689_v45 = vld [vmem:[#allocation7 + $0x9e0] ss:$16 sps:$4 sm:$0xff]  }
 0x25e   :  { %2960 = vmatprep.subr.bf16.mxu0 %v6607_v20  ;;  %3042 = vmatprep.subr.bf16.mxu1 %v6610_v47  ;;  %v6697_v20 = vld [vmem:[#allocation7 + $0xa04] ss:$16 sps:$4 sm:$0xff]   ;;  %v6700_v47 = vld [vmem:[#allocation7 + $0xa0c] ss:$16 sps:$4 sm:$0xff]  }
 0x261   :  { %2961 = vmatpush1.bf16.msra.mxu0 %v6605_v48  ;;  %3043 = vmatpush1.bf16.msra.mxu1 %v6608_v49  ;;  %v7560_v48 = vld [vmem:[#allocation8 + $0x4] sm:$0xf] }
 0x262   :  { %2962 = vmatprep.subr.bf16.mxu0 %v6613_v50  ;;  %3044 = vmatprep.subr.bf16.mxu1 %v6616_v51  ;;  %v1337_v49 = vrot.slane %v7560_v48, %v7520_v9  ;;  %v1341_v50 = vrot.slane %v7560_v48, %v7522_v10  ;;  %v1349_v51 = vrot.slane %v7560_v48, %v7526_v12 }
 0x265   :  { %2963 = vmatpush1.bf16.msra.mxu0 %v6611_v52  ;;  %3045 = vmatpush1.bf16.msra.mxu1 %v6614_v53 }
 0x266   :  { %2964 = vmatprep.subr.bf16.mxu0 %v6619_v54  ;;  %3046 = vmatprep.subr.bf16.mxu1 %v6622_v56 }
 0x269   :  { %2965 = vmatpush1.bf16.msra.mxu0 %v6617_v57  ;;  %3047 = vmatpush1.bf16.msra.mxu1 %v6620_v58 }
 0x26a   :  { %2966 = vmatprep.subr.bf16.mxu0 %v6625_v59  ;;  %3048 = vmatprep.subr.bf16.mxu1 %v6628_v60 }
 0x26d   :  { %2967 = vmatpush1.bf16.msra.mxu0 %v6623_v61  ;;  %3049 = vmatpush1.bf16.msra.mxu1 %v6626_v62 }
 0x26e   :  { %2968 = vmatprep.subr.bf16.mxu0 %v6631_v63  ;;  %3050 = vmatprep.subr.bf16.mxu1 %v6634_v0 }
 0x271   :  { %2969 = vmatpush1.bf16.msra.mxu0 %v6629_v1  ;;  %3051 = vmatpush1.bf16.msra.mxu1 %v6632_v2 }
 0x272   :  { %2970 = vmatprep.subr.bf16.mxu0 %v6637_v3  ;;  %3052 = vmatprep.subr.bf16.mxu1 %v6640_v4  ;;  %v6695_v4 = vld [vmem:[#allocation7 + $0xa00] ss:$16 sps:$4 sm:$0xff]  }
 0x275   :  { %2971 = vmatpush1.bf16.msra.mxu0 %v6635_v5  ;;  %3053 = vmatpush1.bf16.msra.mxu1 %v6638_v6  ;;  %v6698_v5 = vld [vmem:[#allocation7 + $0xa08] ss:$16 sps:$4 sm:$0xff]  }
 0x276   :  { %2972 = vmatprep.subr.bf16.mxu0 %v6643_v7  ;;  %3054 = vmatprep.subr.bf16.mxu1 %v6646_v8  ;;  %v6703_v7 = vld [vmem:[#allocation7 + $0xa24] ss:$16 sps:$4 sm:$0xff]   ;;  %v6706_v8 = vld [vmem:[#allocation7 + $0xa2c] ss:$16 sps:$4 sm:$0xff]  }
 0x279   :  { %2973 = vmatpush1.bf16.msra.mxu0 %v6641_v13  ;;  %3055 = vmatpush1.bf16.msra.mxu1 %v6644_v14  ;;  %v6701_v14 = vld [vmem:[#allocation7 + $0xa20] ss:$16 sps:$4 sm:$0xff]  }
 0x27a   :  { %2974 = vmatprep.subr.bf16.mxu0 %v6649_v15  ;;  %3056 = vmatprep.subr.bf16.mxu1 %v6652_v17  ;;  %v6704_v15 = vld [vmem:[#allocation7 + $0xa28] ss:$16 sps:$4 sm:$0xff]   ;;  %v6709_v17 = vld [vmem:[#allocation7 + $0xa44] ss:$16 sps:$4 sm:$0xff]  }
 0x27d   :  { %2975 = vmatpush1.bf16.msra.mxu0 %v6647_v18  ;;  %3057 = vmatpush1.bf16.msra.mxu1 %v6650_v19  ;;  %v6712_v18 = vld [vmem:[#allocation7 + $0xa4c] ss:$16 sps:$4 sm:$0xff]   ;;  %v6707_v19 = vld [vmem:[#allocation7 + $0xa40] ss:$16 sps:$4 sm:$0xff]  }
 0x27e   :  { %2976 = vmatprep.subr.bf16.mxu0 %v6655_v55  ;;  %3058 = vmatprep.subr.bf16.mxu1 %v6658_v21  ;;  %v6710_v55 = vld [vmem:[#allocation7 + $0xa48] ss:$16 sps:$4 sm:$0xff]   ;;  %v6715_v21 = vld [vmem:[#allocation7 + $0xa64] ss:$16 sps:$4 sm:$0xff]  }
 0x281   :  { %2977 = vmatpush1.bf16.msra.mxu0 %v6653_v22  ;;  %3059 = vmatpush1.bf16.msra.mxu1 %v6656_v23  ;;  %v6718_v22 = vld [vmem:[#allocation7 + $0xa6c] ss:$16 sps:$4 sm:$0xff]   ;;  %v6713_v23 = vld [vmem:[#allocation7 + $0xa60] ss:$16 sps:$4 sm:$0xff]  }
 0x282   :  { %2978 = vmatprep.subr.bf16.mxu0 %v6661_v24  ;;  %3060 = vmatprep.subr.bf16.mxu1 %v6664_v25  ;;  %v6716_v24 = vld [vmem:[#allocation7 + $0xa68] ss:$16 sps:$4 sm:$0xff]   ;;  %v6721_v25 = vld [vmem:[#allocation7 + $0xa84] ss:$16 sps:$4 sm:$0xff]  }
 0x285   :  { %2979 = vmatpush1.bf16.msra.mxu0 %v6659_v26  ;;  %3061 = vmatpush1.bf16.msra.mxu1 %v6662_v27  ;;  %v6724_v26 = vld [vmem:[#allocation7 + $0xa8c] ss:$16 sps:$4 sm:$0xff]   ;;  %v6719_v27 = vld [vmem:[#allocation7 + $0xa80] ss:$16 sps:$4 sm:$0xff]  }
 0x286   :  { %2980 = vmatprep.subr.bf16.mxu0 %v6667_v28  ;;  %3062 = vmatprep.subr.bf16.mxu1 %v6670_v29  ;;  %v6722_v28 = vld [vmem:[#allocation7 + $0xa88] ss:$16 sps:$4 sm:$0xff]   ;;  %v6727_v29 = vld [vmem:[#allocation7 + $0xaa4] ss:$16 sps:$4 sm:$0xff]  }
 0x289   :  { %2981 = vmatpush1.bf16.msra.mxu0 %v6665_v30  ;;  %3063 = vmatpush1.bf16.msra.mxu1 %v6668_v31  ;;  %v6730_v30 = vld [vmem:[#allocation7 + $0xaac] ss:$16 sps:$4 sm:$0xff]   ;;  %v6725_v31 = vld [vmem:[#allocation7 + $0xaa0] ss:$16 sps:$4 sm:$0xff]  }
 0x28a   :  { %2982 = vmatprep.subr.bf16.mxu0 %v6673_v32  ;;  %3064 = vmatprep.subr.bf16.mxu1 %v6676_v33  ;;  %v6728_v32 = vld [vmem:[#allocation7 + $0xaa8] ss:$16 sps:$4 sm:$0xff]   ;;  %v6733_v33 = vld [vmem:[#allocation7 + $0xac4] ss:$16 sps:$4 sm:$0xff]  }
 0x28d   :  { %2983 = vmatpush1.bf16.msra.mxu0 %v6671_v34  ;;  %3065 = vmatpush1.bf16.msra.mxu1 %v6674_v35  ;;  %v6736_v34 = vld [vmem:[#allocation7 + $0xacc] ss:$16 sps:$4 sm:$0xff]   ;;  %v6731_v35 = vld [vmem:[#allocation7 + $0xac0] ss:$16 sps:$4 sm:$0xff]  }
 0x28e   :  { %2984 = vmatprep.subr.bf16.mxu0 %v6679_v36  ;;  %3066 = vmatprep.subr.bf16.mxu1 %v6682_v37  ;;  %v6734_v36 = vld [vmem:[#allocation7 + $0xac8] ss:$16 sps:$4 sm:$0xff]   ;;  %v6739_v37 = vld [vmem:[#allocation7 + $0xae4] ss:$16 sps:$4 sm:$0xff]  }
 0x291   :  { %2985 = vmatpush1.bf16.msra.mxu0 %v6677_v38  ;;  %3067 = vmatpush1.bf16.msra.mxu1 %v6680_v39  ;;  %v6742_v38 = vld [vmem:[#allocation7 + $0xaec] ss:$16 sps:$4 sm:$0xff]   ;;  %v6737_v39 = vld [vmem:[#allocation7 + $0xae0] ss:$16 sps:$4 sm:$0xff]  }
 0x292   :  { %2986 = vmatprep.subr.bf16.mxu0 %v6685_v40  ;;  %3068 = vmatprep.subr.bf16.mxu1 %v6688_v41  ;;  %v6740_v40 = vld [vmem:[#allocation7 + $0xae8] ss:$16 sps:$4 sm:$0xff]   ;;  %v6745_v41 = vld [vmem:[#allocation7 + $0xb04] ss:$16 sps:$4 sm:$0xff]  }
 0x295   :  { %2987 = vmatpush1.bf16.msra.mxu0 %v6683_v42  ;;  %3069 = vmatpush1.bf16.msra.mxu1 %v6686_v16  ;;  %v6748_v42 = vld [vmem:[#allocation7 + $0xb0c] ss:$16 sps:$4 sm:$0xff]   ;;  %v6743_v16 = vld [vmem:[#allocation7 + $0xb00] ss:$16 sps:$4 sm:$0xff]  }
 0x296   :  { %2988 = vmatprep.subr.bf16.mxu0 %v6691_v43  ;;  %3070 = vmatprep.subr.bf16.mxu1 %v6694_v44  ;;  %v6746_v43 = vld [vmem:[#allocation7 + $0xb08] ss:$16 sps:$4 sm:$0xff]   ;;  %v6751_v44 = vld [vmem:[#allocation7 + $0xb24] ss:$16 sps:$4 sm:$0xff]  }
 0x299   :  { %2989 = vmatpush1.bf16.msra.mxu0 %v6689_v45  ;;  %3071 = vmatpush1.bf16.msra.mxu1 %v6692_v46  ;;  %v6754_v45 = vld [vmem:[#allocation7 + $0xb2c] ss:$16 sps:$4 sm:$0xff]   ;;  %v6749_v46 = vld [vmem:[#allocation7 + $0xb20] ss:$16 sps:$4 sm:$0xff]  }
 0x29a   :  { %2999 = vmatprep.subr.bf16.mxu0 %v6697_v20  ;;  %3081 = vmatprep.subr.bf16.mxu1 %v6700_v47  ;;  %v6752_v20 = vld [vmem:[#allocation7 + $0xb28] ss:$16 sps:$4 sm:$0xff]   ;;  %v6757_v47 = vld [vmem:[#allocation7 + $0xb44] ss:$16 sps:$4 sm:$0xff]  }
 0x32f   :  { %v2069_v52 = vpop.f32.mrb[4].mxu0  ;;  %v7568_v53 = vpop.f32.mrb[4].mxu1 }
 0x330   :  { %v6141_v54 = vadd.f32 %v2069_v52, %v1337_v49  ;;  %v2071_v56 = vpop.f32.mrb[5].mxu0  ;;  %v2153_v57 = vpop.f32.mrb[5].mxu1  ;;  %v6760_v49 = vld [vmem:[#allocation7 + $0xb4c] ss:$16 sps:$4 sm:$0xff]   ;;  %v6763_v52 = vld [vmem:[#allocation7 + $0xb64] ss:$16 sps:$4 sm:$0xff]  }
 0x331   :  { %v6142_v58 = vadd.f32 %v2071_v56, %v1341_v50  ;;  %v6144_v59 = vadd.f32 %v2153_v57, %v1349_v51  ;;  %v2073_v60 = vpop.f32.mrb[6].mxu0  ;;  %v2155_v61 = vpop.f32.mrb[6].mxu1  ;;  %v6755_v50 = vld [vmem:[#allocation7 + $0xb40] ss:$16 sps:$4 sm:$0xff]   ;;  %v6758_v51 = vld [vmem:[#allocation7 + $0xb48] ss:$16 sps:$4 sm:$0xff]  }
 0x332   :  { %v2158_v62 = vmax.f32 %v6141_v54, 0.0  ;;  %v2074_v63 = vpop.f32.mrb[7].mxu0  ;;  %v2156_v0 = vpop.f32.mrb[7].mxu1  ;;  %v6766_v54 = vld [vmem:[#allocation7 + $0xb6c] ss:$16 sps:$4 sm:$0xff]  }
 0x333   :  { %v2159_v1 = vmax.f32 %v6142_v58, 0.0  ;;  %v2161_v2 = vmax.f32 %v6144_v59, 0.0  ;;  %v6761_v56 = vld [vmem:[#allocation7 + $0xb60] ss:$16 sps:$4 sm:$0xff]   ;;  %v6764_v57 = vld [vmem:[#allocation7 + $0xb68] ss:$16 sps:$4 sm:$0xff]  }
 0x334   :  { %v2162_v6 = vpack.c.bf16 %v2158_v62, %v2158_v62  ;;  %v6769_v58 = vld [vmem:[#allocation7 + $0xb84] ss:$16 sps:$4 sm:$0xff]   ;;  %v6772_v59 = vld [vmem:[#allocation7 + $0xb8c] ss:$16 sps:$4 sm:$0xff]   ;;  %v6767_v60 = vld [vmem:[#allocation7 + $0xb80] ss:$16 sps:$4 sm:$0xff]  }
 0x335   :  { %v2163_v3 = vpack.c.bf16 %v2159_v1, %v2159_v1  ;;  %v2165_v13 = vpack.c.bf16 %v2161_v2, %v2161_v2  ;;  %v6770_v61 = vld [vmem:[#allocation7 + $0xb88] ss:$16 sps:$4 sm:$0xff]   ;;  %v6775_v62 = vld [vmem:[#allocation7 + $0xba4] ss:$16 sps:$4 sm:$0xff]   ;;  %v6778_v63 = vld [vmem:[#allocation7 + $0xbac] ss:$16 sps:$4 sm:$0xff]   ;;  %v1345_v2 = vrot.slane %v7560_v48, %v7524_v11 }
 0x336   :  { %v6773_v0 = vld [vmem:[#allocation7 + $0xba0] ss:$16 sps:$4 sm:$0xff]   ;;  %v6776_v1 = vld [vmem:[#allocation7 + $0xba8] ss:$16 sps:$4 sm:$0xff]   ;;  %v6793_v48 = vld [vmem:[#allocation7 + $0xc04] ss:$16 sps:$4 sm:$0xff]  }
 0x337   :  { %2990 = vmatprep.mubr.bf16.mxu0 %v2163_v3  ;;  %3072 = vmatprep.mubr.bf16.mxu1 %v2163_v3  ;;  %v6781_v3 = vld [vmem:[#allocation7 + $0xbc4] ss:$16 sps:$4 sm:$0xff]  }
 0x338   :  { %2991 = vmatmul.mubr.bf16.vlgmr.msra.gmra.mrb[8].mxu0 %v2162_v6  ;;  %3073 = vmatmul.mubr.bf16.vlgmr.msra.gmra.mrb[8].mxu1 %v2162_v6  ;;  %v6782_v6 = vld [vmem:[#allocation7 + $0xbc8] ss:$16 sps:$4 sm:$0xff]  }
 0x339   :  { %3000 = vmatpush1.bf16.msra.mxu0 %v6695_v4  ;;  %3082 = vmatpush1.bf16.msra.mxu1 %v6698_v5  ;;  %v6784_v4 = vld [vmem:[#allocation7 + $0xbcc] ss:$16 sps:$4 sm:$0xff]   ;;  %v6779_v5 = vld [vmem:[#allocation7 + $0xbc0] ss:$16 sps:$4 sm:$0xff]  }
 0x33a   :  { %3031 = vmatprep.mubr.bf16.mxu0 %v2165_v13  ;;  %3113 = vmatprep.mubr.bf16.mxu1 %v2165_v13  ;;  %v6790_v13 = vld [vmem:[#allocation7 + $0xbec] ss:$16 sps:$4 sm:$0xff]  }
 0x33b   :  { %3001 = vmatprep.subr.bf16.mxu0 %v6703_v7  ;;  %3083 = vmatprep.subr.bf16.mxu1 %v6706_v8  ;;  %v6143_v7 = vadd.f32 %v7568_v53, %v1345_v2  ;;  %v6787_v8 = vld [vmem:[#allocation7 + $0xbe4] ss:$16 sps:$4 sm:$0xff]  }
 0x33c   :  { %v6799_v53 = vld [vmem:[#allocation7 + $0xc24] ss:$16 sps:$4 sm:$0xff]  }
 0x33d   :  { %3002 = vmatpush1.bf16.msra.mxu0 %v6701_v14  ;;  %3084 = vmatpush1.bf16.msra.mxu1 %v6704_v15  ;;  %v6785_v14 = vld [vmem:[#allocation7 + $0xbe0] ss:$16 sps:$4 sm:$0xff]   ;;  %v6788_v15 = vld [vmem:[#allocation7 + $0xbe8] ss:$16 sps:$4 sm:$0xff]   ;;  %v6865_v2 = vld [vmem:[#allocation7 + $0xd84] ss:$16 sps:$4 sm:$0xff]  }
 0x33e   :  { %3003 = vmatprep.subr.bf16.mxu0 %v6709_v17  ;;  %3085 = vmatprep.subr.bf16.mxu1 %v6712_v18  ;;  %v2160_v17 = vmax.f32 %v6143_v7, 0.0  ;;  %v6796_v18 = vld [vmem:[#allocation7 + $0xc0c] ss:$16 sps:$4 sm:$0xff]  }
 0x33f   :  { %v6874_v7 = vld [vmem:[#allocation7 + $0xdac] ss:$16 sps:$4 sm:$0xff]  }
 0x341   :  { %3004 = vmatpush1.bf16.msra.mxu0 %v6707_v19  ;;  %3086 = vmatpush1.bf16.msra.mxu1 %v6710_v55  ;;  %v6791_v19 = vld [vmem:[#allocation7 + $0xc00] ss:$16 sps:$4 sm:$0xff]   ;;  %v6794_v55 = vld [vmem:[#allocation7 + $0xc08] ss:$16 sps:$4 sm:$0xff]  }
 0x342   :  { %3005 = vmatprep.subr.bf16.mxu0 %v6715_v21  ;;  %3087 = vmatprep.subr.bf16.mxu1 %v6718_v22  ;;  %v2164_v21 = vpack.c.bf16 %v2160_v17, %v2160_v17  ;;  %v6802_v22 = vld [vmem:[#allocation7 + $0xc2c] ss:$16 sps:$4 sm:$0xff]   ;;  %v6875_v17 = vld [vmem:[#allocation7 + $0xdc0] ss:$16 sps:$4 sm:$0xff]  }
 0x345   :  { %3006 = vmatpush1.bf16.msra.mxu0 %v6713_v23  ;;  %3088 = vmatpush1.bf16.msra.mxu1 %v6716_v24  ;;  %v6797_v23 = vld [vmem:[#allocation7 + $0xc20] ss:$16 sps:$4 sm:$0xff]   ;;  %v6800_v24 = vld [vmem:[#allocation7 + $0xc28] ss:$16 sps:$4 sm:$0xff]  }
 0x346   :  { %3007 = vmatprep.subr.bf16.mxu0 %v6721_v25  ;;  %3089 = vmatprep.subr.bf16.mxu1 %v6724_v26  ;;  %v6805_v25 = vld [vmem:[#allocation7 + $0xc44] ss:$16 sps:$4 sm:$0xff]   ;;  %v6808_v26 = vld [vmem:[#allocation7 + $0xc4c] ss:$16 sps:$4 sm:$0xff]  }
 0x349   :  { %3008 = vmatpush1.bf16.msra.mxu0 %v6719_v27  ;;  %3090 = vmatpush1.bf16.msra.mxu1 %v6722_v28  ;;  %v6803_v27 = vld [vmem:[#allocation7 + $0xc40] ss:$16 sps:$4 sm:$0xff]   ;;  %v6806_v28 = vld [vmem:[#allocation7 + $0xc48] ss:$16 sps:$4 sm:$0xff]  }
 0x34a   :  { %3009 = vmatprep.subr.bf16.mxu0 %v6727_v29  ;;  %3091 = vmatprep.subr.bf16.mxu1 %v6730_v30  ;;  %v6811_v29 = vld [vmem:[#allocation7 + $0xc64] ss:$16 sps:$4 sm:$0xff]   ;;  %v6814_v30 = vld [vmem:[#allocation7 + $0xc6c] ss:$16 sps:$4 sm:$0xff]  }
 0x34d   :  { %3010 = vmatpush1.bf16.msra.mxu0 %v6725_v31  ;;  %3092 = vmatpush1.bf16.msra.mxu1 %v6728_v32  ;;  %v6809_v31 = vld [vmem:[#allocation7 + $0xc60] ss:$16 sps:$4 sm:$0xff]   ;;  %v6812_v32 = vld [vmem:[#allocation7 + $0xc68] ss:$16 sps:$4 sm:$0xff]  }
 0x34e   :  { %3011 = vmatprep.subr.bf16.mxu0 %v6733_v33  ;;  %3093 = vmatprep.subr.bf16.mxu1 %v6736_v34  ;;  %v6817_v33 = vld [vmem:[#allocation7 + $0xc84] ss:$16 sps:$4 sm:$0xff]   ;;  %v6820_v34 = vld [vmem:[#allocation7 + $0xc8c] ss:$16 sps:$4 sm:$0xff]  }
 0x351   :  { %3012 = vmatpush1.bf16.msra.mxu0 %v6731_v35  ;;  %3094 = vmatpush1.bf16.msra.mxu1 %v6734_v36  ;;  %v6815_v35 = vld [vmem:[#allocation7 + $0xc80] ss:$16 sps:$4 sm:$0xff]   ;;  %v6818_v36 = vld [vmem:[#allocation7 + $0xc88] ss:$16 sps:$4 sm:$0xff]  }
 0x352   :  { %3013 = vmatprep.subr.bf16.mxu0 %v6739_v37  ;;  %3095 = vmatprep.subr.bf16.mxu1 %v6742_v38  ;;  %v6823_v37 = vld [vmem:[#allocation7 + $0xca4] ss:$16 sps:$4 sm:$0xff]   ;;  %v6826_v38 = vld [vmem:[#allocation7 + $0xcac] ss:$16 sps:$4 sm:$0xff]  }
 0x355   :  { %3014 = vmatpush1.bf16.msra.mxu0 %v6737_v39  ;;  %3096 = vmatpush1.bf16.msra.mxu1 %v6740_v40  ;;  %v6821_v39 = vld [vmem:[#allocation7 + $0xca0] ss:$16 sps:$4 sm:$0xff]   ;;  %v6824_v40 = vld [vmem:[#allocation7 + $0xca8] ss:$16 sps:$4 sm:$0xff]  }
 0x356   :  { %3015 = vmatprep.subr.bf16.mxu0 %v6745_v41  ;;  %3097 = vmatprep.subr.bf16.mxu1 %v6748_v42  ;;  %v6829_v41 = vld [vmem:[#allocation7 + $0xcc4] ss:$16 sps:$4 sm:$0xff]   ;;  %v6832_v42 = vld [vmem:[#allocation7 + $0xccc] ss:$16 sps:$4 sm:$0xff]  }
 0x359   :  { %3016 = vmatpush1.bf16.msra.mxu0 %v6743_v16  ;;  %3098 = vmatpush1.bf16.msra.mxu1 %v6746_v43  ;;  %v6827_v16 = vld [vmem:[#allocation7 + $0xcc0] ss:$16 sps:$4 sm:$0xff]   ;;  %v6830_v43 = vld [vmem:[#allocation7 + $0xcc8] ss:$16 sps:$4 sm:$0xff]  }
 0x35a   :  { %3017 = vmatprep.subr.bf16.mxu0 %v6751_v44  ;;  %3099 = vmatprep.subr.bf16.mxu1 %v6754_v45  ;;  %v6835_v44 = vld [vmem:[#allocation7 + $0xce4] ss:$16 sps:$4 sm:$0xff]   ;;  %v6838_v45 = vld [vmem:[#allocation7 + $0xcec] ss:$16 sps:$4 sm:$0xff]  }
 0x35d   :  { %3018 = vmatpush1.bf16.msra.mxu0 %v6749_v46  ;;  %3100 = vmatpush1.bf16.msra.mxu1 %v6752_v20  ;;  %v6833_v46 = vld [vmem:[#allocation7 + $0xce0] ss:$16 sps:$4 sm:$0xff]   ;;  %v6836_v20 = vld [vmem:[#allocation7 + $0xce8] ss:$16 sps:$4 sm:$0xff]  }
 0x35e   :  { %3019 = vmatprep.subr.bf16.mxu0 %v6757_v47  ;;  %3101 = vmatprep.subr.bf16.mxu1 %v6760_v49  ;;  %v6841_v47 = vld [vmem:[#allocation7 + $0xd04] ss:$16 sps:$4 sm:$0xff]   ;;  %v6844_v49 = vld [vmem:[#allocation7 + $0xd0c] ss:$16 sps:$4 sm:$0xff]  }
 0x361   :  { %3020 = vmatpush1.bf16.msra.mxu0 %v6755_v50  ;;  %3102 = vmatpush1.bf16.msra.mxu1 %v6758_v51  ;;  %v6839_v50 = vld [vmem:[#allocation7 + $0xd00] ss:$16 sps:$4 sm:$0xff]   ;;  %v6842_v51 = vld [vmem:[#allocation7 + $0xd08] ss:$16 sps:$4 sm:$0xff]  }
 0x362   :  { %3021 = vmatprep.subr.bf16.mxu0 %v6763_v52  ;;  %3103 = vmatprep.subr.bf16.mxu1 %v6766_v54  ;;  %v6847_v52 = vld [vmem:[#allocation7 + $0xd24] ss:$16 sps:$4 sm:$0xff]   ;;  %v6850_v54 = vld [vmem:[#allocation7 + $0xd2c] ss:$16 sps:$4 sm:$0xff]  }
 0x365   :  { %3022 = vmatpush1.bf16.msra.mxu0 %v6761_v56  ;;  %3104 = vmatpush1.bf16.msra.mxu1 %v6764_v57  ;;  %v6845_v56 = vld [vmem:[#allocation7 + $0xd20] ss:$16 sps:$4 sm:$0xff]   ;;  %v6848_v57 = vld [vmem:[#allocation7 + $0xd28] ss:$16 sps:$4 sm:$0xff]  }
 0x366   :  { %3023 = vmatprep.subr.bf16.mxu0 %v6769_v58  ;;  %3105 = vmatprep.subr.bf16.mxu1 %v6772_v59  ;;  %v6853_v58 = vld [vmem:[#allocation7 + $0xd44] ss:$16 sps:$4 sm:$0xff]   ;;  %v6856_v59 = vld [vmem:[#allocation7 + $0xd4c] ss:$16 sps:$4 sm:$0xff]  }
 0x369   :  { %3024 = vmatpush1.bf16.msra.mxu0 %v6767_v60  ;;  %3106 = vmatpush1.bf16.msra.mxu1 %v6770_v61  ;;  %v6851_v60 = vld [vmem:[#allocation7 + $0xd40] ss:$16 sps:$4 sm:$0xff]   ;;  %v6854_v61 = vld [vmem:[#allocation7 + $0xd48] ss:$16 sps:$4 sm:$0xff]  }
 0x36a   :  { %3025 = vmatprep.subr.bf16.mxu0 %v6775_v62  ;;  %3107 = vmatprep.subr.bf16.mxu1 %v6778_v63  ;;  %v6859_v62 = vld [vmem:[#allocation7 + $0xd64] ss:$16 sps:$4 sm:$0xff]   ;;  %v6862_v63 = vld [vmem:[#allocation7 + $0xd6c] ss:$16 sps:$4 sm:$0xff]  }
 0x36d   :  { %3026 = vmatpush1.bf16.msra.mxu0 %v6773_v0  ;;  %3108 = vmatpush1.bf16.msra.mxu1 %v6776_v1  ;;  %v6857_v0 = vld [vmem:[#allocation7 + $0xd60] ss:$16 sps:$4 sm:$0xff]   ;;  %v6860_v1 = vld [vmem:[#allocation7 + $0xd68] ss:$16 sps:$4 sm:$0xff]  }
 0x36e   :  { %3027 = vmatprep.subr.bf16.mxu0 %v6781_v3  ;;  %3109 = vmatprep.subr.bf16.mxu1 %v6784_v4  ;;  %v6868_v3 = vld [vmem:[#allocation7 + $0xd8c] ss:$16 sps:$4 sm:$0xff]   ;;  %v6863_v4 = vld [vmem:[#allocation7 + $0xd80] ss:$16 sps:$4 sm:$0xff]  }
 0x371   :  { %3028 = vmatpush1.bf16.msra.mxu0 %v6779_v5  ;;  %3110 = vmatpush1.bf16.msra.mxu1 %v6782_v6  ;;  %v6866_v5 = vld [vmem:[#allocation7 + $0xd88] ss:$16 sps:$4 sm:$0xff]   ;;  %v6871_v6 = vld [vmem:[#allocation7 + $0xda4] ss:$16 sps:$4 sm:$0xff]  }
 0x372   :  { %3029 = vmatprep.subr.bf16.mxu0 %v6787_v8  ;;  %3111 = vmatprep.subr.bf16.mxu1 %v6790_v13  ;;  %v6869_v8 = vld [vmem:[#allocation7 + $0xda0] ss:$16 sps:$4 sm:$0xff]   ;;  %v6872_v13 = vld [vmem:[#allocation7 + $0xda8] ss:$16 sps:$4 sm:$0xff]  }
 0x375   :  { %3030 = vmatpush1.bf16.msra.mxu0 %v6785_v14  ;;  %3112 = vmatpush1.bf16.msra.mxu1 %v6788_v15  ;;  %v6877_v14 = vld [vmem:[#allocation7 + $0xdc4] ss:$16 sps:$4 sm:$0xff]   ;;  %v6880_v15 = vld [vmem:[#allocation7 + $0xdcc] ss:$16 sps:$4 sm:$0xff]  }
 0x376   :  { %3922 = vmatprep.subr.bf16.mxu0 %v6793_v48  ;;  %4004 = vmatprep.subr.bf16.mxu1 %v6796_v18  ;;  %v6878_v48 = vld [vmem:[#allocation7 + $0xdc8] ss:$16 sps:$4 sm:$0xff]   ;;  %v6883_v18 = vld [vmem:[#allocation7 + $0xde4] ss:$16 sps:$4 sm:$0xff]  }
 0x378   :  { %3032 = vmatmul.mubr.bf16.vlgmr.msra.gmra.mrb[8].mxu0 %v2164_v21  ;;  %3114 = vmatmul.mubr.bf16.vlgmr.msra.gmra.mrb[8].mxu1 %v2164_v21  ;;  %v6884_v21 = vld [vmem:[#allocation7 + $0xde8] ss:$16 sps:$4 sm:$0xff]  }
 0x379   :  { %3923 = vmatpush1.bf16.msra.mxu0 %v6791_v19  ;;  %4005 = vmatpush1.bf16.msra.mxu1 %v6794_v55  ;;  %v6886_v19 = vld [vmem:[#allocation7 + $0xdec] ss:$16 sps:$4 sm:$0xff]   ;;  %v6881_v55 = vld [vmem:[#allocation7 + $0xde0] ss:$16 sps:$4 sm:$0xff]  }
 0x37a   :  { %3924 = vmatprep.subr.bf16.mxu0 %v6799_v53  ;;  %4006 = vmatprep.subr.bf16.mxu1 %v6802_v22  ;;  %v6889_v53 = vld [vmem:[#allocation7 + $0xe04] ss:$16 sps:$4 sm:$0xff]   ;;  %v6892_v22 = vld [vmem:[#allocation7 + $0xe0c] ss:$16 sps:$4 sm:$0xff]  }
 0x37d   :  { %3925 = vmatpush1.bf16.msra.mxu0 %v6797_v23  ;;  %4007 = vmatpush1.bf16.msra.mxu1 %v6800_v24  ;;  %v7573_v23 = vld [vmem:[#allocation8 + $0x8] sm:$0xf] }
 0x37e   :  { %3926 = vmatprep.subr.bf16.mxu0 %v6805_v25  ;;  %4008 = vmatprep.subr.bf16.mxu1 %v6808_v26  ;;  %v2301_v24 = vrot.slane %v7573_v23, %v7520_v9  ;;  %v2305_v25 = vrot.slane %v7573_v23, %v7522_v10  ;;  %v2313_v26 = vrot.slane %v7573_v23, %v7526_v12 }
 0x381   :  { %3927 = vmatpush1.bf16.msra.mxu0 %v6803_v27  ;;  %4009 = vmatpush1.bf16.msra.mxu1 %v6806_v28 }
 0x382   :  { %3928 = vmatprep.subr.bf16.mxu0 %v6811_v29  ;;  %4010 = vmatprep.subr.bf16.mxu1 %v6814_v30 }
 0x385   :  { %3929 = vmatpush1.bf16.msra.mxu0 %v6809_v31  ;;  %4011 = vmatpush1.bf16.msra.mxu1 %v6812_v32 }
 0x386   :  { %3930 = vmatprep.subr.bf16.mxu0 %v6817_v33  ;;  %4012 = vmatprep.subr.bf16.mxu1 %v6820_v34 }
 0x389   :  { %3931 = vmatpush1.bf16.msra.mxu0 %v6815_v35  ;;  %4013 = vmatpush1.bf16.msra.mxu1 %v6818_v36 }
 0x38a   :  { %3932 = vmatprep.subr.bf16.mxu0 %v6823_v37  ;;  %4014 = vmatprep.subr.bf16.mxu1 %v6826_v38 }
 0x38d   :  { %3933 = vmatpush1.bf16.msra.mxu0 %v6821_v39  ;;  %4015 = vmatpush1.bf16.msra.mxu1 %v6824_v40 }
 0x38e   :  { %3934 = vmatprep.subr.bf16.mxu0 %v6829_v41  ;;  %4016 = vmatprep.subr.bf16.mxu1 %v6832_v42  ;;  %v6887_v42 = vld [vmem:[#allocation7 + $0xe00] ss:$16 sps:$4 sm:$0xff]  }
 0x391   :  { %3935 = vmatpush1.bf16.msra.mxu0 %v6827_v16  ;;  %4017 = vmatpush1.bf16.msra.mxu1 %v6830_v43  ;;  %v6890_v16 = vld [vmem:[#allocation7 + $0xe08] ss:$16 sps:$4 sm:$0xff]  }
 0x392   :  { %3936 = vmatprep.subr.bf16.mxu0 %v6835_v44  ;;  %4018 = vmatprep.subr.bf16.mxu1 %v6838_v45  ;;  %v6895_v44 = vld [vmem:[#allocation7 + $0xe24] ss:$16 sps:$4 sm:$0xff]   ;;  %v6898_v45 = vld [vmem:[#allocation7 + $0xe2c] ss:$16 sps:$4 sm:$0xff]  }
 0x395   :  { %3937 = vmatpush1.bf16.msra.mxu0 %v6833_v46  ;;  %4019 = vmatpush1.bf16.msra.mxu1 %v6836_v20  ;;  %v6893_v20 = vld [vmem:[#allocation7 + $0xe20] ss:$16 sps:$4 sm:$0xff]  }
 0x396   :  { %3938 = vmatprep.subr.bf16.mxu0 %v6841_v47  ;;  %4020 = vmatprep.subr.bf16.mxu1 %v6844_v49  ;;  %v6896_v47 = vld [vmem:[#allocation7 + $0xe28] ss:$16 sps:$4 sm:$0xff]   ;;  %v6901_v49 = vld [vmem:[#allocation7 + $0xe44] ss:$16 sps:$4 sm:$0xff]  }
 0x399   :  { %3939 = vmatpush1.bf16.msra.mxu0 %v6839_v50  ;;  %4021 = vmatpush1.bf16.msra.mxu1 %v6842_v51  ;;  %v6904_v50 = vld [vmem:[#allocation7 + $0xe4c] ss:$16 sps:$4 sm:$0xff]   ;;  %v6899_v51 = vld [vmem:[#allocation7 + $0xe40] ss:$16 sps:$4 sm:$0xff]  }
 0x39a   :  { %3940 = vmatprep.subr.bf16.mxu0 %v6847_v52  ;;  %4022 = vmatprep.subr.bf16.mxu1 %v6850_v54  ;;  %v6902_v52 = vld [vmem:[#allocation7 + $0xe48] ss:$16 sps:$4 sm:$0xff]   ;;  %v6907_v54 = vld [vmem:[#allocation7 + $0xe64] ss:$16 sps:$4 sm:$0xff]  }
 0x39d   :  { %3941 = vmatpush1.bf16.msra.mxu0 %v6845_v56  ;;  %4023 = vmatpush1.bf16.msra.mxu1 %v6848_v57  ;;  %v6910_v56 = vld [vmem:[#allocation7 + $0xe6c] ss:$16 sps:$4 sm:$0xff]   ;;  %v6905_v57 = vld [vmem:[#allocation7 + $0xe60] ss:$16 sps:$4 sm:$0xff]  }
 0x39e   :  { %3942 = vmatprep.subr.bf16.mxu0 %v6853_v58  ;;  %4024 = vmatprep.subr.bf16.mxu1 %v6856_v59  ;;  %v6908_v58 = vld [vmem:[#allocation7 + $0xe68] ss:$16 sps:$4 sm:$0xff]   ;;  %v6913_v59 = vld [vmem:[#allocation7 + $0xe84] ss:$16 sps:$4 sm:$0xff]  }
 0x3a1   :  { %3943 = vmatpush1.bf16.msra.mxu0 %v6851_v60  ;;  %4025 = vmatpush1.bf16.msra.mxu1 %v6854_v61  ;;  %v6916_v60 = vld [vmem:[#allocation7 + $0xe8c] ss:$16 sps:$4 sm:$0xff]   ;;  %v6911_v61 = vld [vmem:[#allocation7 + $0xe80] ss:$16 sps:$4 sm:$0xff]  }
 0x3a2   :  { %3944 = vmatprep.subr.bf16.mxu0 %v6859_v62  ;;  %4026 = vmatprep.subr.bf16.mxu1 %v6862_v63  ;;  %v6914_v62 = vld [vmem:[#allocation7 + $0xe88] ss:$16 sps:$4 sm:$0xff]   ;;  %v6919_v63 = vld [vmem:[#allocation7 + $0xea4] ss:$16 sps:$4 sm:$0xff]  }
 0x3a5   :  { %3945 = vmatpush1.bf16.msra.mxu0 %v6857_v0  ;;  %4027 = vmatpush1.bf16.msra.mxu1 %v6860_v1  ;;  %v6922_v0 = vld [vmem:[#allocation7 + $0xeac] ss:$16 sps:$4 sm:$0xff]   ;;  %v6917_v1 = vld [vmem:[#allocation7 + $0xea0] ss:$16 sps:$4 sm:$0xff]  }
 0x3a6   :  { %3946 = vmatprep.subr.bf16.mxu0 %v6865_v2  ;;  %4028 = vmatprep.subr.bf16.mxu1 %v6868_v3  ;;  %v6920_v2 = vld [vmem:[#allocation7 + $0xea8] ss:$16 sps:$4 sm:$0xff]   ;;  %v6925_v3 = vld [vmem:[#allocation7 + $0xec4] ss:$16 sps:$4 sm:$0xff]  }
 0x3a9   :  { %3947 = vmatpush1.bf16.msra.mxu0 %v6863_v4  ;;  %4029 = vmatpush1.bf16.msra.mxu1 %v6866_v5  ;;  %v6928_v4 = vld [vmem:[#allocation7 + $0xecc] ss:$16 sps:$4 sm:$0xff]   ;;  %v6923_v5 = vld [vmem:[#allocation7 + $0xec0] ss:$16 sps:$4 sm:$0xff]  }
 0x3aa   :  { %3948 = vmatprep.subr.bf16.mxu0 %v6871_v6  ;;  %4030 = vmatprep.subr.bf16.mxu1 %v6874_v7  ;;  %v6926_v6 = vld [vmem:[#allocation7 + $0xec8] ss:$16 sps:$4 sm:$0xff]   ;;  %v6931_v7 = vld [vmem:[#allocation7 + $0xee4] ss:$16 sps:$4 sm:$0xff]  }
 0x3ad   :  { %3949 = vmatpush1.bf16.msra.mxu0 %v6869_v8  ;;  %4031 = vmatpush1.bf16.msra.mxu1 %v6872_v13  ;;  %v6934_v8 = vld [vmem:[#allocation7 + $0xeec] ss:$16 sps:$4 sm:$0xff]   ;;  %v6929_v13 = vld [vmem:[#allocation7 + $0xee0] ss:$16 sps:$4 sm:$0xff]  }
 0x3ae   :  { %3950 = vmatprep.subr.bf16.mxu0 %v6877_v14  ;;  %4032 = vmatprep.subr.bf16.mxu1 %v6880_v15  ;;  %v6932_v14 = vld [vmem:[#allocation7 + $0xee8] ss:$16 sps:$4 sm:$0xff]   ;;  %v6937_v15 = vld [vmem:[#allocation7 + $0xf04] ss:$16 sps:$4 sm:$0xff]  }
 0x3b1   :  { %3951 = vmatpush1.bf16.msra.mxu0 %v6875_v17  ;;  %4033 = vmatpush1.bf16.msra.mxu1 %v6878_v48  ;;  %v6940_v17 = vld [vmem:[#allocation7 + $0xf0c] ss:$16 sps:$4 sm:$0xff]   ;;  %v6935_v48 = vld [vmem:[#allocation7 + $0xf00] ss:$16 sps:$4 sm:$0xff]  }
 0x3b2   :  { %3952 = vmatprep.subr.bf16.mxu0 %v6883_v18  ;;  %4034 = vmatprep.subr.bf16.mxu1 %v6886_v19  ;;  %v6938_v18 = vld [vmem:[#allocation7 + $0xf08] ss:$16 sps:$4 sm:$0xff]   ;;  %v6943_v19 = vld [vmem:[#allocation7 + $0xf24] ss:$16 sps:$4 sm:$0xff]  }
 0x3b5   :  { %3953 = vmatpush1.bf16.msra.mxu0 %v6881_v55  ;;  %4035 = vmatpush1.bf16.msra.mxu1 %v6884_v21  ;;  %v6946_v55 = vld [vmem:[#allocation7 + $0xf2c] ss:$16 sps:$4 sm:$0xff]   ;;  %v6941_v21 = vld [vmem:[#allocation7 + $0xf20] ss:$16 sps:$4 sm:$0xff]  }
 0x3b6   :  { %3963 = vmatprep.subr.bf16.mxu0 %v6889_v53  ;;  %4045 = vmatprep.subr.bf16.mxu1 %v6892_v22  ;;  %v6944_v53 = vld [vmem:[#allocation7 + $0xf28] ss:$16 sps:$4 sm:$0xff]   ;;  %v6949_v22 = vld [vmem:[#allocation7 + $0xf44] ss:$16 sps:$4 sm:$0xff]  }
 0x44b   :  { %v3033_v27 = vpop.f32.mrb[8].mxu0  ;;  %v7581_v28 = vpop.f32.mrb[8].mxu1 }
 0x44c   :  { %v6145_v29 = vadd.f32 %v3033_v27, %v2301_v24  ;;  %v3035_v30 = vpop.f32.mrb[9].mxu0  ;;  %v3117_v31 = vpop.f32.mrb[9].mxu1  ;;  %v6952_v24 = vld [vmem:[#allocation7 + $0xf4c] ss:$16 sps:$4 sm:$0xff]   ;;  %v6955_v27 = vld [vmem:[#allocation7 + $0xf64] ss:$16 sps:$4 sm:$0xff]  }
 0x44d   :  { %v6146_v32 = vadd.f32 %v3035_v30, %v2305_v25  ;;  %v6148_v33 = vadd.f32 %v3117_v31, %v2313_v26  ;;  %v3037_v34 = vpop.f32.mrb[10].mxu0  ;;  %v3119_v35 = vpop.f32.mrb[10].mxu1  ;;  %v6947_v25 = vld [vmem:[#allocation7 + $0xf40] ss:$16 sps:$4 sm:$0xff]   ;;  %v6950_v26 = vld [vmem:[#allocation7 + $0xf48] ss:$16 sps:$4 sm:$0xff]  }
 0x44e   :  { %v3122_v36 = vmax.f32 %v6145_v29, 0.0  ;;  %v3038_v37 = vpop.f32.mrb[11].mxu0  ;;  %v3120_v38 = vpop.f32.mrb[11].mxu1  ;;  %v6958_v29 = vld [vmem:[#allocation7 + $0xf6c] ss:$16 sps:$4 sm:$0xff]  }
 0x44f   :  { %v3123_v39 = vmax.f32 %v6146_v32, 0.0  ;;  %v3125_v40 = vmax.f32 %v6148_v33, 0.0  ;;  %v6953_v30 = vld [vmem:[#allocation7 + $0xf60] ss:$16 sps:$4 sm:$0xff]   ;;  %v6956_v31 = vld [vmem:[#allocation7 + $0xf68] ss:$16 sps:$4 sm:$0xff]  }
 0x450   :  { %v3126_v43 = vpack.c.bf16 %v3122_v36, %v3122_v36  ;;  %v6961_v32 = vld [vmem:[#allocation7 + $0xf84] ss:$16 sps:$4 sm:$0xff]   ;;  %v6964_v33 = vld [vmem:[#allocation7 + $0xf8c] ss:$16 sps:$4 sm:$0xff]   ;;  %v6959_v34 = vld [vmem:[#allocation7 + $0xf80] ss:$16 sps:$4 sm:$0xff]  }
 0x451   :  { %v3127_v41 = vpack.c.bf16 %v3123_v39, %v3123_v39  ;;  %v3129_v46 = vpack.c.bf16 %v3125_v40, %v3125_v40  ;;  %v6962_v35 = vld [vmem:[#allocation7 + $0xf88] ss:$16 sps:$4 sm:$0xff]   ;;  %v6967_v36 = vld [vmem:[#allocation7 + $0xfa4] ss:$16 sps:$4 sm:$0xff]   ;;  %v6970_v37 = vld [vmem:[#allocation7 + $0xfac] ss:$16 sps:$4 sm:$0xff]   ;;  %v2309_v40 = vrot.slane %v7573_v23, %v7524_v11 }
 0x452   :  { %v6965_v38 = vld [vmem:[#allocation7 + $0xfa0] ss:$16 sps:$4 sm:$0xff]   ;;  %v6968_v39 = vld [vmem:[#allocation7 + $0xfa8] ss:$16 sps:$4 sm:$0xff]   ;;  %v6985_v23 = vld [vmem:[#allocation7 + $0x1004] ss:$16 sps:$4 sm:$0xff]  }
 0x453   :  { %3954 = vmatprep.mubr.bf16.mxu0 %v3127_v41  ;;  %4036 = vmatprep.mubr.bf16.mxu1 %v3127_v41  ;;  %v6973_v41 = vld [vmem:[#allocation7 + $0xfc4] ss:$16 sps:$4 sm:$0xff]  }
 0x454   :  { %3955 = vmatmul.mubr.bf16.vlgmr.msra.gmra.mrb[12].mxu0 %v3126_v43  ;;  %4037 = vmatmul.mubr.bf16.vlgmr.msra.gmra.mrb[12].mxu1 %v3126_v43  ;;  %v6974_v43 = vld [vmem:[#allocation7 + $0xfc8] ss:$16 sps:$4 sm:$0xff]  }
 0x455   :  { %3964 = vmatpush1.bf16.msra.mxu0 %v6887_v42  ;;  %4046 = vmatpush1.bf16.msra.mxu1 %v6890_v16  ;;  %v6976_v42 = vld [vmem:[#allocation7 + $0xfcc] ss:$16 sps:$4 sm:$0xff]   ;;  %v6971_v16 = vld [vmem:[#allocation7 + $0xfc0] ss:$16 sps:$4 sm:$0xff]  }
 0x456   :  { %3995 = vmatprep.mubr.bf16.mxu0 %v3129_v46  ;;  %4077 = vmatprep.mubr.bf16.mxu1 %v3129_v46  ;;  %v6982_v46 = vld [vmem:[#allocation7 + $0xfec] ss:$16 sps:$4 sm:$0xff]  }
 0x457   :  { %3965 = vmatprep.subr.bf16.mxu0 %v6895_v44  ;;  %4047 = vmatprep.subr.bf16.mxu1 %v6898_v45  ;;  %v6147_v44 = vadd.f32 %v7581_v28, %v2309_v40  ;;  %v6979_v45 = vld [vmem:[#allocation7 + $0xfe4] ss:$16 sps:$4 sm:$0xff]  }
 0x458   :  { %v6991_v28 = vld [vmem:[#allocation7 + $0x1024] ss:$16 sps:$4 sm:$0xff]  }
 0x459   :  { %3966 = vmatpush1.bf16.msra.mxu0 %v6893_v20  ;;  %4048 = vmatpush1.bf16.msra.mxu1 %v6896_v47  ;;  %v6977_v20 = vld [vmem:[#allocation7 + $0xfe0] ss:$16 sps:$4 sm:$0xff]   ;;  %v6980_v47 = vld [vmem:[#allocation7 + $0xfe8] ss:$16 sps:$4 sm:$0xff]   ;;  %v7057_v40 = vld [vmem:[#allocation7 + $0x1184] ss:$16 sps:$4 sm:$0xff]  }
 0x45a   :  { %3967 = vmatprep.subr.bf16.mxu0 %v6901_v49  ;;  %4049 = vmatprep.subr.bf16.mxu1 %v6904_v50  ;;  %v3124_v49 = vmax.f32 %v6147_v44, 0.0  ;;  %v6988_v50 = vld [vmem:[#allocation7 + $0x100c] ss:$16 sps:$4 sm:$0xff]  }
 0x45b   :  { %v7066_v44 = vld [vmem:[#allocation7 + $0x11ac] ss:$16 sps:$4 sm:$0xff]  }
 0x45d   :  { %3968 = vmatpush1.bf16.msra.mxu0 %v6899_v51  ;;  %4050 = vmatpush1.bf16.msra.mxu1 %v6902_v52  ;;  %v6983_v51 = vld [vmem:[#allocation7 + $0x1000] ss:$16 sps:$4 sm:$0xff]   ;;  %v6986_v52 = vld [vmem:[#allocation7 + $0x1008] ss:$16 sps:$4 sm:$0xff]  }
 0x45e   :  { %3969 = vmatprep.subr.bf16.mxu0 %v6907_v54  ;;  %4051 = vmatprep.subr.bf16.mxu1 %v6910_v56  ;;  %v3128_v54 = vpack.c.bf16 %v3124_v49, %v3124_v49  ;;  %v6994_v56 = vld [vmem:[#allocation7 + $0x102c] ss:$16 sps:$4 sm:$0xff]   ;;  %v7067_v49 = vld [vmem:[#allocation7 + $0x11c0] ss:$16 sps:$4 sm:$0xff]  }
 0x461   :  { %3970 = vmatpush1.bf16.msra.mxu0 %v6905_v57  ;;  %4052 = vmatpush1.bf16.msra.mxu1 %v6908_v58  ;;  %v6989_v57 = vld [vmem:[#allocation7 + $0x1020] ss:$16 sps:$4 sm:$0xff]   ;;  %v6992_v58 = vld [vmem:[#allocation7 + $0x1028] ss:$16 sps:$4 sm:$0xff]  }
 0x462   :  { %3971 = vmatprep.subr.bf16.mxu0 %v6913_v59  ;;  %4053 = vmatprep.subr.bf16.mxu1 %v6916_v60  ;;  %v6997_v59 = vld [vmem:[#allocation7 + $0x1044] ss:$16 sps:$4 sm:$0xff]   ;;  %v7000_v60 = vld [vmem:[#allocation7 + $0x104c] ss:$16 sps:$4 sm:$0xff]  }
 0x465   :  { %3972 = vmatpush1.bf16.msra.mxu0 %v6911_v61  ;;  %4054 = vmatpush1.bf16.msra.mxu1 %v6914_v62  ;;  %v6995_v61 = vld [vmem:[#allocation7 + $0x1040] ss:$16 sps:$4 sm:$0xff]   ;;  %v6998_v62 = vld [vmem:[#allocation7 + $0x1048] ss:$16 sps:$4 sm:$0xff]  }
 0x466   :  { %3973 = vmatprep.subr.bf16.mxu0 %v6919_v63  ;;  %4055 = vmatprep.subr.bf16.mxu1 %v6922_v0  ;;  %v7003_v63 = vld [vmem:[#allocation7 + $0x1064] ss:$16 sps:$4 sm:$0xff]   ;;  %v7006_v0 = vld [vmem:[#allocation7 + $0x106c] ss:$16 sps:$4 sm:$0xff]  }
 0x469   :  { %3974 = vmatpush1.bf16.msra.mxu0 %v6917_v1  ;;  %4056 = vmatpush1.bf16.msra.mxu1 %v6920_v2  ;;  %v7001_v1 = vld [vmem:[#allocation7 + $0x1060] ss:$16 sps:$4 sm:$0xff]   ;;  %v7004_v2 = vld [vmem:[#allocation7 + $0x1068] ss:$16 sps:$4 sm:$0xff]  }
 0x46a   :  { %3975 = vmatprep.subr.bf16.mxu0 %v6925_v3  ;;  %4057 = vmatprep.subr.bf16.mxu1 %v6928_v4  ;;  %v7009_v3 = vld [vmem:[#allocation7 + $0x1084] ss:$16 sps:$4 sm:$0xff]   ;;  %v7012_v4 = vld [vmem:[#allocation7 + $0x108c] ss:$16 sps:$4 sm:$0xff]  }
 0x46d   :  { %3976 = vmatpush1.bf16.msra.mxu0 %v6923_v5  ;;  %4058 = vmatpush1.bf16.msra.mxu1 %v6926_v6  ;;  %v7007_v5 = vld [vmem:[#allocation7 + $0x1080] ss:$16 sps:$4 sm:$0xff]   ;;  %v7010_v6 = vld [vmem:[#allocation7 + $0x1088] ss:$16 sps:$4 sm:$0xff]  }
 0x46e   :  { %3977 = vmatprep.subr.bf16.mxu0 %v6931_v7  ;;  %4059 = vmatprep.subr.bf16.mxu1 %v6934_v8  ;;  %v7015_v7 = vld [vmem:[#allocation7 + $0x10a4] ss:$16 sps:$4 sm:$0xff]   ;;  %v7018_v8 = vld [vmem:[#allocation7 + $0x10ac] ss:$16 sps:$4 sm:$0xff]  }
 0x471   :  { %3978 = vmatpush1.bf16.msra.mxu0 %v6929_v13  ;;  %4060 = vmatpush1.bf16.msra.mxu1 %v6932_v14  ;;  %v7013_v13 = vld [vmem:[#allocation7 + $0x10a0] ss:$16 sps:$4 sm:$0xff]   ;;  %v7016_v14 = vld [vmem:[#allocation7 + $0x10a8] ss:$16 sps:$4 sm:$0xff]  }
 0x472   :  { %3979 = vmatprep.subr.bf16.mxu0 %v6937_v15  ;;  %4061 = vmatprep.subr.bf16.mxu1 %v6940_v17  ;;  %v7021_v15 = vld [vmem:[#allocation7 + $0x10c4] ss:$16 sps:$4 sm:$0xff]   ;;  %v7024_v17 = vld [vmem:[#allocation7 + $0x10cc] ss:$16 sps:$4 sm:$0xff]  }
 0x475   :  { %3980 = vmatpush1.bf16.msra.mxu0 %v6935_v48  ;;  %4062 = vmatpush1.bf16.msra.mxu1 %v6938_v18  ;;  %v7019_v48 = vld [vmem:[#allocation7 + $0x10c0] ss:$16 sps:$4 sm:$0xff]   ;;  %v7022_v18 = vld [vmem:[#allocation7 + $0x10c8] ss:$16 sps:$4 sm:$0xff]  }
 0x476   :  { %3981 = vmatprep.subr.bf16.mxu0 %v6943_v19  ;;  %4063 = vmatprep.subr.bf16.mxu1 %v6946_v55  ;;  %v7027_v19 = vld [vmem:[#allocation7 + $0x10e4] ss:$16 sps:$4 sm:$0xff]   ;;  %v7030_v55 = vld [vmem:[#allocation7 + $0x10ec] ss:$16 sps:$4 sm:$0xff]  }
 0x479   :  { %3982 = vmatpush1.bf16.msra.mxu0 %v6941_v21  ;;  %4064 = vmatpush1.bf16.msra.mxu1 %v6944_v53  ;;  %v7025_v21 = vld [vmem:[#allocation7 + $0x10e0] ss:$16 sps:$4 sm:$0xff]   ;;  %v7028_v53 = vld [vmem:[#allocation7 + $0x10e8] ss:$16 sps:$4 sm:$0xff]  }
 0x47a   :  { %3983 = vmatprep.subr.bf16.mxu0 %v6949_v22  ;;  %4065 = vmatprep.subr.bf16.mxu1 %v6952_v24  ;;  %v7033_v22 = vld [vmem:[#allocation7 + $0x1104] ss:$16 sps:$4 sm:$0xff]   ;;  %v7036_v24 = vld [vmem:[#allocation7 + $0x110c] ss:$16 sps:$4 sm:$0xff]  }
 0x47d   :  { %3984 = vmatpush1.bf16.msra.mxu0 %v6947_v25  ;;  %4066 = vmatpush1.bf16.msra.mxu1 %v6950_v26  ;;  %v7031_v25 = vld [vmem:[#allocation7 + $0x1100] ss:$16 sps:$4 sm:$0xff]   ;;  %v7034_v26 = vld [vmem:[#allocation7 + $0x1108] ss:$16 sps:$4 sm:$0xff]  }
 0x47e   :  { %3985 = vmatprep.subr.bf16.mxu0 %v6955_v27  ;;  %4067 = vmatprep.subr.bf16.mxu1 %v6958_v29  ;;  %v7039_v27 = vld [vmem:[#allocation7 + $0x1124] ss:$16 sps:$4 sm:$0xff]   ;;  %v7042_v29 = vld [vmem:[#allocation7 + $0x112c] ss:$16 sps:$4 sm:$0xff]  }
 0x481   :  { %3986 = vmatpush1.bf16.msra.mxu0 %v6953_v30  ;;  %4068 = vmatpush1.bf16.msra.mxu1 %v6956_v31  ;;  %v7037_v30 = vld [vmem:[#allocation7 + $0x1120] ss:$16 sps:$4 sm:$0xff]   ;;  %v7040_v31 = vld [vmem:[#allocation7 + $0x1128] ss:$16 sps:$4 sm:$0xff]  }
 0x482   :  { %3987 = vmatprep.subr.bf16.mxu0 %v6961_v32  ;;  %4069 = vmatprep.subr.bf16.mxu1 %v6964_v33  ;;  %v7045_v32 = vld [vmem:[#allocation7 + $0x1144] ss:$16 sps:$4 sm:$0xff]   ;;  %v7048_v33 = vld [vmem:[#allocation7 + $0x114c] ss:$16 sps:$4 sm:$0xff]  }
 0x485   :  { %3988 = vmatpush1.bf16.msra.mxu0 %v6959_v34  ;;  %4070 = vmatpush1.bf16.msra.mxu1 %v6962_v35  ;;  %v7043_v34 = vld [vmem:[#allocation7 + $0x1140] ss:$16 sps:$4 sm:$0xff]   ;;  %v7046_v35 = vld [vmem:[#allocation7 + $0x1148] ss:$16 sps:$4 sm:$0xff]  }
 0x486   :  { %3989 = vmatprep.subr.bf16.mxu0 %v6967_v36  ;;  %4071 = vmatprep.subr.bf16.mxu1 %v6970_v37  ;;  %v7051_v36 = vld [vmem:[#allocation7 + $0x1164] ss:$16 sps:$4 sm:$0xff]   ;;  %v7054_v37 = vld [vmem:[#allocation7 + $0x116c] ss:$16 sps:$4 sm:$0xff]  }
 0x489   :  { %3990 = vmatpush1.bf16.msra.mxu0 %v6965_v38  ;;  %4072 = vmatpush1.bf16.msra.mxu1 %v6968_v39  ;;  %v7049_v38 = vld [vmem:[#allocation7 + $0x1160] ss:$16 sps:$4 sm:$0xff]   ;;  %v7052_v39 = vld [vmem:[#allocation7 + $0x1168] ss:$16 sps:$4 sm:$0xff]  }
 0x48a   :  { %3991 = vmatprep.subr.bf16.mxu0 %v6973_v41  ;;  %4073 = vmatprep.subr.bf16.mxu1 %v6976_v42  ;;  %v7060_v41 = vld [vmem:[#allocation7 + $0x118c] ss:$16 sps:$4 sm:$0xff]   ;;  %v7055_v42 = vld [vmem:[#allocation7 + $0x1180] ss:$16 sps:$4 sm:$0xff]  }
 0x48d   :  { %3992 = vmatpush1.bf16.msra.mxu0 %v6971_v16  ;;  %4074 = vmatpush1.bf16.msra.mxu1 %v6974_v43  ;;  %v7058_v16 = vld [vmem:[#allocation7 + $0x1188] ss:$16 sps:$4 sm:$0xff]   ;;  %v7063_v43 = vld [vmem:[#allocation7 + $0x11a4] ss:$16 sps:$4 sm:$0xff]  }
 0x48e   :  { %3993 = vmatprep.subr.bf16.mxu0 %v6979_v45  ;;  %4075 = vmatprep.subr.bf16.mxu1 %v6982_v46  ;;  %v7061_v45 = vld [vmem:[#allocation7 + $0x11a0] ss:$16 sps:$4 sm:$0xff]   ;;  %v7064_v46 = vld [vmem:[#allocation7 + $0x11a8] ss:$16 sps:$4 sm:$0xff]  }
 0x491   :  { %3994 = vmatpush1.bf16.msra.mxu0 %v6977_v20  ;;  %4076 = vmatpush1.bf16.msra.mxu1 %v6980_v47  ;;  %v7069_v20 = vld [vmem:[#allocation7 + $0x11c4] ss:$16 sps:$4 sm:$0xff]   ;;  %v7072_v47 = vld [vmem:[#allocation7 + $0x11cc] ss:$16 sps:$4 sm:$0xff]  }
 0x492   :  { %4886 = vmatprep.subr.bf16.mxu0 %v6985_v23  ;;  %4968 = vmatprep.subr.bf16.mxu1 %v6988_v50  ;;  %v7070_v23 = vld [vmem:[#allocation7 + $0x11c8] ss:$16 sps:$4 sm:$0xff]   ;;  %v7075_v50 = vld [vmem:[#allocation7 + $0x11e4] ss:$16 sps:$4 sm:$0xff]  }
 0x494   :  { %3996 = vmatmul.mubr.bf16.vlgmr.msra.gmra.mrb[12].mxu0 %v3128_v54  ;;  %4078 = vmatmul.mubr.bf16.vlgmr.msra.gmra.mrb[12].mxu1 %v3128_v54  ;;  %v7076_v54 = vld [vmem:[#allocation7 + $0x11e8] ss:$16 sps:$4 sm:$0xff]  }
 0x495   :  { %4887 = vmatpush1.bf16.msra.mxu0 %v6983_v51  ;;  %4969 = vmatpush1.bf16.msra.mxu1 %v6986_v52  ;;  %v7078_v51 = vld [vmem:[#allocation7 + $0x11ec] ss:$16 sps:$4 sm:$0xff]   ;;  %v7073_v52 = vld [vmem:[#allocation7 + $0x11e0] ss:$16 sps:$4 sm:$0xff]  }
 0x496   :  { %4888 = vmatprep.subr.bf16.mxu0 %v6991_v28  ;;  %4970 = vmatprep.subr.bf16.mxu1 %v6994_v56  ;;  %v7081_v28 = vld [vmem:[#allocation7 + $0x1204] ss:$16 sps:$4 sm:$0xff]   ;;  %v7084_v56 = vld [vmem:[#allocation7 + $0x120c] ss:$16 sps:$4 sm:$0xff]  }
 0x499   :  { %4889 = vmatpush1.bf16.msra.mxu0 %v6989_v57  ;;  %4971 = vmatpush1.bf16.msra.mxu1 %v6992_v58  ;;  %v7586_v57 = vld [vmem:[#allocation8 + $0xc] sm:$0xf] }
 0x49a   :  { %4890 = vmatprep.subr.bf16.mxu0 %v6997_v59  ;;  %4972 = vmatprep.subr.bf16.mxu1 %v7000_v60  ;;  %v3265_v58 = vrot.slane %v7586_v57, %v7520_v9  ;;  %v3269_v59 = vrot.slane %v7586_v57, %v7522_v10  ;;  %v3277_v60 = vrot.slane %v7586_v57, %v7526_v12 }
 0x49d   :  { %4891 = vmatpush1.bf16.msra.mxu0 %v6995_v61  ;;  %4973 = vmatpush1.bf16.msra.mxu1 %v6998_v62 }
 0x49e   :  { %4892 = vmatprep.subr.bf16.mxu0 %v7003_v63  ;;  %4974 = vmatprep.subr.bf16.mxu1 %v7006_v0 }
 0x4a1   :  { %4893 = vmatpush1.bf16.msra.mxu0 %v7001_v1  ;;  %4975 = vmatpush1.bf16.msra.mxu1 %v7004_v2 }
 0x4a2   :  { %4894 = vmatprep.subr.bf16.mxu0 %v7009_v3  ;;  %4976 = vmatprep.subr.bf16.mxu1 %v7012_v4 }
 0x4a5   :  { %4895 = vmatpush1.bf16.msra.mxu0 %v7007_v5  ;;  %4977 = vmatpush1.bf16.msra.mxu1 %v7010_v6 }
 0x4a6   :  { %4896 = vmatprep.subr.bf16.mxu0 %v7015_v7  ;;  %4978 = vmatprep.subr.bf16.mxu1 %v7018_v8 }
 0x4a9   :  { %4897 = vmatpush1.bf16.msra.mxu0 %v7013_v13  ;;  %4979 = vmatpush1.bf16.msra.mxu1 %v7016_v14 }
 0x4aa   :  { %4898 = vmatprep.subr.bf16.mxu0 %v7021_v15  ;;  %4980 = vmatprep.subr.bf16.mxu1 %v7024_v17  ;;  %v7079_v17 = vld [vmem:[#allocation7 + $0x1200] ss:$16 sps:$4 sm:$0xff]  }
 0x4ad   :  { %4899 = vmatpush1.bf16.msra.mxu0 %v7019_v48  ;;  %4981 = vmatpush1.bf16.msra.mxu1 %v7022_v18  ;;  %v7082_v48 = vld [vmem:[#allocation7 + $0x1208] ss:$16 sps:$4 sm:$0xff]  }
 0x4ae   :  { %4900 = vmatprep.subr.bf16.mxu0 %v7027_v19  ;;  %4982 = vmatprep.subr.bf16.mxu1 %v7030_v55  ;;  %v7087_v19 = vld [vmem:[#allocation7 + $0x1224] ss:$16 sps:$4 sm:$0xff]   ;;  %v7090_v55 = vld [vmem:[#allocation7 + $0x122c] ss:$16 sps:$4 sm:$0xff]  }
 0x4b1   :  { %4901 = vmatpush1.bf16.msra.mxu0 %v7025_v21  ;;  %4983 = vmatpush1.bf16.msra.mxu1 %v7028_v53  ;;  %v7085_v53 = vld [vmem:[#allocation7 + $0x1220] ss:$16 sps:$4 sm:$0xff]  }
 0x4b2   :  { %4902 = vmatprep.subr.bf16.mxu0 %v7033_v22  ;;  %4984 = vmatprep.subr.bf16.mxu1 %v7036_v24  ;;  %v7088_v22 = vld [vmem:[#allocation7 + $0x1228] ss:$16 sps:$4 sm:$0xff]   ;;  %v7093_v24 = vld [vmem:[#allocation7 + $0x1244] ss:$16 sps:$4 sm:$0xff]  }
 0x4b5   :  { %4903 = vmatpush1.bf16.msra.mxu0 %v7031_v25  ;;  %4985 = vmatpush1.bf16.msra.mxu1 %v7034_v26  ;;  %v7096_v25 = vld [vmem:[#allocation7 + $0x124c] ss:$16 sps:$4 sm:$0xff]   ;;  %v7091_v26 = vld [vmem:[#allocation7 + $0x1240] ss:$16 sps:$4 sm:$0xff]  }
 0x4b6   :  { %4904 = vmatprep.subr.bf16.mxu0 %v7039_v27  ;;  %4986 = vmatprep.subr.bf16.mxu1 %v7042_v29  ;;  %v7094_v27 = vld [vmem:[#allocation7 + $0x1248] ss:$16 sps:$4 sm:$0xff]   ;;  %v7099_v29 = vld [vmem:[#allocation7 + $0x1264] ss:$16 sps:$4 sm:$0xff]  }
 0x4b9   :  { %4905 = vmatpush1.bf16.msra.mxu0 %v7037_v30  ;;  %4987 = vmatpush1.bf16.msra.mxu1 %v7040_v31  ;;  %v7102_v30 = vld [vmem:[#allocation7 + $0x126c] ss:$16 sps:$4 sm:$0xff]   ;;  %v7097_v31 = vld [vmem:[#allocation7 + $0x1260] ss:$16 sps:$4 sm:$0xff]  }
 0x4ba   :  { %4906 = vmatprep.subr.bf16.mxu0 %v7045_v32  ;;  %4988 = vmatprep.subr.bf16.mxu1 %v7048_v33  ;;  %v7100_v32 = vld [vmem:[#allocation7 + $0x1268] ss:$16 sps:$4 sm:$0xff]   ;;  %v7105_v33 = vld [vmem:[#allocation7 + $0x1284] ss:$16 sps:$4 sm:$0xff]  }
 0x4bd   :  { %4907 = vmatpush1.bf16.msra.mxu0 %v7043_v34  ;;  %4989 = vmatpush1.bf16.msra.mxu1 %v7046_v35  ;;  %v7108_v34 = vld [vmem:[#allocation7 + $0x128c] ss:$16 sps:$4 sm:$0xff]   ;;  %v7103_v35 = vld [vmem:[#allocation7 + $0x1280] ss:$16 sps:$4 sm:$0xff]  }
 0x4be   :  { %4908 = vmatprep.subr.bf16.mxu0 %v7051_v36  ;;  %4990 = vmatprep.subr.bf16.mxu1 %v7054_v37  ;;  %v7106_v36 = vld [vmem:[#allocation7 + $0x1288] ss:$16 sps:$4 sm:$0xff]   ;;  %v7111_v37 = vld [vmem:[#allocation7 + $0x12a4] ss:$16 sps:$4 sm:$0xff]  }
 0x4c1   :  { %4909 = vmatpush1.bf16.msra.mxu0 %v7049_v38  ;;  %4991 = vmatpush1.bf16.msra.mxu1 %v7052_v39  ;;  %v7114_v38 = vld [vmem:[#allocation7 + $0x12ac] ss:$16 sps:$4 sm:$0xff]   ;;  %v7109_v39 = vld [vmem:[#allocation7 + $0x12a0] ss:$16 sps:$4 sm:$0xff]  }
 0x4c2   :  { %4910 = vmatprep.subr.bf16.mxu0 %v7057_v40  ;;  %4992 = vmatprep.subr.bf16.mxu1 %v7060_v41  ;;  %v7112_v40 = vld [vmem:[#allocation7 + $0x12a8] ss:$16 sps:$4 sm:$0xff]   ;;  %v7117_v41 = vld [vmem:[#allocation7 + $0x12c4] ss:$16 sps:$4 sm:$0xff]  }
 0x4c5   :  { %4911 = vmatpush1.bf16.msra.mxu0 %v7055_v42  ;;  %4993 = vmatpush1.bf16.msra.mxu1 %v7058_v16  ;;  %v7120_v42 = vld [vmem:[#allocation7 + $0x12cc] ss:$16 sps:$4 sm:$0xff]   ;;  %v7115_v16 = vld [vmem:[#allocation7 + $0x12c0] ss:$16 sps:$4 sm:$0xff]  }
 0x4c6   :  { %4912 = vmatprep.subr.bf16.mxu0 %v7063_v43  ;;  %4994 = vmatprep.subr.bf16.mxu1 %v7066_v44  ;;  %v7118_v43 = vld [vmem:[#allocation7 + $0x12c8] ss:$16 sps:$4 sm:$0xff]   ;;  %v7123_v44 = vld [vmem:[#allocation7 + $0x12e4] ss:$16 sps:$4 sm:$0xff]  }
 0x4c9   :  { %4913 = vmatpush1.bf16.msra.mxu0 %v7061_v45  ;;  %4995 = vmatpush1.bf16.msra.mxu1 %v7064_v46  ;;  %v7126_v45 = vld [vmem:[#allocation7 + $0x12ec] ss:$16 sps:$4 sm:$0xff]   ;;  %v7121_v46 = vld [vmem:[#allocation7 + $0x12e0] ss:$16 sps:$4 sm:$0xff]  }
 0x4ca   :  { %4914 = vmatprep.subr.bf16.mxu0 %v7069_v20  ;;  %4996 = vmatprep.subr.bf16.mxu1 %v7072_v47  ;;  %v7124_v20 = vld [vmem:[#allocation7 + $0x12e8] ss:$16 sps:$4 sm:$0xff]   ;;  %v7129_v47 = vld [vmem:[#allocation7 + $0x1304] ss:$16 sps:$4 sm:$0xff]  }
 0x4cd   :  { %4915 = vmatpush1.bf16.msra.mxu0 %v7067_v49  ;;  %4997 = vmatpush1.bf16.msra.mxu1 %v7070_v23  ;;  %v7132_v49 = vld [vmem:[#allocation7 + $0x130c] ss:$16 sps:$4 sm:$0xff]   ;;  %v7127_v23 = vld [vmem:[#allocation7 + $0x1300] ss:$16 sps:$4 sm:$0xff]  }
 0x4ce   :  { %4916 = vmatprep.subr.bf16.mxu0 %v7075_v50  ;;  %4998 = vmatprep.subr.bf16.mxu1 %v7078_v51  ;;  %v7130_v50 = vld [vmem:[#allocation7 + $0x1308] ss:$16 sps:$4 sm:$0xff]   ;;  %v7135_v51 = vld [vmem:[#allocation7 + $0x1324] ss:$16 sps:$4 sm:$0xff]  }
 0x4d1   :  { %4917 = vmatpush1.bf16.msra.mxu0 %v7073_v52  ;;  %4999 = vmatpush1.bf16.msra.mxu1 %v7076_v54  ;;  %v7138_v52 = vld [vmem:[#allocation7 + $0x132c] ss:$16 sps:$4 sm:$0xff]   ;;  %v7133_v54 = vld [vmem:[#allocation7 + $0x1320] ss:$16 sps:$4 sm:$0xff]  }
 0x4d2   :  { %4927 = vmatprep.subr.bf16.mxu0 %v7081_v28  ;;  %5009 = vmatprep.subr.bf16.mxu1 %v7084_v56  ;;  %v7136_v28 = vld [vmem:[#allocation7 + $0x1328] ss:$16 sps:$4 sm:$0xff]   ;;  %v7141_v56 = vld [vmem:[#allocation7 + $0x1344] ss:$16 sps:$4 sm:$0xff]  }
 0x567   :  { %v3997_v61 = vpop.f32.mrb[12].mxu0  ;;  %v7594_v62 = vpop.f32.mrb[12].mxu1 }
 0x568   :  { %v6149_v63 = vadd.f32 %v3997_v61, %v3265_v58  ;;  %v3999_v0 = vpop.f32.mrb[13].mxu0  ;;  %v4081_v1 = vpop.f32.mrb[13].mxu1  ;;  %v7144_v58 = vld [vmem:[#allocation7 + $0x134c] ss:$16 sps:$4 sm:$0xff]   ;;  %v7147_v61 = vld [vmem:[#allocation7 + $0x1364] ss:$16 sps:$4 sm:$0xff]  }
 0x569   :  { %v6150_v2 = vadd.f32 %v3999_v0, %v3269_v59  ;;  %v6152_v3 = vadd.f32 %v4081_v1, %v3277_v60  ;;  %v4001_v4 = vpop.f32.mrb[14].mxu0  ;;  %v4083_v5 = vpop.f32.mrb[14].mxu1  ;;  %v7139_v59 = vld [vmem:[#allocation7 + $0x1340] ss:$16 sps:$4 sm:$0xff]   ;;  %v7142_v60 = vld [vmem:[#allocation7 + $0x1348] ss:$16 sps:$4 sm:$0xff]  }
 0x56a   :  { %v4086_v6 = vmax.f32 %v6149_v63, 0.0  ;;  %v4002_v7 = vpop.f32.mrb[15].mxu0  ;;  %v4084_v8 = vpop.f32.mrb[15].mxu1  ;;  %v7150_v63 = vld [vmem:[#allocation7 + $0x136c] ss:$16 sps:$4 sm:$0xff]  }
 0x56b   :  { %v4087_v13 = vmax.f32 %v6150_v2, 0.0  ;;  %v4089_v14 = vmax.f32 %v6152_v3, 0.0  ;;  %v7145_v0 = vld [vmem:[#allocation7 + $0x1360] ss:$16 sps:$4 sm:$0xff]   ;;  %v7148_v1 = vld [vmem:[#allocation7 + $0x1368] ss:$16 sps:$4 sm:$0xff]  }
 0x56c   :  { %v4090_v18 = vpack.c.bf16 %v4086_v6, %v4086_v6  ;;  %v7153_v2 = vld [vmem:[#allocation7 + $0x1384] ss:$16 sps:$4 sm:$0xff]   ;;  %v7156_v3 = vld [vmem:[#allocation7 + $0x138c] ss:$16 sps:$4 sm:$0xff]   ;;  %v7151_v4 = vld [vmem:[#allocation7 + $0x1380] ss:$16 sps:$4 sm:$0xff]  }
 0x56d   :  { %v4091_v15 = vpack.c.bf16 %v4087_v13, %v4087_v13  ;;  %v4093_v21 = vpack.c.bf16 %v4089_v14, %v4089_v14  ;;  %v7154_v5 = vld [vmem:[#allocation7 + $0x1388] ss:$16 sps:$4 sm:$0xff]   ;;  %v7159_v6 = vld [vmem:[#allocation7 + $0x13a4] ss:$16 sps:$4 sm:$0xff]   ;;  %v7162_v7 = vld [vmem:[#allocation7 + $0x13ac] ss:$16 sps:$4 sm:$0xff]   ;;  %v3273_v14 = vrot.slane %v7586_v57, %v7524_v11 }
 0x56e   :  { %v7157_v8 = vld [vmem:[#allocation7 + $0x13a0] ss:$16 sps:$4 sm:$0xff]   ;;  %v7160_v13 = vld [vmem:[#allocation7 + $0x13a8] ss:$16 sps:$4 sm:$0xff]  }
 0x56f   :  { %4918 = vmatprep.mubr.bf16.mxu0 %v4091_v15  ;;  %5000 = vmatprep.mubr.bf16.mxu1 %v4091_v15  ;;  %v7165_v15 = vld [vmem:[#allocation7 + $0x13c4] ss:$16 sps:$4 sm:$0xff]  }
 0x570   :  { %4919 = vmatmul.mubr.bf16.vlgmr.msra.gmra.mrb[16].mxu0 %v4090_v18  ;;  %5001 = vmatmul.mubr.bf16.vlgmr.msra.gmra.mrb[16].mxu1 %v4090_v18  ;;  %v7166_v18 = vld [vmem:[#allocation7 + $0x13c8] ss:$16 sps:$4 sm:$0xff]  }
 0x571   :  { %4928 = vmatpush1.bf16.msra.mxu0 %v7079_v17  ;;  %5010 = vmatpush1.bf16.msra.mxu1 %v7082_v48  ;;  %v7168_v17 = vld [vmem:[#allocation7 + $0x13cc] ss:$16 sps:$4 sm:$0xff]   ;;  %v7163_v48 = vld [vmem:[#allocation7 + $0x13c0] ss:$16 sps:$4 sm:$0xff]   ;;  %v7175_v57 = vld [vmem:[#allocation10 + $0x40] sm:$0xff]  }
 0x572   :  { %4959 = vmatprep.mubr.bf16.mxu0 %v4093_v21  ;;  %5041 = vmatprep.mubr.bf16.mxu1 %v4093_v21  ;;  %v7174_v21 = vld [vmem:[#allocation7 + $0x13ec] ss:$16 sps:$4 sm:$0xff]  }
 0x573   :  { %4929 = vmatprep.subr.bf16.mxu0 %v7087_v19  ;;  %5011 = vmatprep.subr.bf16.mxu1 %v7090_v55  ;;  %v6151_v19 = vadd.f32 %v7594_v62, %v3273_v14  ;;  %v7171_v55 = vld [vmem:[#allocation7 + $0x13e4] ss:$16 sps:$4 sm:$0xff]   ;;  %v7179_v62 = vld [vmem:[#allocation10 + $0x48] sm:$0xff]  }
 0x575   :  { %4930 = vmatpush1.bf16.msra.mxu0 %v7085_v53  ;;  %5012 = vmatpush1.bf16.msra.mxu1 %v7088_v22  ;;  %v7169_v53 = vld [vmem:[#allocation7 + $0x13e0] ss:$16 sps:$4 sm:$0xff]   ;;  %v7172_v22 = vld [vmem:[#allocation7 + $0x13e8] ss:$16 sps:$4 sm:$0xff]  }
 0x576   :  { %4931 = vmatprep.subr.bf16.mxu0 %v7093_v24  ;;  %5013 = vmatprep.subr.bf16.mxu1 %v7096_v25  ;;  %v4088_v24 = vmax.f32 %v6151_v19, 0.0  ;;  %v7176_v25 = vld [vmem:[#allocation10 + $0xc0] sm:$0xff]  }
 0x579   :  { %4932 = vmatpush1.bf16.msra.mxu0 %v7091_v26  ;;  %5014 = vmatpush1.bf16.msra.mxu1 %v7094_v27  ;;  %v7177_v26 = vld [vmem:[#allocation10] sm:$0xff]  }
 0x57a   :  { %4933 = vmatprep.subr.bf16.mxu0 %v7099_v29  ;;  %5015 = vmatprep.subr.bf16.mxu1 %v7102_v30  ;;  %v7178_v27 = vld [vmem:[#allocation10 + $0x80] sm:$0xff]   ;;  %v4092_v29 = vpack.c.bf16 %v4088_v24, %v4088_v24  ;;  %v7180_v30 = vld [vmem:[#allocation10 + $0xc8] sm:$0xff]  }
 0x57d   :  { %4934 = vmatpush1.bf16.msra.mxu0 %v7097_v31  ;;  %5016 = vmatpush1.bf16.msra.mxu1 %v7100_v32  ;;  %v7181_v31 = vld [vmem:[#allocation10 + $0x8] sm:$0xff]  }
 0x57e   :  { %4935 = vmatprep.subr.bf16.mxu0 %v7105_v33  ;;  %5017 = vmatprep.subr.bf16.mxu1 %v7108_v34  ;;  %v7182_v32 = vld [vmem:[#allocation10 + $0x88] sm:$0xff]   ;;  %v7183_v33 = vld [vmem:[#allocation10 + $0x50] sm:$0xff]  }
 0x57f   :  { %v7184_v34 = vld [vmem:[#allocation10 + $0xd0] sm:$0xff]  }
 0x581   :  { %4936 = vmatpush1.bf16.msra.mxu0 %v7103_v35  ;;  %5018 = vmatpush1.bf16.msra.mxu1 %v7106_v36  ;;  %v7185_v35 = vld [vmem:[#allocation10 + $0x10] sm:$0xff]  }
 0x582   :  { %4937 = vmatprep.subr.bf16.mxu0 %v7111_v37  ;;  %5019 = vmatprep.subr.bf16.mxu1 %v7114_v38  ;;  %v7186_v36 = vld [vmem:[#allocation10 + $0x90] sm:$0xff]   ;;  %v7187_v37 = vld [vmem:[#allocation10 + $0x58] sm:$0xff]  }
 0x583   :  { %v7188_v38 = vld [vmem:[#allocation10 + $0xd8] sm:$0xff]  }
 0x585   :  { %4938 = vmatpush1.bf16.msra.mxu0 %v7109_v39  ;;  %5020 = vmatpush1.bf16.msra.mxu1 %v7112_v40  ;;  %v7189_v39 = vld [vmem:[#allocation10 + $0x18] sm:$0xff]  }
 0x586   :  { %4939 = vmatprep.subr.bf16.mxu0 %v7117_v41  ;;  %5021 = vmatprep.subr.bf16.mxu1 %v7120_v42  ;;  %v7190_v40 = vld [vmem:[#allocation10 + $0x98] sm:$0xff]   ;;  %v7191_v41 = vld [vmem:[#allocation10 + $0x60] sm:$0xff]  }
 0x587   :  { %v7192_v42 = vld [vmem:[#allocation10 + $0xe0] sm:$0xff]  }
 0x589   :  { %4940 = vmatpush1.bf16.msra.mxu0 %v7115_v16  ;;  %5022 = vmatpush1.bf16.msra.mxu1 %v7118_v43  ;;  %v7193_v16 = vld [vmem:[#allocation10 + $0x20] sm:$0xff]  }
 0x58a   :  { %4941 = vmatprep.subr.bf16.mxu0 %v7123_v44  ;;  %5023 = vmatprep.subr.bf16.mxu1 %v7126_v45  ;;  %v7194_v43 = vld [vmem:[#allocation10 + $0xa0] sm:$0xff]   ;;  %v7195_v44 = vld [vmem:[#allocation10 + $0x68] sm:$0xff]  }
 0x58b   :  { %v7196_v45 = vld [vmem:[#allocation10 + $0xe8] sm:$0xff]  }
 0x58d   :  { %4942 = vmatpush1.bf16.msra.mxu0 %v7121_v46  ;;  %5024 = vmatpush1.bf16.msra.mxu1 %v7124_v20  ;;  %v7197_v46 = vld [vmem:[#allocation10 + $0x28] sm:$0xff]  }
 0x58e   :  { %4943 = vmatprep.subr.bf16.mxu0 %v7129_v47  ;;  %5025 = vmatprep.subr.bf16.mxu1 %v7132_v49  ;;  %v7198_v20 = vld [vmem:[#allocation10 + $0xa8] sm:$0xff]   ;;  %v7199_v47 = vld [vmem:[#allocation10 + $0x70] sm:$0xff]  }
 0x58f   :  { %v7200_v49 = vld [vmem:[#allocation10 + $0xf0] sm:$0xff]  }
 0x591   :  { %4944 = vmatpush1.bf16.msra.mxu0 %v7127_v23  ;;  %5026 = vmatpush1.bf16.msra.mxu1 %v7130_v50  ;;  %v7201_v23 = vld [vmem:[#allocation10 + $0x30] sm:$0xff]  }
 0x592   :  { %4945 = vmatprep.subr.bf16.mxu0 %v7135_v51  ;;  %5027 = vmatprep.subr.bf16.mxu1 %v7138_v52  ;;  %v7202_v50 = vld [vmem:[#allocation10 + $0xb0] sm:$0xff]   ;;  %v7203_v51 = vld [vmem:[#allocation10 + $0x78] sm:$0xff]  }
 0x593   :  { %v7204_v52 = vld [vmem:[#allocation10 + $0xf8] sm:$0xff]  }
 0x595   :  { %4946 = vmatpush1.bf16.msra.mxu0 %v7133_v54  ;;  %5028 = vmatpush1.bf16.msra.mxu1 %v7136_v28  ;;  %v7205_v54 = vld [vmem:[#allocation10 + $0x38] sm:$0xff]  }
 0x596   :  { %4947 = vmatprep.subr.bf16.mxu0 %v7141_v56  ;;  %5029 = vmatprep.subr.bf16.mxu1 %v7144_v58  ;;  %v7206_v28 = vld [vmem:[#allocation10 + $0xb8] sm:$0xff]  }
 0x597   :  { %v4224_v56 = vld [vmem:[#allocation8 + $0x10] sm:$0xf] }
 0x598   :  { %v4229_v58 = vrot.slane %v4224_v56, %v7520_v9 }
 0x599   :  { %4948 = vmatpush1.bf16.msra.mxu0 %v7139_v59  ;;  %5030 = vmatpush1.bf16.msra.mxu1 %v7142_v60  ;;  %v4237_v59 = vrot.slane %v4224_v56, %v7524_v11  ;;  %v4233_v60 = vrot.slane %v4224_v56, %v7522_v10 }
 0x59a   :  { %4949 = vmatprep.subr.bf16.mxu0 %v7147_v61  ;;  %5031 = vmatprep.subr.bf16.mxu1 %v7150_v63  ;;  %v4241_v61 = vrot.slane %v4224_v56, %v7526_v12 }
 0x59d   :  { %4950 = vmatpush1.bf16.msra.mxu0 %v7145_v0  ;;  %5032 = vmatpush1.bf16.msra.mxu1 %v7148_v1 }
 0x59e   :  { %4951 = vmatprep.subr.bf16.mxu0 %v7153_v2  ;;  %5033 = vmatprep.subr.bf16.mxu1 %v7156_v3 }
 0x5a1   :  { %4952 = vmatpush1.bf16.msra.mxu0 %v7151_v4  ;;  %5034 = vmatpush1.bf16.msra.mxu1 %v7154_v5 }
 0x5a2   :  { %4953 = vmatprep.subr.bf16.mxu0 %v7159_v6  ;;  %5035 = vmatprep.subr.bf16.mxu1 %v7162_v7 }
 0x5a5   :  { %4954 = vmatpush1.bf16.msra.mxu0 %v7157_v8  ;;  %5036 = vmatpush1.bf16.msra.mxu1 %v7160_v13 }
 0x5a6   :  { %4955 = vmatprep.subr.bf16.mxu0 %v7165_v15  ;;  %5037 = vmatprep.subr.bf16.mxu1 %v7168_v17 }
 0x5a9   :  { %4956 = vmatpush1.bf16.msra.mxu0 %v7163_v48  ;;  %5038 = vmatpush1.bf16.msra.mxu1 %v7166_v18 }
 0x5aa   :  { %4957 = vmatprep.subr.bf16.mxu0 %v7171_v55  ;;  %5039 = vmatprep.subr.bf16.mxu1 %v7174_v21  ;;  %v6060_v21 = vld [vmem:[#allocation11] ss:$0 sm:$0xff] }
 0x5ad   :  { %4958 = vmatpush1.bf16.msra.mxu0 %v7169_v53  ;;  %5040 = vmatpush1.bf16.msra.mxu1 %v7172_v22 }
 0x5ae   :  { %6093 = vmatprep.subr.bf16.mxu0 %v7175_v57  ;;  %6115 = vmatprep.subr.bf16.mxu1 %v7176_v25 }
 0x5b0   :  { %4960 = vmatmul.mubr.bf16.vlgmr.msra.gmra.mrb[16].mxu0 %v4092_v29  ;;  %5042 = vmatmul.mubr.bf16.vlgmr.msra.gmra.mrb[16].mxu1 %v4092_v29 }
 0x5b1   :  { %6094 = vmatpush3.bf16.msra.mxu0 %v7177_v26  ;;  %6116 = vmatpush3.bf16.msra.mxu1 %v7178_v27 }
 0x5b2   :  { %6095 = vmatprep.subr.bf16.mxu0 %v7179_v62  ;;  %6117 = vmatprep.subr.bf16.mxu1 %v7180_v30 }
 0x5b5   :  { %6096 = vmatpush3.bf16.msra.mxu0 %v7181_v31  ;;  %6118 = vmatpush3.bf16.msra.mxu1 %v7182_v32 }
 0x5b6   :  { %6097 = vmatprep.subr.bf16.mxu0 %v7183_v33  ;;  %6119 = vmatprep.subr.bf16.mxu1 %v7184_v34 }
 0x5b9   :  { %6098 = vmatpush3.bf16.msra.mxu0 %v7185_v35  ;;  %6120 = vmatpush3.bf16.msra.mxu1 %v7186_v36 }
 0x5ba   :  { %6099 = vmatprep.subr.bf16.mxu0 %v7187_v37  ;;  %6121 = vmatprep.subr.bf16.mxu1 %v7188_v38 }
 0x5bd   :  { %6100 = vmatpush3.bf16.msra.mxu0 %v7189_v39  ;;  %6122 = vmatpush3.bf16.msra.mxu1 %v7190_v40 }
 0x5be   :  { %6101 = vmatprep.subr.bf16.mxu0 %v7191_v41  ;;  %6123 = vmatprep.subr.bf16.mxu1 %v7192_v42 }
 0x5c1   :  { %6102 = vmatpush3.bf16.msra.mxu0 %v7193_v16  ;;  %6124 = vmatpush3.bf16.msra.mxu1 %v7194_v43 }
 0x5c2   :  { %6103 = vmatprep.subr.bf16.mxu0 %v7195_v44  ;;  %6125 = vmatprep.subr.bf16.mxu1 %v7196_v45 }
 0x5c5   :  { %6104 = vmatpush3.bf16.msra.mxu0 %v7197_v46  ;;  %6126 = vmatpush3.bf16.msra.mxu1 %v7198_v20 }
 0x5c6   :  { %6105 = vmatprep.subr.bf16.mxu0 %v7199_v47  ;;  %6127 = vmatprep.subr.bf16.mxu1 %v7200_v49 }
 0x5c9   :  { %6106 = vmatpush3.bf16.msra.mxu0 %v7201_v23  ;;  %6128 = vmatpush3.bf16.msra.mxu1 %v7202_v50 }
 0x5ca   :  { %6107 = vmatprep.subr.bf16.mxu0 %v7203_v51  ;;  %6129 = vmatprep.subr.bf16.mxu1 %v7204_v52 }
 0x5cd   :  { %6108 = vmatpush3.bf16.msra.mxu0 %v7205_v54  ;;  %6130 = vmatpush3.bf16.msra.mxu1 %v7206_v28 }
 0x683   :  { %v4961_v63 = vpop.f32.mrb[16].mxu0  ;;  %v5043_v0 = vpop.f32.mrb[16].mxu1 }
 0x684   :  { %v6153_v1 = vadd.f32 %v4961_v63, %v4229_v58  ;;  %v6155_v2 = vadd.f32 %v5043_v0, %v4237_v59  ;;  %v4963_v3 = vpop.f32.mrb[17].mxu0  ;;  %v5045_v4 = vpop.f32.mrb[17].mxu1 }
 0x685   :  { %v6154_v5 = vadd.f32 %v4963_v3, %v4233_v60  ;;  %v6156_v6 = vadd.f32 %v5045_v4, %v4241_v61  ;;  %v4965_v7 = vpop.f32.mrb[18].mxu0  ;;  %v5047_v8 = vpop.f32.mrb[18].mxu1 }
 0x686   :  { %v5050_v13 = vmax.f32 %v6153_v1, 0.0  ;;  %v5052_v14 = vmax.f32 %v6155_v2, 0.0  ;;  %v4966_v15 = vpop.f32.mrb[19].mxu0  ;;  %v5048_v9 = vpop.f32.mrb[19].mxu1 }
 0x687   :  { %v5051_v17 = vmax.f32 %v6154_v5, 0.0  ;;  %v5053_v11 = vmax.f32 %v6156_v6, 0.0 }
 0x688   :  { %v5054_v18 = vpack.c.bf16 %v5050_v13, %v5050_v13  ;;  %v5056_v12 = vpack.c.bf16 %v5052_v14, %v5052_v14 }
 0x689   :  { %v5055_v48 = vpack.c.bf16 %v5051_v17, %v5051_v17  ;;  %v5057_v10 = vpack.c.bf16 %v5053_v11, %v5053_v11 }
 0x68b   :  { %5353 = vmatprep.mubr.bf16.mxu0 %v5055_v48  ;;  %5393 = vmatprep.mubr.bf16.mxu1 %v5057_v10 }
 0x68c   :  { %5354 = vmatmul.mubr.bf16.vlgmr.msra.gmra.mrb[20].mxu0 %v5054_v18  ;;  %5394 = vmatmul.mubr.bf16.vlgmr.msra.gmra.mrb[20].mxu1 %v5056_v12 }
 0x75f   :  { %v6109_v19 = vpop.f32.mrb[20].mxu0  ;;  %v6131_v55 = vpop.f32.mrb[20].mxu1 }
 0x760   :  { %v6110_v53 = vpop.f32.mrb[21].mxu0  ;;  %v6132_v22 = vpop.f32.mrb[21].mxu1 }
 0x761   :  { %v6111_v24 = vadd.f32 %v6110_v53, %v6109_v19  ;;  %v6133_v57 = vadd.f32 %v6132_v22, %v6131_v55  ;;  %v6112_v25 = vpop.f32.mrb[22].mxu0  ;;  %v6134_v26 = vpop.f32.mrb[22].mxu1 }
 0x762   :  { %v6113_v27 = vpop.f32.mrb[23].mxu0  ;;  %v6135_v29 = vpop.f32.mrb[23].mxu1 }
 0x763   :  { %v5356_v62 = vadd.f32 %v6111_v24, %v6060_v21 }
 0x765   :  { %v5396_v30 = vadd.f32 %v6133_v57, %v5356_v62 }
 0x767   :  { %5401 = vst [vmem:[#allocation13] sm:$0xff] %v5396_v30 }
 0x768   :  { %7350 = shalt.err (!%p7347_p10)
}
 0x769   :  { %s7351_s9 = scalar_lea.hbm %s7622_s7, 128 }
 0x76a   :  { %p7352_p11 = scmp.ne.s32.totalorder %s7622_s7, %s7351_s9  ;;  %p7355_p12 = scmp.lt.u32.totalorder %s7351_s9, %s7622_s7 }
 0x76c   :  { %p7357_p13 = pnand %p7355_p12, %p7352_p11 }
 0x76e   :  { %7360 = shalt.err (!%p7357_p13)
}
 0x76f   :  { %5411 = dma.vmem_to_hbm [thread:$0]  %s5409_s6, 128, %s7622_s7, [#allocation4]  }
 0x770   :  { %7369 = dma.done.wait [#allocation4], 128  }
 0x771   :  { %7370 = vsyncadd [#allocation4], 4294967168 }
 0x772   :  { %5415 = vsyncpa [#allocation3], 1 }
 0x773   :  { %5416 = vsyncpa [#allocation6], 1 }
 0x774   :  { %5417 = vsyncpa [#allocation9], 1 }
 0x775   :  { %5418 = vsyncpa [#allocation12], 1 }
 0x776   :  { %5419 = vsyncpa [#allocation4], 1 }

</bundles_post_ra>
